<compile_context>
chip_gen: v7x
topology: tpu7x:2x2x1
jax: 0.10.0
libtpu: 0.0.40
codegen_flags: <defaults>
</compile_context>

<pallas_src>
import jax
import jax.numpy as jnp
import numpy as np
from jax.experimental import pallas as pl
from jax.experimental.pallas import tpu as pltpu

# Constants from the PyTorch script
N_EMBD = 384
BLOCK_SIZE = 256
NUM_HEADS = 6
HEAD_SIZE = 64          # num_heads * head_size == n_embd


def _mha_fused_kernel(x_ref, wqkv_ref, wproj_ref, b_ref, o_ref):
    """Grid (B, H).  One batch element / one head per step; H is a reduction.

    x_ref:     (1, T, C)     activations for batch element b
    wqkv_ref:  (1, C, 3*hs)  [Wq | Wk | Wv] for head h
    wproj_ref: (hs, C)       rows of the output projection belonging to head h
    b_ref:     (1, C)        output-projection bias
    o_ref:     (1, T, C)     resident accumulator / final output (f32)
    """
    h = pl.program_id(1)
    T = x_ref.shape[1]
    C = x_ref.shape[2]
    hs = wproj_ref.shape[0]

    # Initialize the resident output block with the bias on the first head.
    @pl.when(h == 0)
    def _init():
        o_ref[...] = jnp.broadcast_to(b_ref[...][None], (1, T, C))

    # ---- fused QKV projection: one wide (T,C)@(C,3*hs) matmul (bf16 in, f32 acc).
    x = x_ref[0].astype(jnp.bfloat16)                 # (T, C)
    wqkv = wqkv_ref[0].astype(jnp.bfloat16)           # (C, 3*hs)
    qkv = jnp.dot(x, wqkv, preferred_element_type=jnp.float32)     # (T, 3*hs) f32
    q = qkv[:, :hs]
    k = qkv[:, hs:2 * hs]
    v = qkv[:, 2 * hs:]

    # ---- scaled causal scores: contract last dims of q and k (no k.T materialized).
    scale = float(hs) ** -0.5
    scores = jax.lax.dot_general(
        q.astype(jnp.bfloat16), k.astype(jnp.bfloat16),
        dimension_numbers=(((1,), (1,)), ((), ())),
        preferred_element_type=jnp.float32) * scale                # (T, T) f32

    row = jax.lax.broadcasted_iota(jnp.int32, (T, T), 0)
    col = jax.lax.broadcasted_iota(jnp.int32, (T, T), 1)
    scores = jnp.where(col <= row, scores, -1e30)    # causal mask, finite fill

    # ---- softmax in f32; divide moved to the EUP slot.
    m = jnp.max(scores, axis=-1, keepdims=True)
    p = jnp.exp(scores - m)
    denom = jnp.sum(p, axis=-1, keepdims=True)
    probs = p * pl.reciprocal(denom, approx=True)
    # TODO(synk): attention-probability dropout omitted (eval-mode / p=0 semantics).

    # ---- weighted values + this head's slice of the output projection,
    #      accumulated into the lane-dense (T, C) resident output block.
    head_out = jnp.dot(probs.astype(jnp.bfloat16), v.astype(jnp.bfloat16),
                       preferred_element_type=jnp.float32)         # (T, hs)
    wp = wproj_ref[...].astype(jnp.bfloat16)                        # (hs, C)
    o_ref[0] += jnp.dot(head_out.astype(jnp.bfloat16), wp,
                        preferred_element_type=jnp.float32)
    # TODO(synk): output dropout omitted (eval-mode semantics).


def multi_head_attention(x, wq, wk, wv, w_proj, b_proj):
    """x: (B, T, C); wq/wk/wv: (H, C, hs); w_proj: (H*hs, C); b_proj: (1, C)."""
    B, T, C = x.shape
    H, _, hs = wq.shape

    # One-time host-side fusion of the per-head Q/K/V weights: (H, C, 3*hs).
    w_qkv = jnp.concatenate([wq, wk, wv], axis=-1)

    return pl.pallas_call(
        _mha_fused_kernel,
        out_shape=jax.ShapeDtypeStruct((B, T, C), jnp.float32),
        grid_spec=pltpu.PrefetchScalarGridSpec(
            num_scalar_prefetch=0,
            grid=(B, H),
            in_specs=[
                pl.BlockSpec((1, T, C), lambda b, h: (b, 0, 0)),        # x
                pl.BlockSpec((1, C, 3 * hs), lambda b, h: (h, 0, 0)),   # fused QKV
                pl.BlockSpec((hs, C), lambda b, h: (h, 0)),             # proj rows
                pl.BlockSpec((1, C), lambda b, h: (0, 0)),              # proj bias
            ],
            out_specs=pl.BlockSpec((1, T, C), lambda b, h: (b, 0, 0)),
        ),
        compiler_params=pltpu.CompilerParams(
            dimension_semantics=("parallel", "arbitrary")),
    )(x, w_qkv, w_proj, b_proj)


def _reference(x, wq, wk, wv, w_proj, b_proj):
    # Pure-JAX f32 reference matching the PyTorch forward (eval mode).
    B, T, C = x.shape
    H, _, hs = wq.shape
    outs = []
    tril = jnp.tril(jnp.ones((T, T)))
    for h in range(H):
        q = x @ wq[h]
        k = x @ wk[h]
        v = x @ wv[h]
        w = (q @ jnp.swapaxes(k, -1, -2)) * (hs ** -0.5)
        w = jnp.where(tril[None] == 0, -jnp.inf, w)
        w = jax.nn.softmax(w, axis=-1)
        outs.append(w @ v)
    cat = jnp.concatenate(outs, axis=-1)
    return cat @ w_proj + b_proj


if __name__ == "__main__":
    B, T = 2, BLOCK_SIZE                 # T == block_size (256)
    key = jax.random.PRNGKey(0)
    kx, kq, kk, kv, kw, kb = jax.random.split(key, 6)

    x = jax.random.normal(kx, (B, T, N_EMBD), dtype=jnp.float32)
    wq = 0.02 * jax.random.normal(kq, (NUM_HEADS, N_EMBD, HEAD_SIZE), jnp.float32)
    wk = 0.02 * jax.random.normal(kk, (NUM_HEADS, N_EMBD, HEAD_SIZE), jnp.float32)
    wv = 0.02 * jax.random.normal(kv, (NUM_HEADS, N_EMBD, HEAD_SIZE), jnp.float32)
    w_proj = 0.02 * jax.random.normal(kw, (NUM_HEADS * HEAD_SIZE, N_EMBD), jnp.float32)
    b_proj = 0.02 * jax.random.normal(kb, (1, N_EMBD), jnp.float32)

    out = multi_head_attention(x, wq, wk, wv, w_proj, b_proj)
    out = jax.block_until_ready(out)

    ref = _reference(x, wq, wk, wv, w_proj, b_proj)
    # bf16 MXU inputs (f32 accumulation) vs pure-f32 reference -> bf16-level tolerance.
    np.testing.assert_allclose(np.asarray(out), np.asarray(ref), atol=2e-2, rtol=2e-2)

    print("KERNEL_OK")
</pallas_src>

<mosaic_0001>
module attributes {stable_mosaic.version = 11 : i64} {
  func.func @_mha_fused_kernel(%arg0: i32, %arg1: i32, %arg2: memref<1x256x384xf32, #tpu.memory_space<vmem>>, %arg3: memref<1x384x192xf32, #tpu.memory_space<vmem>>, %arg4: memref<64x384xf32, #tpu.memory_space<vmem>>, %arg5: memref<1x384xf32, #tpu.memory_space<vmem>>, %arg6: memref<1x256x384xf32, #tpu.memory_space<vmem>>) attributes {dimension_semantics = [#tpu.dimension_semantics<parallel>, #tpu.dimension_semantics<arbitrary>], iteration_bounds = array<i64: 2, 6>, scalar_prefetch = 0 : i64, scratch_operands = 0 : i64, tpu.core_type = #tpu.core_type<tc>, window_params = [{transform_indices = @transform_0, window_bounds = array<i64: 1, 256, 384>}, {transform_indices = @transform_1, window_bounds = array<i64: 1, 384, 192>}, {transform_indices = @transform_2, window_bounds = array<i64: 64, 384>}, {pipeline_mode = #tpu.pipeline_mode<synchronous>, transform_indices = @transform_3, window_bounds = array<i64: 1, 384>}, {transform_indices = @transform_4, window_bounds = array<i64: 1, 256, 384>}]} {
    %c0_i32 = arith.constant 0 : i32
    %0 = arith.cmpi eq, %arg1, %c0_i32 : i32
    %1 = arith.extui %0 : i1 to i32
    %c0_i32_0 = arith.constant 0 : i32
    %2 = arith.cmpi ne, %1, %c0_i32_0 : i32
    scf.if %2 {
      %c0_21 = arith.constant 0 : index
      %c0_22 = arith.constant 0 : index
      %46 = vector.load %arg5[%c0_21, %c0_22] : memref<1x384xf32, #tpu.memory_space<vmem>>, vector<1x384xf32>
      %47 = vector.shape_cast %46 : vector<1x384xf32> to vector<1x1x384xf32>
      %48 = vector.shape_cast %47 : vector<1x1x384xf32> to vector<1x1x384xf32>
      %49 = vector.broadcast %48 : vector<1x1x384xf32> to vector<1x256x384xf32>
      %c0_23 = arith.constant 0 : index
      %c0_24 = arith.constant 0 : index
      %c0_25 = arith.constant 0 : index
      %50 = vector.load %arg6[%c0_23, %c0_24, %c0_25] : memref<1x256x384xf32, #tpu.memory_space<vmem>>, vector<1x256x384xf32>
      tpu.vector_store %arg6[%c0_23, %c0_24, %c0_25], %49 {strides = array<i32>} : memref<1x256x384xf32, #tpu.memory_space<vmem>>, vector<1x256x384xf32>,
    } else {
    }
    %c0 = arith.constant 0 : index
    %c0_1 = arith.constant 0 : index
    %c0_2 = arith.constant 0 : index
    %3 = vector.load %arg2[%c0, %c0_1, %c0_2] : memref<1x256x384xf32, #tpu.memory_space<vmem>>, vector<1x256x384xf32>
    %4 = vector.shape_cast %3 : vector<1x256x384xf32> to vector<256x384xf32>
    %5 = arith.truncf %4 : vector<256x384xf32> to vector<256x384xbf16>
    %c0_3 = arith.constant 0 : index
    %c0_4 = arith.constant 0 : index
    %c0_5 = arith.constant 0 : index
    %6 = vector.load %arg3[%c0_3, %c0_4, %c0_5] : memref<1x384x192xf32, #tpu.memory_space<vmem>>, vector<1x384x192xf32>
    %7 = vector.shape_cast %6 : vector<1x384x192xf32> to vector<384x192xf32>
    %8 = arith.truncf %7 : vector<384x192xf32> to vector<384x192xbf16>
    %cst = arith.constant dense<0.000000e+00> : vector<256x192xf32>
    %9 = tpu.matmul %5, %8, %cst {dimension_numbers = #tpu.dot_dimension_numbers<[1], [0], [0], [1], [0, 0, 1, 1], [], []>} : vector<256x384xbf16>, vector<384x192xbf16>, vector<256x192xf32> -> vector<256x192xf32>
    %10 = vector.extract_strided_slice %9 {offsets = [0, 0], sizes = [256, 64], strides = [1, 1]} : vector<256x192xf32> to vector<256x64xf32>
    %11 = vector.extract_strided_slice %9 {offsets = [0, 64], sizes = [256, 64], strides = [1, 1]} : vector<256x192xf32> to vector<256x64xf32>
    %12 = vector.extract_strided_slice %9 {offsets = [0, 128], sizes = [256, 64], strides = [1, 1]} : vector<256x192xf32> to vector<256x64xf32>
    %13 = arith.truncf %10 : vector<256x64xf32> to vector<256x64xbf16>
    %14 = arith.truncf %11 : vector<256x64xf32> to vector<256x64xbf16>
    %cst_6 = arith.constant dense<0.000000e+00> : vector<256x256xf32>
    %15 = tpu.matmul %13, %14, %cst_6 {dimension_numbers = #tpu.dot_dimension_numbers<[1], [1], [0], [0], [0, 0, 1, 0], [], []>} : vector<256x64xbf16>, vector<256x64xbf16>, vector<256x256xf32> -> vector<256x256xf32>
    %cst_7 = arith.constant 1.250000e-01 : f32
    %16 = vector.broadcast %cst_7 : f32 to vector<256x256xf32>
    %17 = arith.mulf %15, %16 : vector<256x256xf32>
    %18 = tpu.iota {dimensions = array<i32: 0>} : vector<256x256xi32>
    %19 = tpu.iota {dimensions = array<i32: 1>} : vector<256x256xi32>
    %20 = arith.cmpi sle, %19, %18 : vector<256x256xi32>
    %cst_8 = arith.constant -1.000000e+30 : f32
    %21 = vector.broadcast %cst_8 : f32 to vector<256x256xf32>
    %22 = arith.select %20, %17, %21 : vector<256x256xi1>, vector<256x256xf32>
    %cst_9 = arith.constant dense<0xFF800000> : vector<256xf32>
    %23 = vector.multi_reduction <maximumf>, %22, %cst_9 [1] : vector<256x256xf32> to vector<256xf32>
    %24 = vector.shape_cast %23 : vector<256xf32> to vector<256x1xf32>
    %25 = vector.broadcast %24 : vector<256x1xf32> to vector<256x256xf32>
    %26 = arith.subf %22, %25 : vector<256x256xf32>
    %27 = math.exp %26 : vector<256x256xf32>
    %cst_10 = arith.constant dense<0.000000e+00> : vector<256xf32>
    %28 = vector.multi_reduction <add>, %27, %cst_10 [1] : vector<256x256xf32> to vector<256xf32>
    %29 = vector.shape_cast %28 : vector<256xf32> to vector<256x1xf32>
    %30 = tpu.reciprocal %29 {approx = true} : vector<256x1xf32> -> vector<256x1xf32>
    %31 = vector.broadcast %30 : vector<256x1xf32> to vector<256x256xf32>
    %32 = arith.mulf %27, %31 : vector<256x256xf32>
    %33 = arith.truncf %32 : vector<256x256xf32> to vector<256x256xbf16>
    %34 = arith.truncf %12 : vector<256x64xf32> to vector<256x64xbf16>
    %cst_11 = arith.constant dense<0.000000e+00> : vector<256x64xf32>
    %35 = tpu.matmul %33, %34, %cst_11 {dimension_numbers = #tpu.dot_dimension_numbers<[1], [0], [0], [1], [0, 0, 1, 1], [], []>} : vector<256x256xbf16>, vector<256x64xbf16>, vector<256x64xf32> -> vector<256x64xf32>
    %c0_12 = arith.constant 0 : index
    %c0_13 = arith.constant 0 : index
    %36 = vector.load %arg4[%c0_12, %c0_13] : memref<64x384xf32, #tpu.memory_space<vmem>>, vector<64x384xf32>
    %37 = arith.truncf %36 : vector<64x384xf32> to vector<64x384xbf16>
    %c0_14 = arith.constant 0 : index
    %c0_15 = arith.constant 0 : index
    %c0_16 = arith.constant 0 : index
    %38 = vector.load %arg6[%c0_14, %c0_15, %c0_16] : memref<1x256x384xf32, #tpu.memory_space<vmem>>, vector<1x256x384xf32>
    %39 = vector.shape_cast %38 : vector<1x256x384xf32> to vector<256x384xf32>
    %40 = arith.truncf %35 : vector<256x64xf32> to vector<256x64xbf16>
    %cst_17 = arith.constant dense<0.000000e+00> : vector<256x384xf32>
    %41 = tpu.matmul %40, %37, %cst_17 {dimension_numbers = #tpu.dot_dimension_numbers<[1], [0], [0], [1], [0, 0, 1, 1], [], []>} : vector<256x64xbf16>, vector<64x384xbf16>, vector<256x384xf32> -> vector<256x384xf32>
    %42 = arith.addf %39, %41 : vector<256x384xf32>
    %c0_18 = arith.constant 0 : index
    %c0_19 = arith.constant 0 : index
    %c0_20 = arith.constant 0 : index
    %43 = vector.load %arg6[%c0_18, %c0_19, %c0_20] : memref<1x256x384xf32, #tpu.memory_space<vmem>>, vector<1x256x384xf32>
    %44 = vector.shape_cast %43 : vector<1x256x384xf32> to vector<256x384xf32>
    %45 = vector.shape_cast %42 : vector<256x384xf32> to vector<1x256x384xf32>
    tpu.vector_store %arg6[%c0_18, %c0_19, %c0_20], %45 {strides = array<i32>} : memref<1x256x384xf32, #tpu.memory_space<vmem>>, vector<1x256x384xf32>,
    return
  }
  func.func @transform_0(%arg0: i32, %arg1: i32) -> (i32, i32, i32) {
    %c0_i32 = arith.constant 0 : i32
    %c0_i32_0 = arith.constant 0 : i32
    %c0_i32_1 = arith.constant 0 : i32
    return %arg0, %c0_i32, %c0_i32_0 : i32, i32, i32
  }
  func.func @transform_1(%arg0: i32, %arg1: i32) -> (i32, i32, i32) {
    %c0_i32 = arith.constant 0 : i32
    %c0_i32_0 = arith.constant 0 : i32
    %c0_i32_1 = arith.constant 0 : i32
    return %arg1, %c0_i32, %c0_i32_0 : i32, i32, i32
  }
  func.func @transform_2(%arg0: i32, %arg1: i32) -> (i32, i32) {
    %c0_i32 = arith.constant 0 : i32
    %c0_i32_0 = arith.constant 0 : i32
    return %arg1, %c0_i32 : i32, i32
  }
  func.func @transform_3(%arg0: i32, %arg1: i32) -> (i32, i32) {
    %c0_i32 = arith.constant 0 : i32
    %c0_i32_0 = arith.constant 0 : i32
    %c0_i32_1 = arith.constant 0 : i32
    return %c0_i32, %c0_i32_0 : i32, i32
  }
  func.func @transform_4(%arg0: i32, %arg1: i32) -> (i32, i32, i32) {
    %c0_i32 = arith.constant 0 : i32
    %c0_i32_0 = arith.constant 0 : i32
    %c0_i32_1 = arith.constant 0 : i32
    return %arg0, %c0_i32, %c0_i32_0 : i32, i32, i32
  }
}

</mosaic_0001>

<bundles_post_ra>
// kernel: tpu_custom_call.1
= control target key start
LH: loop header
LB: loop body
LE: loop exit
PB: predicated region body
PF: predicated region fallthrough
CT: control target
= control target key end

     0   :  { %9 = vsyncpa [#allocation3], 0  ;;  %s5624_s0 = inlined_call_operand.vmem [shape: f32[2,256,384], index: 0, kind: input, shape index: {}]   ;;  %s5625_s1 = inlined_call_operand.vmem [shape: f32[6,384,192], index: 1, kind: input, shape index: {}]   ;;  %s5626_s2 = inlined_call_operand.vmem [shape: f32[384,384], index: 2, kind: input, shape index: {}]   ;;  %s5627_s3 = inlined_call_operand.vmem [shape: f32[1,384], index: 3, kind: input, shape index: {}]   ;;  %s5628_s4 = inlined_call_operand.hbm [shape: f32[2,256,384], index: 4, kind: output, shape index: {}]  }
   0x1   :  { %11 = vsyncpa [#allocation3 + $0x1], 0  ;;  %s3928_s15 = smov 0   ;;  %s3930_s16 = smov 0  }
   0x2   :  { %s3932_s17 = smov 0   ;;  %s3934_s18 = smov 0  }
   0x3   :  { %s3936_s19 = smov 0   ;;  %s3938_s20 = smov 0  }
   0x4   :  { %s3940_s21 = smov 0   ;;  %s3942_s22 = smov 0  }
   0x5 LB: > { %5648 = sst [smem:[#allocation5_spill]] %s3892_s21  ;;  %s3169_s23 = sadd.s32 4294967295, %s3896_s22   ;;  %s3896_s22 = sphi %s3942_s22, %s17_s22   ;;  %s3892_s21 = sphi %s3940_s21, %s5696_s21   ;;  %s3888_s20 = sphi %s3938_s20, %s5701_s20   ;;  %s3884_s19 = sphi %s3936_s19, %s5694_s19   ;;  %s3880_s18 = sphi %s3934_s18, %s5700_s18   ;;  %s3876_s17 = sphi %s3932_s17, %s5699_s17   ;;  %s3872_s16 = sphi %s3930_s16, %s5698_s16   ;;  %s3868_s15 = sphi %s3928_s15, %s5697_s15  }
   0x6   : > { %s3170_s24 = sadd.s32 4294967294, %s3896_s22   ;;  %s26_s25 = sadd.s32 1, %s3888_s20 }
   0x7   : > { %p27_p0 = scmp.ge.s32.totalorder %s26_s25, 6  ;;  %s29_s26 = sadd.s32 1, %s3892_s21 }
   0x8   : > { %p145_p1 = scmp.ne.s32.totalorder %s3876_s17, %s3872_s16  ;;  %p146_p2 = scmp.eq.s32.totalorder %s3169_s23, 11 }
   0x9   : > { %s5703_s25 = smov (%p27_p0, %s26_s25), 0  ;;  %s5705_s26 = smov (!%p27_p0, %s29_s26), %s3892_s21 }
   0xa   : > { %5649 = sst [smem:[#allocation6_spill]] %s5703_s25  ;;  %p3977_p3 = por %p146_p2, %p145_p1 }
   0xb   : > { %p151_p4 = scmp.ne.s32.totalorder %s3872_s16, %s3868_s15  ;;  %p31_p5 = scmp.ge.s32.totalorder %s5705_s26, 2 }
   0xc   : > { %p152_p6 = scmp.eq.s32.totalorder %s3170_s24, 11  ;;  %p3173_p7 = scmp.ge.s32.totalorder %s3896_s22, 1 }
   0xd   : > { %p199_p8 = scmp.lt.s32.totalorder %s3896_s22, 13  ;;  %s5707_s26 = smov (%p31_p5, %s5705_s26), 0 }
   0xe   : > { %5651 = sst [smem:[#allocation7_spill]] %s5707_s26  ;;  %p3987_p9 = por %p152_p6, %p151_p4 }
   0xf   : > { %p200_p10 = pnand %p3173_p7, %p199_p8  ;;  %s132_s29 = ssub.s32 %s3892_s21, %s5707_s26 }
  0x10   : > { %s135_s30 = sadd.s32 1, %s3876_s17  ;;  %p133_p11 = scmp.eq.s32.totalorder %s132_s29, 0 }
  0x11   : > { %203 = sbr.rel (%p200_p10) target bundleno = 1980 (0x7bc), region = 36 }
  0x12   : > { %s3995_s5 = scalar_select %p133_p11, %s3876_s17, %s135_s30  }
  0x18   : > { %s5630_s6 = sand.u32 1, %s3872_s16   ;;  %p236_p12 = scmp.lt.s32.totalorder %s3884_s19, 1 }
  0x19   : > { %s3530_s7 = smul.u32 768, %s5630_s6  ;;  %p241_p13 = scmp.lt.s32.totalorder %s3880_s18, 5 }
  0x1a   : > { %s237_s8 = scalar_select %p236_p12, %s3884_s19, 1 }
  0x1b   : > { %s3176_s9 = sshll.u32 %s3880_s18, 3  ;;  %p3178_p1 = scmp.ne.s32.totalorder %s3880_s18, 0 }
  0x1c   : > { %s3531_s10 = smul.u32 768, %s237_s8  ;;  %p247_p0 = scmp.lt.s32.totalorder %s3176_s9, 47  ;;  %v260_v0 = vlaneseq (!%p3178_p1)  ;;  %v258_v2 = vld [vmem:[%s5627_s3] sm:$0x7] (!%p3178_p1) }
  0x1d   : > { %s242_s11 = scalar_select %p241_p13, %s3880_s18, 5 }
  0x1e   : > { %s4008_s14 = scalar_lea.vmem %s5624_s0, %s3531_s10  ;;  %s5709_s9 = smov (!%p247_p0, %s3176_s9), 47  ;;  %v261_v1 = vshrl.u32 (!%p3178_p1), %v260_v0, 7 }
  0x1f   : > { %s3532_s23 = smul.u32 768, %s242_s11  ;;  %s4020_s8 = scalar_lea.vmem [#allocation2], %s3530_s7 }
  0x20   : > { %s3533_s26 = smul.u32 24, %s5709_s9  ;;  %v262_v3 = vsub.s32 (!%p3178_p1), 0, %v261_v1  ;;  %v266_v4 = vsub.s32 (!%p3178_p1), 1, %v261_v1  ;;  %v270_v5 = vsub.s32 (!%p3178_p1), 2, %v261_v1 }
  0x21   : > { %s4013_s30 = scalar_lea.vmem %s5625_s1, %s3532_s23  ;;  %257 = sbr.rel (%p3178_p1) target bundleno = 84 (0x54), region = 40 }
  0x22   : > { %s4018_s21 = scalar_lea.vmem %s5626_s2, %s3533_s26  ;;  %v263_v6 = vrot.slane (!%p3178_p1), %v258_v2, %v262_v3  ;;  %v4026_v7 = vrot.slane (!%p3178_p1), %v258_v2, %v266_v4  ;;  %v4028_v8 = vrot.slane (!%p3178_p1), %v258_v2, %v270_v5 }
  0x24   : > { %275 = vst [vmem:[%s4020_s8] sm:$0xff] (!%p3178_p1), %v263_v6  ;;  %278 = vst [vmem:[%s4020_s8 + $0x18] sm:$0xff] (!%p3178_p1), %v263_v6 }
  0x25   : > { %281 = vst [vmem:[%s4020_s8 + $0x30] sm:$0xff] (!%p3178_p1), %v263_v6  ;;  %284 = vst [vmem:[%s4020_s8 + $0x48] sm:$0xff] (!%p3178_p1), %v263_v6 }
  0x26   : > { %287 = vst [vmem:[%s4020_s8 + $0x60] sm:$0xff] (!%p3178_p1), %v263_v6  ;;  %290 = vst [vmem:[%s4020_s8 + $0x78] sm:$0xff] (!%p3178_p1), %v263_v6 }
  0x27   : > { %293 = vst [vmem:[%s4020_s8 + $0x90] sm:$0xff] (!%p3178_p1), %v263_v6  ;;  %296 = vst [vmem:[%s4020_s8 + $0xa8] sm:$0xff] (!%p3178_p1), %v263_v6 }
  0x28   : > { %299 = vst [vmem:[%s4020_s8 + $0xc0] sm:$0xff] %v263_v6  ;;  %302 = vst [vmem:[%s4020_s8 + $0xd8] sm:$0xff] %v263_v6 }
  0x29   : > { %305 = vst [vmem:[%s4020_s8 + $0xf0] sm:$0xff] %v263_v6  ;;  %308 = vst [vmem:[%s4020_s8 + $0x108] sm:$0xff] %v263_v6 }
  0x2a   : > { %311 = vst [vmem:[%s4020_s8 + $0x120] sm:$0xff] %v263_v6  ;;  %314 = vst [vmem:[%s4020_s8 + $0x138] sm:$0xff] %v263_v6 }
  0x2b   : > { %317 = vst [vmem:[%s4020_s8 + $0x150] sm:$0xff] %v263_v6  ;;  %320 = vst [vmem:[%s4020_s8 + $0x168] sm:$0xff] %v263_v6 }
  0x2c   : > { %323 = vst [vmem:[%s4020_s8 + $0x180] sm:$0xff] %v263_v6  ;;  %326 = vst [vmem:[%s4020_s8 + $0x198] sm:$0xff] %v263_v6 }
  0x2d   : > { %329 = vst [vmem:[%s4020_s8 + $0x1b0] sm:$0xff] %v263_v6  ;;  %332 = vst [vmem:[%s4020_s8 + $0x1c8] sm:$0xff] %v263_v6 }
  0x2e   : > { %335 = vst [vmem:[%s4020_s8 + $0x1e0] sm:$0xff] %v263_v6  ;;  %338 = vst [vmem:[%s4020_s8 + $0x1f8] sm:$0xff] %v263_v6 }
  0x2f   : > { %341 = vst [vmem:[%s4020_s8 + $0x210] sm:$0xff] %v263_v6  ;;  %344 = vst [vmem:[%s4020_s8 + $0x228] sm:$0xff] %v263_v6 }
  0x30   : > { %347 = vst [vmem:[%s4020_s8 + $0x240] sm:$0xff] %v263_v6  ;;  %350 = vst [vmem:[%s4020_s8 + $0x258] sm:$0xff] %v263_v6 }
  0x31   : > { %353 = vst [vmem:[%s4020_s8 + $0x270] sm:$0xff] %v263_v6  ;;  %356 = vst [vmem:[%s4020_s8 + $0x288] sm:$0xff] %v263_v6 }
  0x32   : > { %359 = vst [vmem:[%s4020_s8 + $0x2a0] sm:$0xff] %v263_v6  ;;  %362 = vst [vmem:[%s4020_s8 + $0x2b8] sm:$0xff] %v263_v6 }
  0x33   : > { %365 = vst [vmem:[%s4020_s8 + $0x2d0] sm:$0xff] %v263_v6  ;;  %368 = vst [vmem:[%s4020_s8 + $0x2e8] sm:$0xff] %v263_v6 }
  0x34   : > { %276 = vst [vmem:[%s4020_s8 + $0x8] sm:$0xff] %v4026_v7  ;;  %279 = vst [vmem:[%s4020_s8 + $0x20] sm:$0xff] %v4026_v7 }
  0x35   : > { %282 = vst [vmem:[%s4020_s8 + $0x38] sm:$0xff] %v4026_v7  ;;  %285 = vst [vmem:[%s4020_s8 + $0x50] sm:$0xff] %v4026_v7 }
  0x36   : > { %288 = vst [vmem:[%s4020_s8 + $0x68] sm:$0xff] %v4026_v7  ;;  %291 = vst [vmem:[%s4020_s8 + $0x80] sm:$0xff] %v4026_v7 }
  0x37   : > { %294 = vst [vmem:[%s4020_s8 + $0x98] sm:$0xff] %v4026_v7  ;;  %297 = vst [vmem:[%s4020_s8 + $0xb0] sm:$0xff] %v4026_v7 }
  0x38   : > { %300 = vst [vmem:[%s4020_s8 + $0xc8] sm:$0xff] %v4026_v7  ;;  %303 = vst [vmem:[%s4020_s8 + $0xe0] sm:$0xff] %v4026_v7 }
  0x39   : > { %306 = vst [vmem:[%s4020_s8 + $0xf8] sm:$0xff] %v4026_v7  ;;  %309 = vst [vmem:[%s4020_s8 + $0x110] sm:$0xff] %v4026_v7 }
  0x3a   : > { %312 = vst [vmem:[%s4020_s8 + $0x128] sm:$0xff] %v4026_v7  ;;  %315 = vst [vmem:[%s4020_s8 + $0x140] sm:$0xff] %v4026_v7 }
  0x3b   : > { %318 = vst [vmem:[%s4020_s8 + $0x158] sm:$0xff] %v4026_v7  ;;  %321 = vst [vmem:[%s4020_s8 + $0x170] sm:$0xff] %v4026_v7 }
  0x3c   : > { %324 = vst [vmem:[%s4020_s8 + $0x188] sm:$0xff] %v4026_v7  ;;  %327 = vst [vmem:[%s4020_s8 + $0x1a0] sm:$0xff] %v4026_v7 }
  0x3d   : > { %330 = vst [vmem:[%s4020_s8 + $0x1b8] sm:$0xff] %v4026_v7  ;;  %333 = vst [vmem:[%s4020_s8 + $0x1d0] sm:$0xff] %v4026_v7 }
  0x3e   : > { %336 = vst [vmem:[%s4020_s8 + $0x1e8] sm:$0xff] %v4026_v7  ;;  %339 = vst [vmem:[%s4020_s8 + $0x200] sm:$0xff] %v4026_v7 }
  0x3f   : > { %342 = vst [vmem:[%s4020_s8 + $0x218] sm:$0xff] %v4026_v7  ;;  %345 = vst [vmem:[%s4020_s8 + $0x230] sm:$0xff] %v4026_v7 }
  0x40   : > { %348 = vst [vmem:[%s4020_s8 + $0x248] sm:$0xff] %v4026_v7  ;;  %351 = vst [vmem:[%s4020_s8 + $0x260] sm:$0xff] %v4026_v7 }
  0x41   : > { %354 = vst [vmem:[%s4020_s8 + $0x278] sm:$0xff] %v4026_v7  ;;  %357 = vst [vmem:[%s4020_s8 + $0x290] sm:$0xff] %v4026_v7 }
  0x42   : > { %360 = vst [vmem:[%s4020_s8 + $0x2a8] sm:$0xff] %v4026_v7  ;;  %363 = vst [vmem:[%s4020_s8 + $0x2c0] sm:$0xff] %v4026_v7 }
  0x43   : > { %366 = vst [vmem:[%s4020_s8 + $0x2d8] sm:$0xff] %v4026_v7  ;;  %369 = vst [vmem:[%s4020_s8 + $0x2f0] sm:$0xff] %v4026_v7 }
  0x44   : > { %277 = vst [vmem:[%s4020_s8 + $0x10] sm:$0xff] %v4028_v8  ;;  %280 = vst [vmem:[%s4020_s8 + $0x28] sm:$0xff] %v4028_v8 }
  0x45   : > { %283 = vst [vmem:[%s4020_s8 + $0x40] sm:$0xff] %v4028_v8  ;;  %286 = vst [vmem:[%s4020_s8 + $0x58] sm:$0xff] %v4028_v8 }
  0x46   : > { %289 = vst [vmem:[%s4020_s8 + $0x70] sm:$0xff] %v4028_v8  ;;  %292 = vst [vmem:[%s4020_s8 + $0x88] sm:$0xff] %v4028_v8 }
  0x47   : > { %295 = vst [vmem:[%s4020_s8 + $0xa0] sm:$0xff] %v4028_v8  ;;  %298 = vst [vmem:[%s4020_s8 + $0xb8] sm:$0xff] %v4028_v8 }
  0x48   : > { %301 = vst [vmem:[%s4020_s8 + $0xd0] sm:$0xff] %v4028_v8  ;;  %304 = vst [vmem:[%s4020_s8 + $0xe8] sm:$0xff] %v4028_v8 }
  0x49   : > { %307 = vst [vmem:[%s4020_s8 + $0x100] sm:$0xff] %v4028_v8  ;;  %310 = vst [vmem:[%s4020_s8 + $0x118] sm:$0xff] %v4028_v8 }
  0x4a   : > { %313 = vst [vmem:[%s4020_s8 + $0x130] sm:$0xff] %v4028_v8  ;;  %316 = vst [vmem:[%s4020_s8 + $0x148] sm:$0xff] %v4028_v8 }
  0x4b   : > { %319 = vst [vmem:[%s4020_s8 + $0x160] sm:$0xff] %v4028_v8  ;;  %322 = vst [vmem:[%s4020_s8 + $0x178] sm:$0xff] %v4028_v8 }
  0x4c   : > { %325 = vst [vmem:[%s4020_s8 + $0x190] sm:$0xff] %v4028_v8  ;;  %328 = vst [vmem:[%s4020_s8 + $0x1a8] sm:$0xff] %v4028_v8 }
  0x4d   : > { %331 = vst [vmem:[%s4020_s8 + $0x1c0] sm:$0xff] %v4028_v8  ;;  %334 = vst [vmem:[%s4020_s8 + $0x1d8] sm:$0xff] %v4028_v8 }
  0x4e   : > { %337 = vst [vmem:[%s4020_s8 + $0x1f0] sm:$0xff] %v4028_v8  ;;  %340 = vst [vmem:[%s4020_s8 + $0x208] sm:$0xff] %v4028_v8 }
  0x4f   : > { %343 = vst [vmem:[%s4020_s8 + $0x220] sm:$0xff] %v4028_v8  ;;  %346 = vst [vmem:[%s4020_s8 + $0x238] sm:$0xff] %v4028_v8 }
  0x50   : > { %349 = vst [vmem:[%s4020_s8 + $0x250] sm:$0xff] %v4028_v8  ;;  %352 = vst [vmem:[%s4020_s8 + $0x268] sm:$0xff] %v4028_v8 }
  0x51   : > { %355 = vst [vmem:[%s4020_s8 + $0x280] sm:$0xff] %v4028_v8  ;;  %358 = vst [vmem:[%s4020_s8 + $0x298] sm:$0xff] %v4028_v8 }
  0x52   : > { %361 = vst [vmem:[%s4020_s8 + $0x2b0] sm:$0xff] %v4028_v8  ;;  %364 = vst [vmem:[%s4020_s8 + $0x2c8] sm:$0xff] %v4028_v8 }
  0x53   : > { %367 = vst [vmem:[%s4020_s8 + $0x2e0] sm:$0xff] %v4028_v8  ;;  %370 = vst [vmem:[%s4020_s8 + $0x2f8] sm:$0xff] %v4028_v8 }
  0x54 PF: > { %v516_v9 = vld [vmem:[%s4013_s30 + $0x8] sm:$0xff]  ;;  %v518_v10 = vld [vmem:[%s4013_s30 + $0x18] sm:$0xff]  ;;  %v515_v11 = vld [vmem:[%s4013_s30] sm:$0xff]  ;;  %vm1109_vm0 = vcmask 523264   ;;  %s3899_s18 = smov 64   ;;  %s3072_s25 = sshll.u32 %s4020_s8, 4  ;;  %s5565_s25 = int_to_ptr.vmem [resolvable:$true] %s3072_s25 }
  0x55   : > { %v612_v12 = vpack.c.bf16 %v518_v10, %v516_v9  ;;  %v517_v13 = vld [vmem:[%s4013_s30 + $0x10] sm:$0xff]  ;;  %v520_v14 = vld [vmem:[%s4013_s30 + $0x28] sm:$0xff]  ;;  %v522_v15 = vld [vmem:[%s4013_s30 + $0x38] sm:$0xff]  ;;  %s3802_s12 = scalar_lea.vmem %s5565_s25, 12288  ;;  %s3900_s13 = smov [#allocation2]  }
  0x56   : > { %v611_v16 = vpack.c.bf16 %v517_v13, %v515_v11  ;;  %v614_v17 = vpack.c.bf16 %v522_v15, %v520_v14  ;;  %v519_v18 = vld [vmem:[%s4013_s30 + $0x20] sm:$0xff]  ;;  %v521_v19 = vld [vmem:[%s4013_s30 + $0x30] sm:$0xff]  ;;  %v524_v20 = vld [vmem:[%s4013_s30 + $0x48] sm:$0xff]  ;;  %p3803_p2 = scmp.ne.s32.totalorder %s5565_s25, %s3802_s12 }
  0x57   : > { %659 = vmatprep.subr.bf16.mxu0 %v612_v12  ;;  %v526_v21 = vld [vmem:[%s4013_s30 + $0x58] sm:$0xff]  ;;  %v613_v22 = vpack.c.bf16 %v521_v19, %v519_v18  ;;  %v523_v24 = vld [vmem:[%s4013_s30 + $0x40] sm:$0xff]  ;;  %v525_v25 = vld [vmem:[%s4013_s30 + $0x50] sm:$0xff] }
  0x58   : > { %660 = vmatpush1.bf16.msra.mxu0 %v611_v16  ;;  %v616_v23 = vpack.c.bf16 %v526_v21, %v524_v20  ;;  %v528_v26 = vld [vmem:[%s4013_s30 + $0x68] sm:$0xff]  ;;  %v530_v27 = vld [vmem:[%s4013_s30 + $0x78] sm:$0xff]  ;;  %v615_v28 = vpack.c.bf16 %v525_v25, %v523_v24  ;;  %v527_v30 = vld [vmem:[%s4013_s30 + $0x60] sm:$0xff]  ;;  %p3804_p4 = pnand %p3803_p2, %p3977_p3 }
  0x59   : > { %661 = vmatprep.subr.bf16.mxu0 %v614_v17  ;;  %v618_v29 = vpack.c.bf16 %v530_v27, %v528_v26  ;;  %v529_v31 = vld [vmem:[%s4013_s30 + $0x70] sm:$0xff]  ;;  %v532_v32 = vld [vmem:[%s4013_s30 + $0x88] sm:$0xff]  ;;  %v534_v33 = vld [vmem:[%s4013_s30 + $0x98] sm:$0xff] }
  0x5a   : > { %v617_v34 = vpack.c.bf16 %v529_v31, %v527_v30  ;;  %v620_v35 = vpack.c.bf16 %v534_v33, %v532_v32  ;;  %v531_v36 = vld [vmem:[%s4013_s30 + $0x80] sm:$0xff]  ;;  %v533_v37 = vld [vmem:[%s4013_s30 + $0x90] sm:$0xff]  ;;  %v536_v38 = vld [vmem:[%s4013_s30 + $0xa8] sm:$0xff]  ;;  %p3805_p5 = pneg %p3804_p4 }
  0x5b   : > { %v538_v39 = vld [vmem:[%s4013_s30 + $0xb8] sm:$0xff]  ;;  %v619_v40 = vpack.c.bf16 %v533_v37, %v531_v36  ;;  %v535_v42 = vld [vmem:[%s4013_s30 + $0xa0] sm:$0xff]  ;;  %v537_v43 = vld [vmem:[%s4013_s30 + $0xb0] sm:$0xff] }
  0x5c   : > { %662 = vmatpush1.bf16.msra.mxu0 %v613_v22  ;;  %v622_v41 = vpack.c.bf16 %v538_v39, %v536_v38  ;;  %v540_v44 = vld [vmem:[%s4013_s30 + $0xc8] sm:$0xff]  ;;  %v542_v45 = vld [vmem:[%s4013_s30 + $0xd8] sm:$0xff]  ;;  %v621_v46 = vpack.c.bf16 %v537_v43, %v535_v42  ;;  %v539_v47 = vld [vmem:[%s4013_s30 + $0xc0] sm:$0xff] }
  0x5d   : > { %663 = vmatprep.subr.bf16.mxu0 %v616_v23  ;;  %v624_v48 = vpack.c.bf16 %v542_v45, %v540_v44  ;;  %v541_v49 = vld [vmem:[%s4013_s30 + $0xd0] sm:$0xff]  ;;  %v372_v50 = vld [vmem:[%s4008_s14 + $0x8] sm:$0xff]  ;;  %v375_v51 = vld [vmem:[%s4008_s14 + $0x20] sm:$0xff] }
  0x5e   : > { %v544_v52 = vld [vmem:[%s4013_s30 + $0xe8] sm:$0xff]  ;;  %v546_v53 = vld [vmem:[%s4013_s30 + $0xf8] sm:$0xff]  ;;  %v468_v54 = vpack.c.bf16 %v375_v51, %v372_v50  ;;  %v623_v55 = vpack.c.bf16 %v541_v49, %v539_v47  ;;  %v543_v57 = vld [vmem:[%s4013_s30 + $0xe0] sm:$0xff] }
  0x5f   : > { %v626_v56 = vpack.c.bf16 %v546_v53, %v544_v52  ;;  %v545_v58 = vld [vmem:[%s4013_s30 + $0xf0] sm:$0xff]  ;;  %v548_v59 = vld [vmem:[%s4013_s30 + $0x108] sm:$0xff]  ;;  %v550_v60 = vld [vmem:[%s4013_s30 + $0x118] sm:$0xff] }
  0x60   : > { %664 = vmatpush1.bf16.msra.mxu0 %v615_v28  ;;  %691 = vmatprep.mubr.bf16.mxu0 %v468_v54  ;;  %v625_v61 = vpack.c.bf16 %v545_v58, %v543_v57  ;;  %v628_v62 = vpack.c.bf16 %v550_v60, %v548_v59  ;;  %v547_v63 = vld [vmem:[%s4013_s30 + $0x100] sm:$0xff]  ;;  %v549_v0 = vld [vmem:[%s4013_s30 + $0x110] sm:$0xff]  ;;  %v552_v1 = vld [vmem:[%s4013_s30 + $0x128] sm:$0xff] }
  0x61   : > { %665 = vmatprep.subr.bf16.mxu0 %v618_v29  ;;  %v554_v2 = vld [vmem:[%s4013_s30 + $0x138] sm:$0xff]  ;;  %v627_v3 = vpack.c.bf16 %v549_v0, %v547_v63  ;;  %v551_v5 = vld [vmem:[%s4013_s30 + $0x120] sm:$0xff]  ;;  %v553_v6 = vld [vmem:[%s4013_s30 + $0x130] sm:$0xff] }
  0x62   : > { %v630_v4 = vpack.c.bf16 %v554_v2, %v552_v1  ;;  %v556_v7 = vld [vmem:[%s4013_s30 + $0x148] sm:$0xff]  ;;  %v558_v8 = vld [vmem:[%s4013_s30 + $0x158] sm:$0xff]  ;;  %v629_v9 = vpack.c.bf16 %v553_v6, %v551_v5  ;;  %v555_v11 = vld [vmem:[%s4013_s30 + $0x140] sm:$0xff] }
  0x63   : > { %v632_v10 = vpack.c.bf16 %v558_v8, %v556_v7  ;;  %v557_v12 = vld [vmem:[%s4013_s30 + $0x150] sm:$0xff]  ;;  %v560_v13 = vld [vmem:[%s4013_s30 + $0x168] sm:$0xff]  ;;  %v562_v14 = vld [vmem:[%s4013_s30 + $0x178] sm:$0xff] }
  0x64   : > { %666 = vmatpush1.bf16.msra.mxu0 %v617_v34  ;;  %v631_v15 = vpack.c.bf16 %v557_v12, %v555_v11  ;;  %v634_v16 = vpack.c.bf16 %v562_v14, %v560_v13  ;;  %v559_v17 = vld [vmem:[%s4013_s30 + $0x160] sm:$0xff]  ;;  %v561_v18 = vld [vmem:[%s4013_s30 + $0x170] sm:$0xff]  ;;  %v564_v19 = vld [vmem:[%s4013_s30 + $0x188] sm:$0xff] }
  0x65   : > { %667 = vmatprep.subr.bf16.mxu0 %v620_v35  ;;  %v566_v20 = vld [vmem:[%s4013_s30 + $0x198] sm:$0xff]  ;;  %v633_v21 = vpack.c.bf16 %v561_v18, %v559_v17  ;;  %v563_v23 = vld [vmem:[%s4013_s30 + $0x180] sm:$0xff]  ;;  %v565_v24 = vld [vmem:[%s4013_s30 + $0x190] sm:$0xff] }
  0x66   : > { %v636_v22 = vpack.c.bf16 %v566_v20, %v564_v19  ;;  %v568_v25 = vld [vmem:[%s4013_s30 + $0x1a8] sm:$0xff]  ;;  %v570_v26 = vld [vmem:[%s4013_s30 + $0x1b8] sm:$0xff]  ;;  %v635_v27 = vpack.c.bf16 %v565_v24, %v563_v23  ;;  %v567_v29 = vld [vmem:[%s4013_s30 + $0x1a0] sm:$0xff] }
  0x67   : > { %v638_v28 = vpack.c.bf16 %v570_v26, %v568_v25  ;;  %v569_v30 = vld [vmem:[%s4013_s30 + $0x1b0] sm:$0xff]  ;;  %v572_v31 = vld [vmem:[%s4013_s30 + $0x1c8] sm:$0xff]  ;;  %v574_v32 = vld [vmem:[%s4013_s30 + $0x1d8] sm:$0xff] }
  0x68   : > { %668 = vmatpush1.bf16.msra.mxu0 %v619_v40  ;;  %v637_v33 = vpack.c.bf16 %v569_v30, %v567_v29  ;;  %v640_v34 = vpack.c.bf16 %v574_v32, %v572_v31  ;;  %v571_v35 = vld [vmem:[%s4013_s30 + $0x1c0] sm:$0xff]  ;;  %v573_v36 = vld [vmem:[%s4013_s30 + $0x1d0] sm:$0xff]  ;;  %v576_v37 = vld [vmem:[%s4013_s30 + $0x1e8] sm:$0xff] }
  0x69   : > { %669 = vmatprep.subr.bf16.mxu0 %v622_v41  ;;  %v578_v38 = vld [vmem:[%s4013_s30 + $0x1f8] sm:$0xff]  ;;  %v639_v39 = vpack.c.bf16 %v573_v36, %v571_v35  ;;  %v575_v41 = vld [vmem:[%s4013_s30 + $0x1e0] sm:$0xff]  ;;  %v577_v42 = vld [vmem:[%s4013_s30 + $0x1f0] sm:$0xff] }
  0x6a   : > { %v642_v40 = vpack.c.bf16 %v578_v38, %v576_v37  ;;  %v580_v43 = vld [vmem:[%s4013_s30 + $0x208] sm:$0xff]  ;;  %v582_v44 = vld [vmem:[%s4013_s30 + $0x218] sm:$0xff]  ;;  %v641_v45 = vpack.c.bf16 %v577_v42, %v575_v41  ;;  %v581_v50 = vld [vmem:[%s4013_s30 + $0x210] sm:$0xff] }
  0x6b   : > { %v374_v47 = vld [vmem:[%s4008_s14 + $0x18] sm:$0xff]  ;;  %v644_v49 = vpack.c.bf16 %v582_v44, %v580_v43  ;;  %v381_v52 = vld [vmem:[%s4008_s14 + $0x50] sm:$0xff]  ;;  %v584_v53 = vld [vmem:[%s4013_s30 + $0x228] sm:$0xff] }
  0x6c   : > { %670 = vmatpush1.bf16.msra.mxu0 %v621_v46  ;;  %v371_v46 = vld [vmem:[%s4008_s14] sm:$0xff]  ;;  %v378_v51 = vld [vmem:[%s4008_s14 + $0x38] sm:$0xff]  ;;  %v585_v60 = vld [vmem:[%s4013_s30 + $0x230] sm:$0xff] }
  0x6d   : > { %671 = vmatprep.subr.bf16.mxu0 %v624_v48  ;;  %v579_v48 = vld [vmem:[%s4013_s30 + $0x200] sm:$0xff]  ;;  %v586_v54 = vld [vmem:[%s4013_s30 + $0x238] sm:$0xff]  ;;  %v471_v57 = vpack.c.bf16 %v381_v52, %v378_v51  ;;  %v377_v63 = vld [vmem:[%s4008_s14 + $0x30] sm:$0xff] }
  0x6e   : > { %v646_v58 = vpack.c.bf16 %v586_v54, %v584_v53  ;;  %v583_v59 = vld [vmem:[%s4013_s30 + $0x220] sm:$0xff]  ;;  %v380_v0 = vld [vmem:[%s4008_s14 + $0x48] sm:$0xff]  ;;  %v589_v6 = vld [vmem:[%s4013_s30 + $0x250] sm:$0xff] }
  0x6f   : > { %v384_v1 = vld [vmem:[%s4008_s14 + $0x68] sm:$0xff]  ;;  %v645_v2 = vpack.c.bf16 %v585_v60, %v583_v59  ;;  %v587_v5 = vld [vmem:[%s4013_s30 + $0x240] sm:$0xff]  ;;  %v594_v8 = vld [vmem:[%s4013_s30 + $0x278] sm:$0xff] }
  0x70   : > { %672 = vmatpush1.bf16.msra.mxu0 %v623_v55  ;;  %v467_v55 = vpack.c.bf16 %v374_v47, %v371_v46  ;;  %v592_v7 = vld [vmem:[%s4013_s30 + $0x268] sm:$0xff]  ;;  %v647_v11 = vpack.c.bf16 %v589_v6, %v587_v5  ;;  %v591_v13 = vld [vmem:[%s4013_s30 + $0x260] sm:$0xff]  ;;  %v593_v14 = vld [vmem:[%s4013_s30 + $0x270] sm:$0xff] }
  0x71   : > { %673 = vmatprep.subr.bf16.mxu0 %v626_v56  ;;  %v643_v56 = vpack.c.bf16 %v581_v50, %v579_v48  ;;  %v650_v12 = vpack.c.bf16 %v594_v8, %v592_v7  ;;  %v383_v17 = vld [vmem:[%s4008_s14 + $0x60] sm:$0xff]  ;;  %v386_v18 = vld [vmem:[%s4008_s14 + $0x78] sm:$0xff]  ;;  %v649_v20 = vpack.c.bf16 %v593_v14, %v591_v13  ;;  %v597_v24 = vld [vmem:[%s4013_s30 + $0x290] sm:$0xff] }
  0x72   : > { %v390_v19 = vld [vmem:[%s4008_s14 + $0x98] sm:$0xff]  ;;  %v595_v23 = vld [vmem:[%s4013_s30 + $0x280] sm:$0xff]  ;;  %v600_v25 = vld [vmem:[%s4013_s30 + $0x2a8] sm:$0xff] }
  0x73   : > { %v602_v26 = vld [vmem:[%s4013_s30 + $0x2b8] sm:$0xff]  ;;  %v651_v29 = vpack.c.bf16 %v597_v24, %v595_v23  ;;  %v599_v31 = vld [vmem:[%s4013_s30 + $0x2a0] sm:$0xff]  ;;  %v601_v32 = vld [vmem:[%s4013_s30 + $0x2b0] sm:$0xff] }
  0x74   : > { %674 = vmatpush1.bf16.msra.mxu0 %v625_v61  ;;  %v588_v61 = vld [vmem:[%s4013_s30 + $0x248] sm:$0xff]  ;;  %v654_v30 = vpack.c.bf16 %v602_v26, %v600_v25  ;;  %v389_v35 = vld [vmem:[%s4008_s14 + $0x90] sm:$0xff]  ;;  %v653_v38 = vpack.c.bf16 %v601_v32, %v599_v31  ;;  %v603_v41 = vld [vmem:[%s4013_s30 + $0x2c0] sm:$0xff] }
  0x75   : > { %675 = vmatprep.subr.bf16.mxu0 %v628_v62  ;;  %v590_v62 = vld [vmem:[%s4013_s30 + $0x258] sm:$0xff]  ;;  %v392_v36 = vld [vmem:[%s4008_s14 + $0xa8] sm:$0xff]  ;;  %v605_v42 = vld [vmem:[%s4013_s30 + $0x2d0] sm:$0xff] }
  0x76   : > { %v396_v37 = vld [vmem:[%s4008_s14 + $0xc8] sm:$0xff]  ;;  %v610_v44 = vld [vmem:[%s4013_s30 + $0x2f8] sm:$0xff]  ;;  %v655_v47 = vpack.c.bf16 %v605_v42, %v603_v41  ;;  %v609_v50 = vld [vmem:[%s4013_s30 + $0x2f0] sm:$0xff] }
  0x77   : > { %v608_v43 = vld [vmem:[%s4013_s30 + $0x2e8] sm:$0xff]  ;;  %v395_v51 = vld [vmem:[%s4008_s14 + $0xc0] sm:$0xff]  ;;  %v398_v52 = vld [vmem:[%s4008_s14 + $0xd8] sm:$0xff] }
  0x78   : > { %676 = vmatpush1.bf16.msra.mxu0 %v627_v3  ;;  %v387_v3 = vld [vmem:[%s4008_s14 + $0x80] sm:$0xff]  ;;  %v658_v48 = vpack.c.bf16 %v610_v44, %v608_v43  ;;  %v402_v54 = vld [vmem:[%s4008_s14 + $0xf8] sm:$0xff]  ;;  %v404_v59 = vld [vmem:[%s4008_s14 + $0x108] sm:$0xff] }
  0x79   : > { %677 = vmatprep.subr.bf16.mxu0 %v630_v4  ;;  %v648_v4 = vpack.c.bf16 %v590_v62, %v588_v61  ;;  %v408_v60 = vld [vmem:[%s4008_s14 + $0x128] sm:$0xff]  ;;  %v411_v61 = vld [vmem:[%s4008_s14 + $0x140] sm:$0xff]  ;;  %v413_v6 = vld [vmem:[%s4008_s14 + $0x150] sm:$0xff] }
  0x7a   : > { %v416_v7 = vld [vmem:[%s4008_s14 + $0x168] sm:$0xff]  ;;  %v422_v13 = vld [vmem:[%s4008_s14 + $0x198] sm:$0xff]  ;;  %v431_v24 = vld [vmem:[%s4008_s14 + $0x1e0] sm:$0xff] }
  0x7b   : > { %v420_v8 = vld [vmem:[%s4008_s14 + $0x188] sm:$0xff]  ;;  %v426_v14 = vld [vmem:[%s4008_s14 + $0x1b8] sm:$0xff]  ;;  %v449_v42 = vld [vmem:[%s4008_s14 + $0x270] sm:$0xff] }
  0x7c   : > { %678 = vmatpush1.bf16.msra.mxu0 %v629_v9  ;;  %v470_v9 = vpack.c.bf16 %v380_v0, %v377_v63  ;;  %v486_v63 = vpack.c.bf16 %v411_v61, %v408_v60  ;;  %v407_v0 = vld [vmem:[%s4008_s14 + $0x120] sm:$0xff]  ;;  %v434_v25 = vld [vmem:[%s4008_s14 + $0x1f8] sm:$0xff]  ;;  %v440_v31 = vld [vmem:[%s4008_s14 + $0x228] sm:$0xff] }
  0x7d   : > { %679 = vmatprep.subr.bf16.mxu0 %v632_v10  ;;  %v474_v10 = vpack.c.bf16 %v387_v3, %v384_v1  ;;  %v410_v1 = vld [vmem:[%s4008_s14 + $0x138] sm:$0xff]  ;;  %v417_v3 = vld [vmem:[%s4008_s14 + $0x170] sm:$0xff]  ;;  %v444_v32 = vld [vmem:[%s4008_s14 + $0x248] sm:$0xff] }
  0x7e   : > { %v438_v26 = vld [vmem:[%s4008_s14 + $0x218] sm:$0xff]  ;;  %v452_v43 = vld [vmem:[%s4008_s14 + $0x288] sm:$0xff]  ;;  %v379_v61 = vld [vmem:[%s4008_s14 + $0x40] sm:$0xff] }
  0x7f   : > { %v456_v44 = vld [vmem:[%s4008_s14 + $0x2a8] sm:$0xff] }
  0x80   : > { %680 = vmatpush1.bf16.msra.mxu0 %v631_v15  ;;  %v596_v15 = vld [vmem:[%s4013_s30 + $0x288] sm:$0xff] }
  0x81   : > { %681 = vmatprep.subr.bf16.mxu0 %v634_v16  ;;  %v598_v16 = vld [vmem:[%s4013_s30 + $0x298] sm:$0xff] }
  0x84   : > { %682 = vmatpush1.bf16.msra.mxu0 %v633_v21  ;;  %v393_v21 = vld [vmem:[%s4008_s14 + $0xb0] sm:$0xff] }
  0x85   : > { %683 = vmatprep.subr.bf16.mxu0 %v636_v22  ;;  %v652_v22 = vpack.c.bf16 %v598_v16, %v596_v15  ;;  %v429_v15 = vld [vmem:[%s4008_s14 + $0x1d0] sm:$0xff] }
  0x88   : > { %684 = vmatpush1.bf16.msra.mxu0 %v635_v27  ;;  %v473_v27 = vpack.c.bf16 %v386_v18, %v383_v17  ;;  %v495_v17 = vpack.c.bf16 %v429_v15, %v426_v14  ;;  %v425_v18 = vld [vmem:[%s4008_s14 + $0x1b0] sm:$0xff]  ;;  %v415_v15 = vld [vmem:[%s4008_s14 + $0x160] sm:$0xff] }
  0x89   : > { %685 = vmatprep.subr.bf16.mxu0 %v638_v28  ;;  %v477_v28 = vpack.c.bf16 %v393_v21, %v390_v19  ;;  %v428_v19 = vld [vmem:[%s4008_s14 + $0x1c8] sm:$0xff]  ;;  %v435_v21 = vld [vmem:[%s4008_s14 + $0x200] sm:$0xff] }
  0x8c   : > { %686 = vmatpush1.bf16.msra.mxu0 %v637_v33  ;;  %v604_v33 = vld [vmem:[%s4013_s30 + $0x2c8] sm:$0xff] }
  0x8d   : > { %687 = vmatprep.subr.bf16.mxu0 %v640_v34  ;;  %v606_v34 = vld [vmem:[%s4013_s30 + $0x2d8] sm:$0xff] }
  0x90   : > { %688 = vmatpush1.bf16.msra.mxu0 %v639_v39  ;;  %v399_v39 = vld [vmem:[%s4008_s14 + $0xe0] sm:$0xff] }
  0x91   : > { %689 = vmatprep.subr.bf16.mxu0 %v642_v40  ;;  %v656_v40 = vpack.c.bf16 %v606_v34, %v604_v33  ;;  %v480_v46 = vpack.c.bf16 %v399_v39, %v396_v37  ;;  %v447_v33 = vld [vmem:[%s4008_s14 + $0x260] sm:$0xff]  ;;  %v446_v37 = vld [vmem:[%s4008_s14 + $0x258] sm:$0xff]  ;;  %v453_v39 = vld [vmem:[%s4008_s14 + $0x290] sm:$0xff] }
  0x94   : > { %690 = vmatpush1.bf16.msra.mxu0 %v641_v45  ;;  %v476_v45 = vpack.c.bf16 %v392_v36, %v389_v35  ;;  %v504_v35 = vpack.c.bf16 %v447_v33, %v444_v32  ;;  %v443_v36 = vld [vmem:[%s4008_s14 + $0x240] sm:$0xff] }
  0x95   : > { %852 = vmatprep.subr.bf16.mxu0 %v644_v49  ;;  %v607_v49 = vld [vmem:[%s4013_s30 + $0x2e0] sm:$0xff] }
  0x96   : > { %v657_v53 = vpack.c.bf16 %v609_v50, %v607_v49  ;;  %v458_v49 = vld [vmem:[%s4008_s14 + $0x2b8] sm:$0xff]  ;;  %v451_v33 = vld [vmem:[%s4008_s14 + $0x280] sm:$0xff] }
  0x97   : > { %692 = vmatmul.mubr.bf16.vlgmr.msra.gmra.mrb[0].mxu0 %v467_v55  ;;  %v405_v55 = vld [vmem:[%s4008_s14 + $0x110] sm:$0xff]  ;;  %v462_v50 = vld [vmem:[%s4008_s14 + $0x2d8] sm:$0xff] }
  0x98   : > { %853 = vmatpush1.bf16.msra.mxu0 %v643_v56  ;;  %701 = vmatprep.mubr.bf16.mxu0 %v471_v57  ;;  %v479_v56 = vpack.c.bf16 %v398_v52, %v395_v51  ;;  %v483_v57 = vpack.c.bf16 %v405_v55, %v402_v54  ;;  %v465_v51 = vld [vmem:[%s4008_s14 + $0x2f0] sm:$0xff]  ;;  %v464_v55 = vld [vmem:[%s4008_s14 + $0x2e8] sm:$0xff] }
  0x99   : > { %854 = vmatprep.subr.bf16.mxu0 %v646_v58  ;;  %v401_v58 = vld [vmem:[%s4008_s14 + $0xf0] sm:$0xff] }
  0x9a   : > { %v482_v62 = vpack.c.bf16 %v404_v59, %v401_v58  ;;  %v461_v54 = vld [vmem:[%s4008_s14 + $0x2d0] sm:$0xff]  ;;  %v376_v59 = vld [vmem:[%s4008_s14 + $0x28] sm:$0xff] }
  0x9b   : > { %v373_v58 = vld [vmem:[%s4008_s14 + $0x10] sm:$0xff] }
  0x9c   : > { %855 = vmatpush1.bf16.msra.mxu0 %v645_v2  ;;  %v414_v2 = vld [vmem:[%s4008_s14 + $0x158] sm:$0xff]  ;;  %v469_v60 = vpack.c.bf16 %v376_v59, %v373_v58 }
  0x9d   : > { %856 = vmatprep.subr.bf16.mxu0 %v648_v4  ;;  %v485_v4 = vpack.c.bf16 %v410_v1, %v407_v0  ;;  %v489_v5 = vpack.c.bf16 %v417_v3, %v414_v2  ;;  %v385_v0 = vld [vmem:[%s4008_s14 + $0x70] sm:$0xff]  ;;  %v388_v1 = vld [vmem:[%s4008_s14 + $0x88] sm:$0xff]  ;;  %v391_v3 = vld [vmem:[%s4008_s14 + $0xa0] sm:$0xff] }
  0x9e   : > { %v475_v2 = vpack.c.bf16 %v388_v1, %v385_v0 }
  0x9f   : > { %702 = vmatmul.mubr.bf16.gmra.mrb[4].mxu0 %v470_v9  ;;  %v423_v9 = vld [vmem:[%s4008_s14 + $0x1a0] sm:$0xff] }
  0xa0   : > { %711 = vmatprep.mubr.bf16.mxu0 %v474_v10  ;;  %857 = vmatpush1.bf16.msra.mxu0 %v647_v11  ;;  %v488_v10 = vpack.c.bf16 %v416_v7, %v413_v6  ;;  %v492_v11 = vpack.c.bf16 %v423_v9, %v420_v8  ;;  %v397_v6 = vld [vmem:[%s4008_s14 + $0xd0] sm:$0xff]  ;;  %v400_v7 = vld [vmem:[%s4008_s14 + $0xe8] sm:$0xff]  ;;  %v403_v9 = vld [vmem:[%s4008_s14 + $0x100] sm:$0xff] }
  0xa1   : > { %858 = vmatprep.subr.bf16.mxu0 %v650_v12  ;;  %v419_v12 = vld [vmem:[%s4008_s14 + $0x180] sm:$0xff]  ;;  %v481_v8 = vpack.c.bf16 %v400_v7, %v397_v6 }
  0xa2   : > { %v491_v16 = vpack.c.bf16 %v422_v13, %v419_v12  ;;  %v409_v12 = vld [vmem:[%s4008_s14 + $0x130] sm:$0xff]  ;;  %v412_v13 = vld [vmem:[%s4008_s14 + $0x148] sm:$0xff] }
  0xa3   : > { %v487_v14 = vpack.c.bf16 %v412_v13, %v409_v12 }
  0xa4   : > { %859 = vmatpush1.bf16.msra.mxu0 %v649_v20  ;;  %v432_v20 = vld [vmem:[%s4008_s14 + $0x1e8] sm:$0xff] }
  0xa5   : > { %860 = vmatprep.subr.bf16.mxu0 %v652_v22  ;;  %v494_v22 = vpack.c.bf16 %v428_v19, %v425_v18  ;;  %v498_v23 = vpack.c.bf16 %v435_v21, %v432_v20  ;;  %v421_v18 = vld [vmem:[%s4008_s14 + $0x190] sm:$0xff]  ;;  %v424_v19 = vld [vmem:[%s4008_s14 + $0x1a8] sm:$0xff]  ;;  %v427_v21 = vld [vmem:[%s4008_s14 + $0x1c0] sm:$0xff] }
  0xa6   : > { %v493_v20 = vpack.c.bf16 %v424_v19, %v421_v18 }
  0xa7   : > { %712 = vmatmul.mubr.bf16.gmra.mrb[8].mxu0 %v473_v27  ;;  %v441_v27 = vld [vmem:[%s4008_s14 + $0x230] sm:$0xff] }
  0xa8   : > { %721 = vmatprep.mubr.bf16.mxu0 %v477_v28  ;;  %861 = vmatpush1.bf16.msra.mxu0 %v651_v29  ;;  %v497_v28 = vpack.c.bf16 %v434_v25, %v431_v24  ;;  %v501_v29 = vpack.c.bf16 %v441_v27, %v438_v26  ;;  %v433_v24 = vld [vmem:[%s4008_s14 + $0x1f0] sm:$0xff]  ;;  %v436_v25 = vld [vmem:[%s4008_s14 + $0x208] sm:$0xff]  ;;  %v439_v27 = vld [vmem:[%s4008_s14 + $0x220] sm:$0xff] }
  0xa9   : > { %862 = vmatprep.subr.bf16.mxu0 %v654_v30  ;;  %v437_v30 = vld [vmem:[%s4008_s14 + $0x210] sm:$0xff]  ;;  %v499_v26 = vpack.c.bf16 %v436_v25, %v433_v24 }
  0xaa   : > { %v500_v34 = vpack.c.bf16 %v440_v31, %v437_v30  ;;  %v445_v30 = vld [vmem:[%s4008_s14 + $0x250] sm:$0xff]  ;;  %v448_v31 = vld [vmem:[%s4008_s14 + $0x268] sm:$0xff] }
  0xab   : > { %v505_v32 = vpack.c.bf16 %v448_v31, %v445_v30 }
  0xac   : > { %863 = vmatpush1.bf16.msra.mxu0 %v653_v38  ;;  %v450_v38 = vld [vmem:[%s4008_s14 + $0x278] sm:$0xff] }
  0xad   : > { %864 = vmatprep.subr.bf16.mxu0 %v656_v40  ;;  %v503_v40 = vpack.c.bf16 %v446_v37, %v443_v36  ;;  %v507_v41 = vpack.c.bf16 %v453_v39, %v450_v38  ;;  %v457_v36 = vld [vmem:[%s4008_s14 + $0x2b0] sm:$0xff]  ;;  %v460_v37 = vld [vmem:[%s4008_s14 + $0x2c8] sm:$0xff]  ;;  %v463_v39 = vld [vmem:[%s4008_s14 + $0x2e0] sm:$0xff] }
  0xae   : > { %v511_v38 = vpack.c.bf16 %v460_v37, %v457_v36 }
  0xaf   : > { %722 = vmatmul.mubr.bf16.gmra.mrb[12].mxu0 %v476_v45  ;;  %v459_v45 = vld [vmem:[%s4008_s14 + $0x2c0] sm:$0xff] }
  0xb0   : > { %731 = vmatprep.mubr.bf16.mxu0 %v480_v46  ;;  %865 = vmatpush1.bf16.msra.mxu0 %v655_v47  ;;  %v506_v46 = vpack.c.bf16 %v452_v43, %v449_v42  ;;  %v510_v47 = vpack.c.bf16 %v459_v45, %v456_v44 }
  0xb1   : > { %866 = vmatprep.subr.bf16.mxu0 %v658_v48  ;;  %v455_v48 = vld [vmem:[%s4008_s14 + $0x2a0] sm:$0xff] }
  0xb2   : > { %v509_v52 = vpack.c.bf16 %v458_v49, %v455_v48 }
  0xb4   : > { %867 = vmatpush1.bf16.msra.mxu0 %v657_v53  ;;  %v513_v53 = vpack.c.bf16 %v465_v51, %v462_v50 }
  0xb7   : > { %732 = vmatmul.mubr.bf16.gmra.mrb[16].mxu0 %v479_v56  ;;  %v512_v56 = vpack.c.bf16 %v464_v55, %v461_v54 }
  0xb8   : > { %741 = vmatprep.mubr.bf16.mxu0 %v483_v57  ;;  %v5632_v57 = vmov 0  }
  0xbf   : > { %742 = vmatmul.mubr.bf16.gmra.mrb[20].mxu0 %v482_v62  ;;  %v382_v62 = vld [vmem:[%s4008_s14 + $0x58] sm:$0xff] }
  0xc0   : > { %751 = vmatprep.mubr.bf16.mxu0 %v486_v63  ;;  %v472_v63 = vpack.c.bf16 %v382_v62, %v379_v61 }
  0xc7   : > { %752 = vmatmul.mubr.bf16.gmra.mrb[24].mxu0 %v485_v4  ;;  %v394_v4 = vld [vmem:[%s4008_s14 + $0xb8] sm:$0xff] }
  0xc8   : > { %761 = vmatprep.mubr.bf16.mxu0 %v489_v5  ;;  %v478_v5 = vpack.c.bf16 %v394_v4, %v391_v3 }
  0xcf   : > { %762 = vmatmul.mubr.bf16.gmra.mrb[28].mxu0 %v488_v10  ;;  %v406_v10 = vld [vmem:[%s4008_s14 + $0x118] sm:$0xff] }
  0xd0   : > { %771 = vmatprep.mubr.bf16.mxu0 %v492_v11  ;;  %v484_v11 = vpack.c.bf16 %v406_v10, %v403_v9 }
  0xd7   : > { %772 = vmatmul.mubr.bf16.gmra.mrb[32].mxu0 %v491_v16  ;;  %v418_v16 = vld [vmem:[%s4008_s14 + $0x178] sm:$0xff] }
  0xd8   : > { %781 = vmatprep.mubr.bf16.mxu0 %v495_v17  ;;  %v490_v17 = vpack.c.bf16 %v418_v16, %v415_v15 }
  0xdf   : > { %782 = vmatmul.mubr.bf16.gmra.mrb[36].mxu0 %v494_v22  ;;  %v430_v22 = vld [vmem:[%s4008_s14 + $0x1d8] sm:$0xff] }
  0xe0   : > { %791 = vmatprep.mubr.bf16.mxu0 %v498_v23  ;;  %v496_v23 = vpack.c.bf16 %v430_v22, %v427_v21 }
  0xe7   : > { %792 = vmatmul.mubr.bf16.gmra.mrb[40].mxu0 %v497_v28  ;;  %v442_v28 = vld [vmem:[%s4008_s14 + $0x238] sm:$0xff] }
  0xe8   : > { %801 = vmatprep.mubr.bf16.mxu0 %v501_v29  ;;  %v502_v29 = vpack.c.bf16 %v442_v28, %v439_v27 }
  0xef   : > { %802 = vmatmul.mubr.bf16.gmra.mrb[44].mxu0 %v500_v34  ;;  %v454_v34 = vld [vmem:[%s4008_s14 + $0x298] sm:$0xff] }
  0xf0   : > { %811 = vmatprep.mubr.bf16.mxu0 %v504_v35  ;;  %v508_v35 = vpack.c.bf16 %v454_v34, %v451_v33 }
  0xf7   : > { %812 = vmatmul.mubr.bf16.gmra.mrb[48].mxu0 %v503_v40  ;;  %v466_v40 = vld [vmem:[%s4008_s14 + $0x2f8] sm:$0xff]  ;;  %s3806_s14 = sshll.u32 %s3900_s13, 4  ;;  %s3807_s14 = int_to_ptr.vmem [resolvable:$false] %s3806_s14 }
  0xf8   : > { %821 = vmatprep.mubr.bf16.mxu0 %v507_v41  ;;  %v514_v41 = vpack.c.bf16 %v466_v40, %v463_v39  ;;  %s3808_s23 = scalar_lea.vmem %s3807_s14, 24576  ;;  %p3809_p6 = scmp.lt.s32.totalorder %s5565_s25, %s3807_s14 }
  0xf9   : > { %p3810_p7 = scmp.lt.s32.totalorder %s3808_s23, %s3802_s12 }
  0xfb   : > { %p3811_p8 = por %p3810_p7, %p3809_p6 }
  0xfd   : > { %p3812_p10 = pnand %p3811_p8, %p3805_p5 }
  0xff   : > { %822 = vmatmul.mubr.bf16.gmra.mrb[52].mxu0 %v506_v46 }
 0x100   : > { %831 = vmatprep.mubr.bf16.mxu0 %v510_v47 }
 0x107   : > { %832 = vmatmul.mubr.bf16.gmra.mrb[56].mxu0 %v509_v52 }
 0x108   : > { %841 = vmatprep.mubr.bf16.mxu0 %v513_v53 }
 0x10f   : > { %842 = vmatmul.mubr.bf16.gmra.mrb[60].mxu0 %v512_v56 }
 0x110   : > { %884 = vmatprep.mubr.bf16.mxu0 %v5632_v57 }
 0x117   : > { %885 = vmatmul.mubr.bf16.vlgmr.msra.gmra.mrb[0].mxu0 %v469_v60 }
 0x118   : > { %894 = vmatprep.mubr.bf16.mxu0 %v5632_v57 }
 0x11f   : > { %895 = vmatmul.mubr.bf16.gmra.mrb[4].mxu0 %v472_v63 }
 0x120   : > { %904 = vmatprep.mubr.bf16.mxu0 %v5632_v57 }
 0x127   : > { %905 = vmatmul.mubr.bf16.gmra.mrb[8].mxu0 %v475_v2 }
 0x128   : > { %914 = vmatprep.mubr.bf16.mxu0 %v5632_v57 }
 0x12f   : > { %915 = vmatmul.mubr.bf16.gmra.mrb[12].mxu0 %v478_v5 }
 0x130   : > { %924 = vmatprep.mubr.bf16.mxu0 %v5632_v57 }
 0x137   : > { %925 = vmatmul.mubr.bf16.gmra.mrb[16].mxu0 %v481_v8 }
 0x138   : > { %934 = vmatprep.mubr.bf16.mxu0 %v5632_v57 }
 0x13f   : > { %935 = vmatmul.mubr.bf16.gmra.mrb[20].mxu0 %v484_v11 }
 0x140   : > { %944 = vmatprep.mubr.bf16.mxu0 %v5632_v57 }
 0x147   : > { %945 = vmatmul.mubr.bf16.gmra.mrb[24].mxu0 %v487_v14 }
 0x148   : > { %954 = vmatprep.mubr.bf16.mxu0 %v5632_v57 }
 0x14f   : > { %955 = vmatmul.mubr.bf16.gmra.mrb[28].mxu0 %v490_v17 }
 0x150   : > { %964 = vmatprep.mubr.bf16.mxu0 %v5632_v57 }
 0x157   : > { %965 = vmatmul.mubr.bf16.gmra.mrb[32].mxu0 %v493_v20 }
 0x158   : > { %974 = vmatprep.mubr.bf16.mxu0 %v5632_v57 }
 0x15f   : > { %975 = vmatmul.mubr.bf16.gmra.mrb[36].mxu0 %v496_v23 }
 0x160   : > { %984 = vmatprep.mubr.bf16.mxu0 %v5632_v57 }
 0x167   : > { %985 = vmatmul.mubr.bf16.gmra.mrb[40].mxu0 %v499_v26 }
 0x168   : > { %994 = vmatprep.mubr.bf16.mxu0 %v5632_v57 }
 0x16f   : > { %995 = vmatmul.mubr.bf16.gmra.mrb[44].mxu0 %v502_v29 }
 0x170   : > { %1004 = vmatprep.mubr.bf16.mxu0 %v5632_v57 }
 0x177   : > { %1005 = vmatmul.mubr.bf16.gmra.mrb[48].mxu0 %v505_v32 }
 0x178   : > { %1014 = vmatprep.mubr.bf16.mxu0 %v5632_v57 }
 0x17f   : > { %1015 = vmatmul.mubr.bf16.gmra.mrb[52].mxu0 %v508_v35 }
 0x180   : > { %1024 = vmatprep.mubr.bf16.mxu0 %v5632_v57 }
 0x187   : > { %1025 = vmatmul.mubr.bf16.gmra.mrb[56].mxu0 %v511_v38 }
 0x188   : > { %1034 = vmatprep.mubr.bf16.mxu0 %v5632_v57 }
 0x18f   : > { %1035 = vmatmul.mubr.bf16.gmra.mrb[60].mxu0 %v514_v41 }
 0x190   : > { %2544 = vmatprep.mubr.bf16.mxu0 %v5632_v57 }
 0x1ea   : > { %v886_v42 = vpop.f32.mrb[0].mxu0 }
 0x1eb   : > { %v4399_v43 = vpop.f32.mrb[1].mxu0 }
 0x1ec   : > { %v890_v44 = vpop.f32.mrb[2].mxu0 }
 0x1ed   : > { %v4401_v45 = vpack.c.bf16 %v890_v44, %v886_v42  ;;  %v4403_v46 = vpop.f32.mrb[3].mxu0 }
 0x1ee   : > { %v2139_v47 = vpack.c.bf16 %v4403_v46, %v4399_v43 }
 0x1ef   : > { %1077 = vrot.lane.b32.xlu0 %v4401_v45, %s3899_s18  ;;  %3246 = vmatprep.mubr.msk.bf16.mxu1 %vm1109_vm0, %v4401_v45 }
 0x1f2   : > { %v896_v48 = vpop.f32.mrb[4].mxu0 }
 0x1f3   : > { %v4411_v49 = vpop.f32.mrb[5].mxu0 }
 0x1f4   : > { %v900_v50 = vpop.f32.mrb[6].mxu0 }
 0x1f5   : > { %v4413_v51 = vpack.c.bf16 %v900_v50, %v896_v48  ;;  %v4415_v52 = vpop.f32.mrb[7].mxu0 }
 0x1f6   : > { %v2140_v53 = vpack.c.bf16 %v4415_v52, %v4411_v49 }
 0x1f7   : > { %1079 = vrot.lane.b32.xlu1 %v4413_v51, %s3899_s18 }
 0x1fa   : > { %v906_v54 = vpop.f32.mrb[8].mxu0 }
 0x1fb   : > { %v4421_v55 = vpop.f32.mrb[9].mxu0 }
 0x1fc   : > { %v910_v56 = vpop.f32.mrb[10].mxu0 }
 0x1fd   : > { %v4423_v58 = vpack.c.bf16 %v910_v56, %v906_v54  ;;  %v4425_v59 = vpop.f32.mrb[11].mxu0 }
 0x1fe   : > { %v5653_v43 = vpack.c.bf16 %v4425_v59, %v4421_v55 }
 0x202   : > { %v916_v61 = vpop.f32.mrb[12].mxu0 }
 0x203   : > { %v4429_v62 = vpop.f32.mrb[13].mxu0 }
 0x204   : > { %v920_v63 = vpop.f32.mrb[14].mxu0 }
 0x205   : > { %v4431_v0 = vpack.c.bf16 %v920_v63, %v916_v61  ;;  %v4433_v1 = vpop.f32.mrb[15].mxu0 }
 0x206   : > { %v5655_v46 = vpack.c.bf16 %v4433_v1, %v4429_v62 }
 0x20a   : > { %v926_v3 = vpop.f32.mrb[16].mxu0 }
 0x20b   : > { %v4437_v4 = vpop.f32.mrb[17].mxu0 }
 0x20c   : > { %v930_v5 = vpop.f32.mrb[18].mxu0 }
 0x20d   : > { %v4439_v6 = vpack.c.bf16 %v930_v5, %v926_v3  ;;  %v4441_v7 = vpop.f32.mrb[19].mxu0 }
 0x20e   : > { %v5657_v49 = vpack.c.bf16 %v4441_v7, %v4437_v4 }
 0x212   : > { %v936_v9 = vpop.f32.mrb[20].mxu0 }
 0x213   : > { %v4445_v10 = vpop.f32.mrb[21].mxu0 }
 0x214   : > { %v940_v11 = vpop.f32.mrb[22].mxu0 }
 0x215   : > { %v4447_v12 = vpack.c.bf16 %v940_v11, %v936_v9  ;;  %v4449_v13 = vpop.f32.mrb[23].mxu0 }
 0x216   : > { %v5659_v52 = vpack.c.bf16 %v4449_v13, %v4445_v10 }
 0x21a   : > { %v946_v15 = vpop.f32.mrb[24].mxu0 }
 0x21b   : > { %v4453_v16 = vpop.f32.mrb[25].mxu0 }
 0x21c   : > { %v950_v17 = vpop.f32.mrb[26].mxu0 }
 0x21d   : > { %v4455_v18 = vpack.c.bf16 %v950_v17, %v946_v15  ;;  %v4457_v19 = vpop.f32.mrb[27].mxu0 }
 0x21e   : > { %v5661_v55 = vpack.c.bf16 %v4457_v19, %v4453_v16 }
 0x222   : > { %v956_v21 = vpop.f32.mrb[28].mxu0 }
 0x223   : > { %v4461_v22 = vpop.f32.mrb[29].mxu0 }
 0x224   : > { %v960_v23 = vpop.f32.mrb[30].mxu0 }
 0x225   : > { %v4463_v24 = vpack.c.bf16 %v960_v23, %v956_v21  ;;  %v4465_v25 = vpop.f32.mrb[31].mxu0 }
 0x226   : > { %v5663_v59 = vpack.c.bf16 %v4465_v25, %v4461_v22 }
 0x22a   : > { %v966_v27 = vpop.f32.mrb[32].mxu0 }
 0x22b   : > { %v4469_v28 = vpop.f32.mrb[33].mxu0 }
 0x22c   : > { %v970_v29 = vpop.f32.mrb[34].mxu0 }
 0x22d   : > { %v4471_v30 = vpack.c.bf16 %v970_v29, %v966_v27  ;;  %v4473_v31 = vpop.f32.mrb[35].mxu0 }
 0x22e   : > { %v2147_v32 = vpack.c.bf16 %v4473_v31, %v4469_v28 }
 0x22f   : > { %1093 = vrot.lane.b32.xlu0 %v4471_v30, %s3899_s18 }
 0x232   : > { %v976_v33 = vpop.f32.mrb[36].mxu0 }
 0x233   : > { %1081 = vrot.lane.b32.xlu0 %v4423_v58, %s3899_s18  ;;  %v4481_v34 = vpop.f32.mrb[37].mxu0 }
 0x234   : > { %v980_v35 = vpop.f32.mrb[38].mxu0 }
 0x235   : > { %v4483_v36 = vpack.c.bf16 %v980_v35, %v976_v33  ;;  %v4485_v37 = vpop.f32.mrb[39].mxu0 }
 0x236   : > { %v2148_v38 = vpack.c.bf16 %v4485_v37, %v4481_v34 }
 0x237   : > { %1083 = vrot.lane.b32.xlu0 %v4431_v0, %s3899_s18  ;;  %1095 = vrot.lane.b32.xlu1 %v4483_v36, %s3899_s18 }
 0x23a   : > { %v986_v39 = vpop.f32.mrb[40].mxu0 }
 0x23b   : > { %1085 = vrot.lane.b32.xlu0 %v4439_v6, %s3899_s18  ;;  %v4495_v40 = vpop.f32.mrb[41].mxu0 }
 0x23c   : > { %v990_v41 = vpop.f32.mrb[42].mxu0 }
 0x23d   : > { %v4497_v42 = vpack.c.bf16 %v990_v41, %v986_v39  ;;  %v4499_v44 = vpop.f32.mrb[43].mxu0 }
 0x23e   : > { %v2149_v48 = vpack.c.bf16 %v4499_v44, %v4495_v40 }
 0x23f   : > { %1087 = vrot.lane.b32.xlu0 %v4447_v12, %s3899_s18  ;;  %1097 = vrot.lane.b32.xlu1 %v4497_v42, %s3899_s18 }
 0x242   : > { %v996_v50 = vpop.f32.mrb[44].mxu0 }
 0x243   : > { %1089 = vrot.lane.b32.xlu0 %v4455_v18, %s3899_s18  ;;  %v4509_v54 = vpop.f32.mrb[45].mxu0 }
 0x244   : > { %v1000_v56 = vpop.f32.mrb[46].mxu0 }
 0x245   : > { %v4511_v61 = vpack.c.bf16 %v1000_v56, %v996_v50  ;;  %v4513_v63 = vpop.f32.mrb[47].mxu0 }
 0x247   : > { %1091 = vrot.lane.b32.xlu0 %v4463_v24, %s3899_s18  ;;  %1099 = vrot.lane.b32.xlu1 %v4511_v61, %s3899_s18 }
 0x24a   : > { %v1006_v5 = vpop.f32.mrb[48].mxu0 }
 0x24b   : > { %v4521_v9 = vpop.f32.mrb[49].mxu0 }
 0x24c   : > { %v1010_v11 = vpop.f32.mrb[50].mxu0 }
 0x24d   : > { %v4523_v15 = vpack.c.bf16 %v1010_v11, %v1006_v5  ;;  %v4525_v17 = vpop.f32.mrb[51].mxu0 }
 0x24f   : > { %1101 = vrot.lane.b32.xlu1 %v4523_v15, %s3899_s18 }
 0x252   : > { %v1016_v23 = vpop.f32.mrb[52].mxu0 }
 0x253   : > { %v4531_v27 = vpop.f32.mrb[53].mxu0 }
 0x254   : > { %v1020_v29 = vpop.f32.mrb[54].mxu0 }
 0x255   : > { %v4533_v33 = vpack.c.bf16 %v1020_v29, %v1016_v23  ;;  %v4535_v35 = vpop.f32.mrb[55].mxu0 }
 0x257   : > { %1103 = vrot.lane.b32.xlu1 %v4533_v33, %s3899_s18 }
 0x25a   : > { %v1026_v41 = vpop.f32.mrb[56].mxu0 }
 0x25b   : > { %v4541_v50 = vpop.f32.mrb[57].mxu0 }
 0x25c   : > { %v1030_v56 = vpop.f32.mrb[58].mxu0 }
 0x25d   : > { %v4543_v5 = vpack.c.bf16 %v1030_v56, %v1026_v41  ;;  %v4545_v11 = vpop.f32.mrb[59].mxu0 }
 0x25f   : > { %1105 = vrot.lane.b32.xlu1 %v4543_v5, %s3899_s18 }
 0x261   : > { %v1078_v56 = vpop.permute.xlu0 %1077 }
 0x262   : > { %v1036_v29 = vpop.f32.mrb[60].mxu0  ;;  %v1159_v23 = vsel %vm1109_vm0, %v1078_v56, 0 }
 0x263   : > { %v4551_v57 = vpop.f32.mrb[61].mxu0 }
 0x264   : > { %v1040_v26 = vpop.f32.mrb[62].mxu0 }
 0x265   : > { %v4553_v20 = vpack.c.bf16 %v1040_v26, %v1036_v29  ;;  %v4555_v14 = vpop.f32.mrb[63].mxu0 }
 0x267   : > { %1107 = vrot.lane.b32.xlu1 %v4553_v20, %s3899_s18 }
 0x269   : > { %v1080_v8 = vpop.permute.xlu1 %1079 }
 0x26a   : > { %v1162_v26 = vsel %vm1109_vm0, %v1080_v8, 0 }
 0x2a1   : > { %v1094_v39 = vpop.permute.xlu0 %1093 }
 0x2a2   : > { %3522 = vmatprep.subr.msk.bf16.mxu1 %vm1109_vm0, %v1094_v39 }
 0x2a3   : > { %3231 = vmatpush3.bf16.xpose.msra.mxu1 %v1159_v23 }
 0x2a5   : > { %v1082_v29 = vpop.permute.xlu0 %1081 }
 0x2a6   : > { %v1165_v41 = vsel %vm1109_vm0, %v1082_v29, 0 }
 0x2a9   : > { %v1096_v21 = vpop.permute.xlu1 %1095  ;;  %v1084_v3 = vpop.permute.xlu0 %1083 }
 0x2aa   : > { %3523 = vmatprep.subr.msk.bf16.mxu1 %vm1109_vm0, %v1096_v21  ;;  %v1168_v39 = vsel %vm1109_vm0, %v1084_v3, 0 }
 0x2ab   : > { %3233 = vmatpush3.bf16.xpose.msra.mxu1 %v1162_v26 }
 0x2ad   : > { %v1086_v23 = vpop.permute.xlu0 %1085 }
 0x2ae   : > { %v1171_v8 = vsel %vm1109_vm0, %v1086_v23, 0 }
 0x2b1   : > { %v1098_v2 = vpop.permute.xlu1 %1097  ;;  %v1088_v21 = vpop.permute.xlu0 %1087 }
 0x2b2   : > { %3524 = vmatprep.subr.msk.bf16.mxu1 %vm1109_vm0, %v1098_v2  ;;  %v1174_v29 = vsel %vm1109_vm0, %v1088_v21, 0 }
 0x2b3   : > { %3235 = vmatpush3.bf16.xpose.msra.mxu1 %v1165_v41 }
 0x2b5   : > { %v1090_v2 = vpop.permute.xlu0 %1089 }
 0x2b6   : > { %v1177_v3 = vsel %vm1109_vm0, %v1090_v2, 0 }
 0x2b9   : > { %v1100_v60 = vpop.permute.xlu1 %1099 }
 0x2ba   : > { %3525 = vmatprep.subr.msk.bf16.mxu1 %vm1109_vm0, %v1100_v60  ;;  %v1092_v60 = vpop.permute.xlu0 %1091 }
 0x2bb   : > { %3237 = vmatpush3.bf16.xpose.msra.mxu1 %v1168_v39  ;;  %v1180_v23 = vsel %vm1109_vm0, %v1092_v60, 0 }
 0x2c1   : > { %v1102_v56 = vpop.permute.xlu1 %1101 }
 0x2c2   : > { %3526 = vmatprep.subr.msk.bf16.mxu1 %vm1109_vm0, %v1102_v56 }
 0x2c3   : > { %3239 = vmatpush3.bf16.xpose.msra.mxu1 %v1171_v8 }
 0x2c9   : > { %v1104_v26 = vpop.permute.xlu1 %1103 }
 0x2ca   : > { %3527 = vmatprep.subr.msk.bf16.mxu1 %vm1109_vm0, %v1104_v26 }
 0x2cb   : > { %3241 = vmatpush3.bf16.xpose.msra.mxu1 %v1174_v29 }
 0x2d1   : > { %v1106_v41 = vpop.permute.xlu1 %1105 }
 0x2d2   : > { %3528 = vmatprep.subr.msk.bf16.mxu1 %vm1109_vm0, %v1106_v41 }
 0x2d3   : > { %3243 = vmatpush3.bf16.xpose.msra.mxu1 %v1177_v3 }
 0x2d9   : > { %v1108_v39 = vpop.permute.xlu1 %1107 }
 0x2da   : > { %3529 = vmatprep.subr.msk.bf16.mxu1 %vm1109_vm0, %v1108_v39 }
 0x2db   : > { %3245 = vmatpush3.bf16.xpose.msra.mxu1 %v1180_v23 }
 0x2dc   : > { %3278 = vmatprep.subr.bf16.mxu1 %v2147_v32 }
 0x2e2   : > { %3247 = vmatmul.mubr.msk.bf16.vlgmr.msra.gmra.mrb[0].mxu1 %vm1109_vm0, %v4401_v45  ;;  %v5654_v45 = vpack.c.bf16 %v4513_v63, %v4509_v54 }
 0x2e3   : > { %3248 = vmatprep.mubr.msk.bf16.mxu1 %vm1109_vm0, %v4413_v51  ;;  %3279 = vmatpush3.bf16.msra.mxu1 %v2139_v47  ;;  %v5656_v47 = vpack.c.bf16 %v4525_v17, %v4521_v9 }
 0x2e4   : > { %3280 = vmatprep.subr.bf16.mxu1 %v2148_v38 }
 0x2e7   : > { %3281 = vmatpush3.bf16.msra.mxu1 %v2140_v53  ;;  %v5660_v53 = vpack.c.bf16 %v4545_v11, %v4541_v50 }
 0x2e8   : > { %3282 = vmatprep.subr.bf16.mxu1 %v2149_v48 }
 0x2ea   : > { %3249 = vmatmul.mubr.msk.bf16.gmra.mrb[4].mxu1 %vm1109_vm0, %v4413_v51  ;;  %v5658_v51 = vpack.c.bf16 %v4535_v35, %v4531_v27 }
 0x2eb   : > { %3250 = vmatprep.mubr.msk.bf16.mxu1 %vm1109_vm0, %v4423_v58  ;;  %3283 = vmatpush3.bf16.msra.mxu1 %v5653_v43 }
 0x2ec   : > { %3284 = vmatprep.subr.bf16.mxu1 %v5654_v45 }
 0x2ef   : > { %3285 = vmatpush3.bf16.msra.mxu1 %v5655_v46 }
 0x2f0   : > { %3286 = vmatprep.subr.bf16.mxu1 %v5656_v47 }
 0x2f2   : > { %3251 = vmatmul.mubr.msk.bf16.gmra.mrb[8].mxu1 %vm1109_vm0, %v4423_v58  ;;  %v5662_v58 = vpack.c.bf16 %v4555_v14, %v4551_v57  ;;  %v1463_v57 = vlaneseq }
 0x2f3   : > { %3252 = vmatprep.mubr.msk.bf16.mxu1 %vm1109_vm0, %v4431_v0  ;;  %3287 = vmatpush3.bf16.msra.mxu1 %v5657_v49 }
 0x2f4   : > { %3288 = vmatprep.subr.bf16.mxu1 %v5658_v51  ;;  %v4687_v62 = vshrl.u32 %v1463_v57, 7 }
 0x2f6   : > { %v1465_v1 = vadd.s32 8, %v4687_v62  ;;  %v1467_v22 = vadd.s32 24, %v4687_v62  ;;  %v1468_v37 = vadd.s32 32, %v4687_v62  ;;  %v1469_v40 = vadd.s32 40, %v4687_v62 }
 0x2f7   : > { %3289 = vmatpush3.bf16.msra.mxu1 %v5659_v52  ;;  %v1470_v27 = vadd.s32 48, %v4687_v62  ;;  %v1471_v50 = vadd.s32 56, %v4687_v62  ;;  %v1472_v41 = vadd.s32 64, %v4687_v62  ;;  %v1473_v39 = vadd.s32 72, %v4687_v62 }
 0x2f8   : > { %3290 = vmatprep.subr.bf16.mxu1 %v5660_v53  ;;  %v1474_v53 = vadd.s32 80, %v4687_v62 }
 0x2fa   : > { %3253 = vmatmul.mubr.msk.bf16.gmra.mrb[12].mxu1 %vm1109_vm0, %v4431_v0  ;;  %v4689_v0 = vand.u32 127, %v1463_v57 }
 0x2fb   : > { %3254 = vmatprep.mubr.msk.bf16.mxu1 %vm1109_vm0, %v4439_v6  ;;  %3291 = vmatpush3.bf16.msra.mxu1 %v5661_v55 }
 0x2fc   : > { %3292 = vmatprep.subr.bf16.mxu1 %v5662_v58  ;;  %vm1499_vm1 = vcmp.le.s32.totalorder %v4689_v0, %v4687_v62  ;;  %vm1501_vm2 = vcmp.le.s32.totalorder %v4689_v0, %v1465_v1  ;;  %vm1505_vm4 = vcmp.le.s32.totalorder %v4689_v0, %v1467_v22  ;;  %vm1507_vm5 = vcmp.le.s32.totalorder %v4689_v0, %v1468_v37 }
 0x2fd   : > { %vm1509_vm6 = vcmp.le.s32.totalorder %v4689_v0, %v1469_v40  ;;  %vm1511_vm7 = vcmp.le.s32.totalorder %v4689_v0, %v1470_v27  ;;  %vm1513_vm8 = vcmp.le.s32.totalorder %v4689_v0, %v1471_v50  ;;  %vm1515_vm9 = vcmp.le.s32.totalorder %v4689_v0, %v1472_v41 }
 0x2fe   : > { %vm1517_vm10 = vcmp.le.s32.totalorder %v4689_v0, %v1473_v39  ;;  %vm1519_vm11 = vcmp.le.s32.totalorder %v4689_v0, %v1474_v53  ;;  %v1477_v22 = vadd.s32 104, %v4687_v62  ;;  %v1478_v40 = vadd.s32 112, %v4687_v62 }
 0x2ff   : > { %3293 = vmatpush3.bf16.msra.mxu1 %v5663_v59  ;;  %v1475_v59 = vadd.s32 88, %v4687_v62  ;;  %v1483_v53 = vadd.s32 152, %v4687_v62 }
 0x300   : > { %vm1525_vm14 = vcmp.le.s32.totalorder %v4689_v0, %v1477_v22  ;;  %vm1527_vm15 = vcmp.le.s32.totalorder %v4689_v0, %v1478_v40 }
 0x301   : > { %vm1521_vm12 = vcmp.le.s32.totalorder %v4689_v0, %v1475_v59 }
 0x302   : > { %3255 = vmatmul.mubr.msk.bf16.gmra.mrb[16].mxu1 %vm1109_vm0, %v4439_v6 }
 0x303   : > { %3256 = vmatprep.mubr.msk.bf16.mxu1 %vm1109_vm0, %v4447_v12 }
 0x30a   : > { %3257 = vmatmul.mubr.msk.bf16.gmra.mrb[20].mxu1 %vm1109_vm0, %v4447_v12 }
 0x30b   : > { %3258 = vmatprep.mubr.msk.bf16.mxu1 %vm1109_vm0, %v4455_v18 }
 0x312   : > { %3259 = vmatmul.mubr.msk.bf16.gmra.mrb[24].mxu1 %vm1109_vm0, %v4455_v18  ;;  %v1466_v18 = vadd.s32 16, %v4687_v62 }
 0x313   : > { %3260 = vmatprep.mubr.msk.bf16.mxu1 %vm1109_vm0, %v4463_v24 }
 0x314   : > { %vm1503_vm3 = vcmp.le.s32.totalorder %v4689_v0, %v1466_v18 }
 0x31a   : > { %3261 = vmatmul.mubr.msk.bf16.gmra.mrb[28].mxu1 %vm1109_vm0, %v4463_v24 }
 0x31b   : > { %3262 = vmatprep.mubr.msk.bf16.mxu1 %vm1109_vm0, %v4471_v30 }
 0x322   : > { %3263 = vmatmul.mubr.msk.bf16.gmra.mrb[32].mxu1 %vm1109_vm0, %v4471_v30 }
 0x323   : > { %3264 = vmatprep.mubr.msk.bf16.mxu1 %vm1109_vm0, %v4483_v36 }
 0x32a   : > { %3265 = vmatmul.mubr.msk.bf16.gmra.mrb[36].mxu1 %vm1109_vm0, %v4483_v36 }
 0x32b   : > { %3266 = vmatprep.mubr.msk.bf16.mxu1 %vm1109_vm0, %v4497_v42 }
 0x332   : > { %3267 = vmatmul.mubr.msk.bf16.gmra.mrb[40].mxu1 %vm1109_vm0, %v4497_v42 }
 0x333   : > { %3268 = vmatprep.mubr.msk.bf16.mxu1 %vm1109_vm0, %v4511_v61 }
 0x33a   : > { %3269 = vmatmul.mubr.msk.bf16.gmra.mrb[44].mxu1 %vm1109_vm0, %v4511_v61 }
 0x33b   : > { %3270 = vmatprep.mubr.msk.bf16.mxu1 %vm1109_vm0, %v4523_v15 }
 0x342   : > { %3271 = vmatmul.mubr.msk.bf16.gmra.mrb[48].mxu1 %vm1109_vm0, %v4523_v15 }
 0x343   : > { %3272 = vmatprep.mubr.msk.bf16.mxu1 %vm1109_vm0, %v4533_v33 }
 0x34a   : > { %3273 = vmatmul.mubr.msk.bf16.gmra.mrb[52].mxu1 %vm1109_vm0, %v4533_v33 }
 0x34b   : > { %3274 = vmatprep.mubr.msk.bf16.mxu1 %vm1109_vm0, %v4543_v5 }
 0x352   : > { %3275 = vmatmul.mubr.msk.bf16.gmra.mrb[56].mxu1 %vm1109_vm0, %v4543_v5 }
 0x353   : > { %3276 = vmatprep.mubr.msk.bf16.mxu1 %vm1109_vm0, %v4553_v20 }
 0x35a   : > { %3277 = vmatmul.mubr.msk.bf16.gmra.mrb[60].mxu1 %vm1109_vm0, %v4553_v20 }
 0x3b5   : > { %v1240_v4 = vpop.f32.mrb[0].mxu1 }
 0x3b6   : > { %v1399_v6 = vmul.f32 0.125, %v1240_v4  ;;  %v1242_v7 = vpop.f32.mrb[1].mxu1 }
 0x3b7   : > { %v1244_v10 = vpop.f32.mrb[2].mxu1 }
 0x3b8   : > { %v1401_v12 = vmul.f32 0.125, %v1244_v10  ;;  %v1246_v13 = vpop.f32.mrb[3].mxu1  ;;  %v4695_v14 = vsel %vm1499_vm1, %v1399_v6, -1e+30 }
 0x3b9   : > { %v1627_v16 = vmax.f32 %v4695_v14, -1e+30 }
 0x3ba   : > { %v4699_v19 = vsel %vm1501_vm2, %v1401_v12, -1e+30 }
 0x3bb   : > { %1628 = vmax.xlane.f32.xlu0 %v1627_v16  ;;  %v1630_v20 = vmax.f32 %v4699_v19, -1e+30  ;;  %v1476_v16 = vadd.s32 96, %v4687_v62 }
 0x3bd   : > { %1631 = vmax.xlane.f32.xlu1 %v1630_v20  ;;  %v1250_v24 = vpop.f32.mrb[4].mxu1  ;;  %vm1523_vm13 = vcmp.le.s32.totalorder %v4689_v0, %v1476_v16 }
 0x3be   : > { %v1403_v25 = vmul.f32 0.125, %v1250_v24  ;;  %v1252_v28 = vpop.f32.mrb[5].mxu1 }
 0x3bf   : > { %v1254_v30 = vpop.f32.mrb[6].mxu1 }
 0x3c0   : > { %v1405_v31 = vmul.f32 0.125, %v1254_v30  ;;  %v1256_v32 = vpop.f32.mrb[7].mxu1  ;;  %v4705_v34 = vsel %vm1503_vm3, %v1403_v25, -1e+30 }
 0x3c1   : > { %v1633_v36 = vmax.f32 %v4705_v34, -1e+30 }
 0x3c2   : > { %v4709_v38 = vsel %vm1505_vm4, %v1405_v31, -1e+30 }
 0x3c3   : > { %1634 = vmax.xlane.f32.xlu0 %v1633_v36  ;;  %v1636_v44 = vmax.f32 %v4709_v38, -1e+30 }
 0x3c5   : > { %v1260_v42 = vpop.f32.mrb[8].mxu1 }
 0x3c6   : > { %v1407_v48 = vmul.f32 0.125, %v1260_v42  ;;  %v1262_v54 = vpop.f32.mrb[9].mxu1 }
 0x3c7   : > { %1637 = vmax.xlane.f32.xlu0 %v1636_v44  ;;  %v1264_v61 = vpop.f32.mrb[10].mxu1 }
 0x3c8   : > { %v1409_v63 = vmul.f32 0.125, %v1264_v61  ;;  %v1266_v9 = vpop.f32.mrb[11].mxu1  ;;  %v4715_v15 = vsel %vm1507_vm5, %v1407_v48, -1e+30  ;;  %v1479_v48 = vadd.s32 120, %v4687_v62 }
 0x3c9   : > { %v1639_v17 = vmax.f32 %v4715_v15, -1e+30 }
 0x3ca   : > { %v4719_v33 = vsel %vm1509_vm6, %v1409_v63, -1e+30  ;;  %vm1529_vm1 = vcmp.le.s32.totalorder %v4689_v0, %v1479_v48 }
 0x3cb   : > { %1640 = vmax.xlane.f32.xlu1 %v1639_v17  ;;  %v1642_v35 = vmax.f32 %v4719_v33, -1e+30 }
 0x3cd   : > { %1643 = vmax.xlane.f32.xlu0 %v1642_v35  ;;  %v1270_v5 = vpop.f32.mrb[12].mxu1 }
 0x3ce   : > { %v1411_v11 = vmul.f32 0.125, %v1270_v5  ;;  %v1272_v56 = vpop.f32.mrb[13].mxu1 }
 0x3cf   : > { %v1274_v8 = vpop.f32.mrb[14].mxu1  ;;  %v4772_v56 = vadd.s32 128, %v4689_v0 }
 0x3d0   : > { %v1413_v21 = vmul.f32 0.125, %v1274_v8  ;;  %v1276_v26 = vpop.f32.mrb[15].mxu1  ;;  %v4725_v29 = vsel %vm1511_vm7, %v1411_v11, -1e+30  ;;  %v1480_v11 = vadd.s32 128, %v4687_v62 }
 0x3d1   : > { %v1645_v2 = vmax.f32 %v4725_v29, -1e+30  ;;  %vm1538_vm5 = vcmp.le.s32.totalorder %v4772_v56, %v1483_v53  ;;  %v1489_v53 = vadd.s32 200, %v4687_v62 }
 0x3d2   : > { %v4729_v3 = vsel %vm1513_vm8, %v1413_v21, -1e+30  ;;  %v1481_v21 = vadd.s32 136, %v4687_v62  ;;  %vm1532_vm2 = vcmp.le.s32.totalorder %v4772_v56, %v1480_v11 }
 0x3d3   : > { %1646 = vmax.xlane.f32.xlu1 %v1645_v2  ;;  %v1648_v60 = vmax.f32 %v4729_v3, -1e+30 }
 0x3d4   : > { %vm1534_vm3 = vcmp.le.s32.totalorder %v4772_v56, %v1481_v21 }
 0x3d5   : > { %1649 = vmax.xlane.f32.xlu0 %v1648_v60  ;;  %v1280_v23 = vpop.f32.mrb[16].mxu1 }
 0x3d6   : > { %v1415_v43 = vmul.f32 0.125, %v1280_v23  ;;  %v1282_v45 = vpop.f32.mrb[17].mxu1 }
 0x3d7   : > { %v1284_v46 = vpop.f32.mrb[18].mxu1 }
 0x3d8   : > { %v1417_v47 = vmul.f32 0.125, %v1284_v46  ;;  %v1286_v49 = vpop.f32.mrb[19].mxu1  ;;  %v4735_v51 = vsel %vm1515_vm9, %v1415_v43, -1e+30 }
 0x3d9   : > { %v1651_v52 = vmax.f32 %v4735_v51, -1e+30 }
 0x3da   : > { %v4739_v55 = vsel %vm1517_vm10, %v1417_v47, -1e+30  ;;  %v1482_v47 = vadd.s32 144, %v4687_v62 }
 0x3db   : > { %1652 = vmax.xlane.f32.xlu1 %v1651_v52  ;;  %v1654_v58 = vmax.f32 %v4739_v55, -1e+30 }
 0x3dc   : > { %vm1536_vm4 = vcmp.le.s32.totalorder %v4772_v56, %v1482_v47 }
 0x3dd   : > { %1655 = vmax.xlane.f32.xlu0 %v1654_v58  ;;  %v1290_v57 = vpop.f32.mrb[20].mxu1 }
 0x3de   : > { %v1419_v1 = vmul.f32 0.125, %v1290_v57  ;;  %v1292_v4 = vpop.f32.mrb[21].mxu1 }
 0x3df   : > { %v1294_v6 = vpop.f32.mrb[22].mxu1 }
 0x3e0   : > { %v1421_v7 = vmul.f32 0.125, %v1294_v6  ;;  %v1296_v10 = vpop.f32.mrb[23].mxu1  ;;  %v4745_v12 = vsel %vm1519_vm11, %v1419_v1, -1e+30  ;;  %vm1550_vm11 = vcmp.le.s32.totalorder %v4772_v56, %v1489_v53  ;;  %v1495_v53 = vadd.s32 248, %v4687_v62 }
 0x3e1   : > { %v1657_v13 = vmax.f32 %v4745_v12, -1e+30 }
 0x3e2   : > { %v4749_v18 = vsel %vm1521_vm12, %v1421_v7, -1e+30 }
 0x3e3   : > { %1658 = vmax.xlane.f32.xlu1 %v1657_v13  ;;  %v1660_v20 = vmax.f32 %v4749_v18, -1e+30 }
 0x3e5   : > { %1661 = vmax.xlane.f32.xlu0 %v1660_v20  ;;  %v1300_v24 = vpop.f32.mrb[24].mxu1  ;;  %v1484_v20 = vadd.s32 160, %v4687_v62 }
 0x3e6   : > { %v1423_v25 = vmul.f32 0.125, %v1300_v24  ;;  %v1302_v28 = vpop.f32.mrb[25].mxu1 }
 0x3e7   : > { %v1304_v30 = vpop.f32.mrb[26].mxu1  ;;  %vm1540_vm6 = vcmp.le.s32.totalorder %v4772_v56, %v1484_v20  ;;  %v1490_v20 = vadd.s32 208, %v4687_v62 }
 0x3e8   : > { %v1425_v31 = vmul.f32 0.125, %v1304_v30  ;;  %v1306_v32 = vpop.f32.mrb[27].mxu1  ;;  %v4755_v36 = vsel %vm1523_vm13, %v1423_v25, -1e+30  ;;  %v1485_v25 = vadd.s32 168, %v4687_v62 }
 0x3e9   : > { %v1663_v37 = vmax.f32 %v4755_v36, -1e+30  ;;  %vm1552_vm12 = vcmp.le.s32.totalorder %v4772_v56, %v1490_v20 }
 0x3ea   : > { %v4759_v42 = vsel %vm1525_vm14, %v1425_v31, -1e+30  ;;  %vm1542_vm7 = vcmp.le.s32.totalorder %v4772_v56, %v1485_v25  ;;  %v1491_v25 = vadd.s32 216, %v4687_v62 }
 0x3eb   : > { %1664 = vmax.xlane.f32.xlu1 %v1663_v37  ;;  %v1666_v44 = vmax.f32 %v4759_v42, -1e+30 }
 0x3ec   : > { %vm1554_vm13 = vcmp.le.s32.totalorder %v4772_v56, %v1491_v25 }
 0x3ed   : > { %1667 = vmax.xlane.f32.xlu0 %v1666_v44  ;;  %v1310_v54 = vpop.f32.mrb[28].mxu1 }
 0x3ee   : > { %v1427_v61 = vmul.f32 0.125, %v1310_v54  ;;  %v1312_v63 = vpop.f32.mrb[29].mxu1 }
 0x3ef   : > { %v1314_v9 = vpop.f32.mrb[30].mxu1  ;;  %v1486_v63 = vadd.s32 176, %v4687_v62 }
 0x3f0   : > { %v1429_v17 = vmul.f32 0.125, %v1314_v9  ;;  %v1316_v27 = vpop.f32.mrb[31].mxu1  ;;  %v4765_v35 = vsel %vm1527_vm15, %v1427_v61, -1e+30 }
 0x3f1   : > { %v1669_v50 = vmax.f32 %v4765_v35, -1e+30  ;;  %v1487_v27 = vadd.s32 184, %v4687_v62  ;;  %vm1544_vm8 = vcmp.le.s32.totalorder %v4772_v56, %v1486_v63  ;;  %v1492_v63 = vadd.s32 224, %v4687_v62 }
 0x3f2   : > { %v4768_v5 = vsel %vm1529_vm1, %v1429_v17, -1e+30 }
 0x3f3   : > { %1670 = vmax.xlane.f32.xlu1 %v1669_v50  ;;  %v1672_v8 = vmax.f32 %v4768_v5, -1e+30  ;;  %vm1546_vm9 = vcmp.le.s32.totalorder %v4772_v56, %v1487_v27  ;;  %v1493_v27 = vadd.s32 232, %v4687_v62  ;;  %vm1556_vm14 = vcmp.le.s32.totalorder %v4772_v56, %v1492_v63 }
 0x3f5   : > { %1673 = vmax.xlane.f32.xlu0 %v1672_v8  ;;  %v1320_v26 = vpop.f32.mrb[32].mxu1  ;;  %vm1558_vm15 = vcmp.le.s32.totalorder %v4772_v56, %v1493_v27 }
 0x3f6   : > { %v1322_v2 = vpop.f32.mrb[33].mxu1  ;;  %v4777_v39 = vmul.f32 0.125, %v1320_v26 }
 0x3f7   : > { %v1432_v41 = vmul.f32 0.125, %v1322_v2  ;;  %v1324_v60 = vpop.f32.mrb[34].mxu1 }
 0x3f8   : > { %v1326_v23 = vpop.f32.mrb[35].mxu1  ;;  %v4782_v45 = vmul.f32 0.125, %v1324_v60 }
 0x3f9   : > { %v1434_v43 = vmul.f32 0.125, %v1326_v23  ;;  %v4780_v0 = vsel %vm1532_vm2, %v1432_v41, -1e+30  ;;  %vm1562_vm2 = vcmp.le.s32.totalorder %v4772_v56, %v1495_v53 }
 0x3fa   : > { %v1675_v46 = vmax.f32 %v4777_v39, %v4780_v0 }
 0x3fb   : > { %v4787_v49 = vsel %vm1534_vm3, %v1434_v43, -1e+30 }
 0x3fc   : > { %1676 = vmax.xlane.f32.xlu1 %v1675_v46  ;;  %v1678_v52 = vmax.f32 %v4782_v45, %v4787_v49  ;;  %v1488_v46 = vadd.s32 192, %v4687_v62 }
 0x3fd   : > { %v1330_v58 = vpop.f32.mrb[36].mxu1 }
 0x3fe   : > { %1679 = vmax.xlane.f32.xlu0 %v1678_v52  ;;  %v1332_v59 = vpop.f32.mrb[37].mxu1  ;;  %v4793_v4 = vmul.f32 0.125, %v1330_v58  ;;  %vm1548_vm10 = vcmp.le.s32.totalorder %v4772_v56, %v1488_v46  ;;  %v1494_v46 = vadd.s32 240, %v4687_v62 }
 0x3ff   : > { %v1436_v57 = vmul.f32 0.125, %v1332_v59  ;;  %v1334_v1 = vpop.f32.mrb[38].mxu1 }
 0x400   : > { %v1336_v6 = vpop.f32.mrb[39].mxu1  ;;  %v4798_v13 = vmul.f32 0.125, %v1334_v1  ;;  %vm1560_vm1 = vcmp.le.s32.totalorder %v4772_v56, %v1494_v46 }
 0x401   : > { %v1438_v7 = vmul.f32 0.125, %v1336_v6  ;;  %v4796_v10 = vsel %vm1536_vm4, %v1436_v57, -1e+30 }
 0x402   : > { %v1681_v16 = vmax.f32 %v4793_v4, %v4796_v10 }
 0x403   : > { %v4803_v22 = vsel %vm1538_vm5, %v1438_v7, -1e+30 }
 0x404   : > { %1682 = vmax.xlane.f32.xlu1 %v1681_v16  ;;  %v1684_v24 = vmax.f32 %v4798_v13, %v4803_v22 }
 0x405   : > { %v1340_v28 = vpop.f32.mrb[40].mxu1 }
 0x406   : > { %1685 = vmax.xlane.f32.xlu0 %v1684_v24  ;;  %v1342_v30 = vpop.f32.mrb[41].mxu1  ;;  %v4809_v37 = vmul.f32 0.125, %v1340_v28 }
 0x407   : > { %v1440_v31 = vmul.f32 0.125, %v1342_v30  ;;  %v1344_v32 = vpop.f32.mrb[42].mxu1 }
 0x408   : > { %v1346_v40 = vpop.f32.mrb[43].mxu1  ;;  %v4814_v54 = vmul.f32 0.125, %v1344_v32 }
 0x409   : > { %v1442_v44 = vmul.f32 0.125, %v1346_v40  ;;  %v4812_v48 = vsel %vm1540_vm6, %v1440_v31, -1e+30 }
 0x40a   : > { %v1687_v61 = vmax.f32 %v4809_v37, %v4812_v48 }
 0x40b   : > { %v4819_v9 = vsel %vm1542_vm7, %v1442_v44, -1e+30 }
 0x40c   : > { %1688 = vmax.xlane.f32.xlu1 %v1687_v61  ;;  %v1690_v17 = vmax.f32 %v4814_v54, %v4819_v9 }
 0x40d   : > { %v1350_v50 = vpop.f32.mrb[44].mxu1 }
 0x40e   : > { %1691 = vmax.xlane.f32.xlu0 %v1690_v17  ;;  %v1352_v11 = vpop.f32.mrb[45].mxu1  ;;  %v4825_v26 = vmul.f32 0.125, %v1350_v50 }
 0x40f   : > { %v1444_v8 = vmul.f32 0.125, %v1352_v11  ;;  %v1354_v21 = vpop.f32.mrb[46].mxu1 }
 0x410   : > { %v1356_v2 = vpop.f32.mrb[47].mxu1  ;;  %v4830_v23 = vmul.f32 0.125, %v1354_v21 }
 0x411   : > { %v1446_v41 = vmul.f32 0.125, %v1356_v2  ;;  %v4828_v60 = vsel %vm1544_vm8, %v1444_v8, -1e+30 }
 0x412   : > { %v1693_v43 = vmax.f32 %v4825_v26, %v4828_v60 }
 0x413   : > { %v4835_v47 = vsel %vm1546_vm9, %v1446_v41, -1e+30 }
 0x414   : > { %1694 = vmax.xlane.f32.xlu1 %v1693_v43  ;;  %v1696_v52 = vmax.f32 %v4830_v23, %v4835_v47 }
 0x415   : > { %v4840_v58 = vpop.f32.mrb[48].mxu1 }
 0x416   : > { %1697 = vmax.xlane.f32.xlu0 %v1696_v52  ;;  %v1362_v59 = vpop.f32.mrb[49].mxu1 }
 0x417   : > { %v1448_v57 = vmul.f32 0.125, %v1362_v59  ;;  %v4843_v1 = vpop.f32.mrb[50].mxu1 }
 0x418   : > { %v1366_v6 = vpop.f32.mrb[51].mxu1 }
 0x419   : > { %v1450_v7 = vmul.f32 0.125, %v1366_v6  ;;  %v4846_v16 = vsel %vm1548_vm10, %v1448_v57, -1e+30 }
 0x41b   : > { %v4849_v24 = vsel %vm1550_vm11, %v1450_v7, -1e+30 }
 0x41d   : > { %v4852_v28 = vpop.f32.mrb[52].mxu1 }
 0x41e   : > { %v1372_v30 = vpop.f32.mrb[53].mxu1 }
 0x41f   : > { %v1452_v31 = vmul.f32 0.125, %v1372_v30  ;;  %v4855_v32 = vpop.f32.mrb[54].mxu1 }
 0x420   : > { %v1376_v40 = vpop.f32.mrb[55].mxu1 }
 0x421   : > { %v1454_v44 = vmul.f32 0.125, %v1376_v40  ;;  %v4858_v61 = vsel %vm1552_vm12, %v1452_v31, -1e+30 }
 0x423   : > { %v4861_v17 = vsel %vm1554_vm13, %v1454_v44, -1e+30 }
 0x425   : > { %v4864_v50 = vpop.f32.mrb[56].mxu1 }
 0x426   : > { %v1382_v11 = vpop.f32.mrb[57].mxu1 }
 0x427   : > { %v1456_v8 = vmul.f32 0.125, %v1382_v11  ;;  %v4867_v21 = vpop.f32.mrb[58].mxu1 }
 0x428   : > { %v1386_v2 = vpop.f32.mrb[59].mxu1 }
 0x429   : > { %v1458_v41 = vmul.f32 0.125, %v1386_v2  ;;  %v4870_v43 = vsel %vm1556_vm14, %v1456_v8, -1e+30 }
 0x42b   : > { %v4873_v52 = vsel %vm1558_vm15, %v1458_v41, -1e+30 }
 0x42d   : > { %v4876_v59 = vpop.f32.mrb[60].mxu1 }
 0x42e   : > { %v1392_v57 = vpop.f32.mrb[61].mxu1 }
 0x42f   : > { %v1460_v6 = vmul.f32 0.125, %v1392_v57  ;;  %v4879_v7 = vpop.f32.mrb[62].mxu1 }
 0x430   : > { %v1396_v20 = vpop.f32.mrb[63].mxu1 }
 0x431   : > { %v1462_v25 = vmul.f32 0.125, %v1396_v20  ;;  %v4882_v30 = vsel %vm1560_vm1, %v1460_v6, -1e+30 }
 0x433   : > { %v4884_v31 = vsel %vm1562_vm2, %v1462_v25, -1e+30 }
 0x448   : > { %v1629_v40 = vpop.xlane.xlu0 %1628 }
 0x449   : > { %v1723_v44 = vsub.f32 %v4695_v14, %v1629_v40  ;;  %v1724_v62 = vsub.f32 -1e+30, %v1629_v40 }
 0x44a   : > { %v1632_v63 = vpop.xlane.xlu1 %1631 }
 0x44b   : > { %v1787_v27 = vmul.f32 1.442695, %v1723_v44  ;;  %v1789_v11 = vmul.f32 1.442695, %v1724_v62  ;;  %v1725_v8 = vsub.f32 %v4699_v19, %v1632_v63  ;;  %v1726_v2 = vsub.f32 -1e+30, %v1632_v63 }
 0x44d   : > { %3610 = vpow2.f32 %v1787_v27  ;;  %v1791_v41 = vmul.f32 1.442695, %v1725_v8  ;;  %v1793_v46 = vmul.f32 1.442695, %v1726_v2 }
 0x44e   : > { %3612 = vpow2.f32 %v1789_v11 }
 0x44f   : > { %3614 = vpow2.f32 %v1791_v41 }
 0x450   : > { %3616 = vpow2.f32 %v1793_v46  ;;  %v1635_v56 = vpop.xlane.xlu0 %1634 }
 0x451   : > { %v1727_v53 = vsub.f32 %v4705_v34, %v1635_v56  ;;  %v1728_v57 = vsub.f32 -1e+30, %v1635_v56 }
 0x453   : > { %v1795_v6 = vmul.f32 1.442695, %v1727_v53  ;;  %v1797_v20 = vmul.f32 1.442695, %v1728_v57 }
 0x454   : > { %v1638_v14 = vpop.xlane.xlu0 %1637 }
 0x455   : > { %3618 = vpow2.f32 %v1795_v6  ;;  %v1729_v25 = vsub.f32 %v4709_v38, %v1638_v14  ;;  %v1730_v40 = vsub.f32 -1e+30, %v1638_v14  ;;  %v4902_v38 = vmul.f32 0.125, %v4840_v58 }
 0x456   : > { %3620 = vpow2.f32 %v1797_v20  ;;  %v4910_v58 = vmul.f32 0.125, %v4843_v1 }
 0x457   : > { %v4890_v19 = vpop.eup %3610  ;;  %v1799_v44 = vmul.f32 1.442695, %v1729_v25  ;;  %v1801_v62 = vmul.f32 1.442695, %v1730_v40  ;;  %v1699_v25 = vmax.f32 %v4902_v38, %v4846_v16 }
 0x458   : > { %v4892_v63 = vpop.eup %3612  ;;  %v1641_v27 = vpop.xlane.xlu1 %1640 }
 0x459   : > { %v4894_v11 = vpop.eup %3614  ;;  %3622 = vpow2.f32 %v1799_v44  ;;  %v1731_v34 = vsub.f32 %v4715_v15, %v1641_v27  ;;  %v1732_v8 = vsub.f32 -1e+30, %v1641_v27  ;;  %v1915_v2 = vadd.f32 %v4892_v63, %v4890_v19 }
 0x45a   : > { %v4899_v41 = vpop.eup %3616  ;;  %3624 = vpow2.f32 %v1801_v62  ;;  %v1644_v46 = vpop.xlane.xlu0 %1643  ;;  %v1702_v62 = vmax.f32 %v4910_v58, %v4849_v24 }
 0x45b   : > { %v1803_v56 = vmul.f32 1.442695, %v1731_v34  ;;  %v1805_v53 = vmul.f32 1.442695, %v1732_v8  ;;  %v1733_v57 = vsub.f32 %v4719_v33, %v1644_v46  ;;  %v1734_v6 = vsub.f32 -1e+30, %v1644_v46  ;;  %1916 = vadd.xlane.f32.xlu1 %v1915_v2 }
 0x45c   : > { %v1918_v15 = vadd.f32 %v4899_v41, %v4894_v11  ;;  %v4922_v8 = vmul.f32 0.125, %v4852_v28 }
 0x45d   : > { %3626 = vpow2.f32 %v1803_v56  ;;  %v1807_v20 = vmul.f32 1.442695, %v1733_v57  ;;  %v1809_v14 = vmul.f32 1.442695, %v1734_v6 }
 0x45e   : > { %3628 = vpow2.f32 %v1805_v53  ;;  %1919 = vadd.xlane.f32.xlu0 %v1918_v15 }
 0x45f   : > { %v4912_v40 = vpop.eup %3618  ;;  %3630 = vpow2.f32 %v1807_v20  ;;  %1700 = vmax.xlane.f32.xlu1 %v1699_v25 }
 0x460   : > { %v4914_v33 = vpop.eup %3620  ;;  %3632 = vpow2.f32 %v1809_v14  ;;  %v1647_v44 = vpop.xlane.xlu1 %1646 }
 0x461   : > { %v1735_v27 = vsub.f32 %v4725_v29, %v1647_v44  ;;  %v1736_v34 = vsub.f32 -1e+30, %v1647_v44  ;;  %v1921_v1 = vadd.f32 %v4914_v33, %v4912_v40  ;;  %v1705_v29 = vmax.f32 %v4922_v8, %v4858_v61 }
 0x462   : > { %1703 = vmax.xlane.f32.xlu0 %v1702_v62  ;;  %v1650_v2 = vpop.xlane.xlu0 %1649  ;;  %v4936_v44 = vmul.f32 0.125, %v4855_v32 }
 0x463   : > { %v4924_v46 = vpop.eup %3622  ;;  %v1811_v56 = vmul.f32 1.442695, %v1735_v27  ;;  %v1813_v53 = vmul.f32 1.442695, %v1736_v34  ;;  %v1737_v57 = vsub.f32 %v4729_v3, %v1650_v2  ;;  %v1738_v6 = vsub.f32 -1e+30, %v1650_v2  ;;  %1922 = vadd.xlane.f32.xlu1 %v1921_v1 }
 0x464   : > { %v4927_v15 = vpop.eup %3624 }
 0x465   : > { %3634 = vpow2.f32 %v1811_v56  ;;  %v1815_v20 = vmul.f32 1.442695, %v1737_v57  ;;  %v1817_v14 = vmul.f32 1.442695, %v1738_v6  ;;  %v1924_v28 = vadd.f32 %v4927_v15, %v4924_v46 }
 0x466   : > { %3636 = vpow2.f32 %v1813_v53  ;;  %v1708_v56 = vmax.f32 %v4936_v44, %v4861_v17  ;;  %v4950_v53 = vmul.f32 0.125, %v4864_v50 }
 0x467   : > { %v4933_v25 = vpop.eup %3626  ;;  %3638 = vpow2.f32 %v1815_v20  ;;  %1925 = vadd.xlane.f32.xlu0 %v1924_v28  ;;  %1706 = vmax.xlane.f32.xlu1 %v1705_v29 }
 0x468   : > { %5664 = vst [vmem:[#allocation8_spill] sm:$0xff] %v4933_v25  ;;  %v4938_v3 = vpop.eup %3628  ;;  %3640 = vpow2.f32 %v1817_v14  ;;  %v1653_v62 = vpop.xlane.xlu1 %1652 }
 0x469   : > { %v4940_v27 = vpop.eup %3630  ;;  %v1739_v34 = vsub.f32 %v4735_v51, %v1653_v62  ;;  %v1740_v1 = vsub.f32 -1e+30, %v1653_v62  ;;  %v1927_v2 = vadd.f32 %v4938_v3, %v4933_v25  ;;  %v1711_v51 = vmax.f32 %v4950_v53, %v4870_v43 }
 0x46a   : > { %v4947_v32 = vpop.eup %3632  ;;  %v1656_v57 = vpop.xlane.xlu0 %1655 }
 0x46b   : > { %v1819_v6 = vmul.f32 1.442695, %v1739_v34  ;;  %v1821_v29 = vmul.f32 1.442695, %v1740_v1  ;;  %v1741_v20 = vsub.f32 %v4739_v55, %v1656_v57  ;;  %v1742_v14 = vsub.f32 -1e+30, %v1656_v57  ;;  %1928 = vadd.xlane.f32.xlu1 %v1927_v2  ;;  %1709 = vmax.xlane.f32.xlu0 %v1708_v56 }
 0x46c   : > { %v1930_v25 = vadd.f32 %v4947_v32, %v4940_v27  ;;  %v4960_v34 = vmul.f32 0.125, %v4867_v21 }
 0x46d   : > { %3642 = vpow2.f32 %v1819_v6  ;;  %v1823_v28 = vmul.f32 1.442695, %v1741_v20  ;;  %v1825_v62 = vmul.f32 1.442695, %v1742_v14 }
 0x46e   : > { %3644 = vpow2.f32 %v1821_v29  ;;  %v1714_v29 = vmax.f32 %v4960_v34, %v4873_v52 }
 0x46f   : > { %v4957_v50 = vpop.eup %3634  ;;  %3646 = vpow2.f32 %v1823_v28  ;;  %1931 = vadd.xlane.f32.xlu0 %v1930_v25  ;;  %1712 = vmax.xlane.f32.xlu1 %v1711_v51  ;;  %v4974_v25 = vmul.f32 0.125, %v4876_v59 }
 0x470   : > { %5665 = vst [vmem:[#allocation9_spill] sm:$0xff] %v4957_v50  ;;  %v4962_v55 = vpop.eup %3636  ;;  %3648 = vpow2.f32 %v1825_v62  ;;  %v1659_v1 = vpop.xlane.xlu1 %1658 }
 0x471   : > { %5666 = vst [vmem:[#allocation10_spill] sm:$0xff] %v4962_v55  ;;  %v4964_v2 = vpop.eup %3638  ;;  %v1743_v56 = vsub.f32 %v4745_v12, %v1659_v1  ;;  %v1744_v57 = vsub.f32 -1e+30, %v1659_v1  ;;  %v1933_v6 = vadd.f32 %v4962_v55, %v4957_v50  ;;  %v1717_v12 = vmax.f32 %v4974_v25, %v4882_v30 }
 0x472   : > { %v4971_v21 = vpop.eup %3640  ;;  %v1662_v20 = vpop.xlane.xlu0 %1661 }
 0x473   : > { %v1827_v14 = vmul.f32 1.442695, %v1743_v56  ;;  %v1829_v51 = vmul.f32 1.442695, %v1744_v57  ;;  %v1745_v28 = vsub.f32 %v4749_v18, %v1662_v20  ;;  %v1746_v62 = vsub.f32 -1e+30, %v1662_v20  ;;  %1934 = vadd.xlane.f32.xlu1 %v1933_v6  ;;  %1715 = vmax.xlane.f32.xlu0 %v1714_v29 }
 0x474   : > { %v1936_v55 = vadd.f32 %v4971_v21, %v4964_v2  ;;  %v4984_v56 = vmul.f32 0.125, %v4879_v7 }
 0x475   : > { %3650 = vpow2.f32 %v1827_v14  ;;  %v1831_v1 = vmul.f32 1.442695, %v1745_v28  ;;  %v1833_v50 = vmul.f32 1.442695, %v1746_v62 }
 0x476   : > { %3652 = vpow2.f32 %v1829_v51  ;;  %v1720_v51 = vmax.f32 %v4984_v56, %v4884_v31 }
 0x477   : > { %v4981_v59 = vpop.eup %3642  ;;  %3654 = vpow2.f32 %v1831_v1  ;;  %1937 = vadd.xlane.f32.xlu0 %v1936_v55  ;;  %1718 = vmax.xlane.f32.xlu1 %v1717_v12 }
 0x478   : > { %5667 = vst [vmem:[#allocation11_spill] sm:$0xff] %v4981_v59  ;;  %v4986_v18 = vpop.eup %3644  ;;  %3656 = vpow2.f32 %v1833_v50  ;;  %v1665_v57 = vpop.xlane.xlu1 %1664 }
 0x479   : > { %5668 = vst [vmem:[#allocation12_spill] sm:$0xff] %v4986_v18  ;;  %v4988_v6 = vpop.eup %3646  ;;  %v1747_v29 = vsub.f32 %v4755_v36, %v1665_v57  ;;  %v1748_v20 = vsub.f32 -1e+30, %v1665_v57  ;;  %v1939_v14 = vadd.f32 %v4986_v18, %v4981_v59 }
 0x47a   : > { %5669 = vst [vmem:[#allocation13_spill] sm:$0xff] %v4988_v6  ;;  %v4995_v7 = vpop.eup %3648  ;;  %v1668_v28 = vpop.xlane.xlu0 %1667 }
 0x47b   : > { %v1835_v55 = vmul.f32 1.442695, %v1747_v29  ;;  %v1837_v62 = vmul.f32 1.442695, %v1748_v20  ;;  %v1749_v12 = vsub.f32 %v4759_v42, %v1668_v28  ;;  %v1750_v50 = vsub.f32 -1e+30, %v1668_v28  ;;  %1940 = vadd.xlane.f32.xlu1 %v1939_v14  ;;  %1721 = vmax.xlane.f32.xlu0 %v1720_v51 }
 0x47c   : > { %v1942_v57 = vadd.f32 %v4995_v7, %v4988_v6 }
 0x47d   : > { %3658 = vpow2.f32 %v1835_v55  ;;  %v1839_v1 = vmul.f32 1.442695, %v1749_v12  ;;  %v1841_v36 = vmul.f32 1.442695, %v1750_v50 }
 0x47e   : > { %3660 = vpow2.f32 %v1837_v62 }
 0x47f   : > { %v5000_v59 = vpop.eup %3650  ;;  %3662 = vpow2.f32 %v1839_v1  ;;  %1943 = vadd.xlane.f32.xlu0 %v1942_v57 }
 0x480   : > { %5670 = vst [vmem:[#allocation14_spill] sm:$0xff] %v5000_v59  ;;  %v5002_v18 = vpop.eup %3652  ;;  %3664 = vpow2.f32 %v1841_v36  ;;  %v1671_v29 = vpop.xlane.xlu1 %1670 }
 0x481   : > { %v5004_v20 = vpop.eup %3654  ;;  %v1751_v42 = vsub.f32 %v4765_v35, %v1671_v29  ;;  %v1752_v14 = vsub.f32 -1e+30, %v1671_v29  ;;  %v1945_v51 = vadd.f32 %v5002_v18, %v5000_v59 }
 0x482   : > { %v5009_v28 = vpop.eup %3656  ;;  %v1674_v55 = vpop.xlane.xlu0 %1673 }
 0x483   : > { %v1843_v62 = vmul.f32 1.442695, %v1751_v42  ;;  %v1845_v12 = vmul.f32 1.442695, %v1752_v14  ;;  %v1753_v50 = vsub.f32 %v4768_v5, %v1674_v55  ;;  %v1754_v1 = vsub.f32 -1e+30, %v1674_v55  ;;  %1946 = vadd.xlane.f32.xlu1 %v1945_v51 }
 0x484   : > { %v1948_v36 = vadd.f32 %v5009_v28, %v5004_v20 }
 0x485   : > { %3666 = vpow2.f32 %v1843_v62  ;;  %v1847_v57 = vmul.f32 1.442695, %v1753_v50  ;;  %v1849_v6 = vmul.f32 1.442695, %v1754_v1 }
 0x486   : > { %3668 = vpow2.f32 %v1845_v12  ;;  %1949 = vadd.xlane.f32.xlu0 %v1948_v36 }
 0x487   : > { %v5014_v35 = vpop.eup %3658  ;;  %3670 = vpow2.f32 %v1847_v57 }
 0x488   : > { %5671 = vst [vmem:[#allocation15_spill] sm:$0xff] %v5014_v35  ;;  %v5016_v29 = vpop.eup %3660  ;;  %3672 = vpow2.f32 %v1849_v6 }
 0x489   : > { %5672 = vst [vmem:[#allocation16_spill] sm:$0xff] %v5016_v29  ;;  %v5018_v42 = vpop.eup %3662  ;;  %v1677_v14 = vpop.xlane.xlu1 %1676  ;;  %v1951_v5 = vadd.f32 %v5016_v29, %v5014_v35 }
 0x48a   : > { %v5022_v51 = vpop.eup %3664  ;;  %v1755_v55 = vsub.f32 %v4777_v39, %v1677_v14  ;;  %v1756_v62 = vsub.f32 %v4780_v0, %v1677_v14 }
 0x48b   : > { %1952 = vadd.xlane.f32.xlu1 %v1951_v5  ;;  %v1680_v12 = vpop.xlane.xlu0 %1679  ;;  %v1954_v50 = vadd.f32 %v5022_v51, %v5018_v42 }
 0x48c   : > { %v1851_v1 = vmul.f32 1.442695, %v1755_v55  ;;  %v1853_v36 = vmul.f32 1.442695, %v1756_v62  ;;  %v1757_v6 = vsub.f32 %v4782_v45, %v1680_v12  ;;  %v1758_v57 = vsub.f32 %v4787_v49, %v1680_v12 }
 0x48d   : > { %1955 = vadd.xlane.f32.xlu0 %v1954_v50 }
 0x48e   : > { %3674 = vpow2.f32 %v1851_v1  ;;  %v1855_v35 = vmul.f32 1.442695, %v1757_v6  ;;  %v1857_v29 = vmul.f32 1.442695, %v1758_v57 }
 0x48f   : > { %v5030_v59 = vpop.eup %3666  ;;  %3676 = vpow2.f32 %v1853_v36 }
 0x490   : > { %v5032_v39 = vpop.eup %3668  ;;  %3678 = vpow2.f32 %v1855_v35 }
 0x491   : > { %v5034_v0 = vpop.eup %3670  ;;  %3680 = vpow2.f32 %v1857_v29  ;;  %v1683_v14 = vpop.xlane.xlu1 %1682  ;;  %v1957_v5 = vadd.f32 %v5032_v39, %v5030_v59 }
 0x492   : > { %v5038_v45 = vpop.eup %3672  ;;  %v1759_v49 = vsub.f32 %v4793_v4, %v1683_v14  ;;  %v1760_v55 = vsub.f32 %v4796_v10, %v1683_v14 }
 0x493   : > { %1958 = vadd.xlane.f32.xlu1 %v1957_v5  ;;  %v1686_v62 = vpop.xlane.xlu0 %1685  ;;  %v1960_v12 = vadd.f32 %v5038_v45, %v5034_v0 }
 0x494   : > { %v1859_v50 = vmul.f32 1.442695, %v1759_v49  ;;  %v1861_v35 = vmul.f32 1.442695, %v1760_v55  ;;  %v1761_v1 = vsub.f32 %v4798_v13, %v1686_v62  ;;  %v1762_v29 = vsub.f32 %v4803_v22, %v1686_v62 }
 0x495   : > { %1961 = vadd.xlane.f32.xlu0 %v1960_v12 }
 0x496   : > { %3682 = vpow2.f32 %v1859_v50  ;;  %v1863_v36 = vmul.f32 1.442695, %v1761_v1  ;;  %v1865_v6 = vmul.f32 1.442695, %v1762_v29 }
 0x497   : > { %3684 = vpow2.f32 %v1861_v35 }
 0x498   : > { %v5046_v57 = vpop.eup %3674  ;;  %3686 = vpow2.f32 %v1863_v36 }
 0x499   : > { %v5048_v4 = vpop.eup %3676  ;;  %3688 = vpow2.f32 %v1865_v6  ;;  %v1689_v10 = vpop.xlane.xlu1 %1688 }
 0x49a   : > { %v5050_v14 = vpop.eup %3678  ;;  %v1763_v5 = vsub.f32 %v4809_v37, %v1689_v10  ;;  %v1764_v13 = vsub.f32 %v4812_v48, %v1689_v10  ;;  %v1963_v22 = vadd.f32 %v5048_v4, %v5046_v57 }
 0x49b   : > { %v5056_v49 = vpop.eup %3680  ;;  %v1692_v55 = vpop.xlane.xlu0 %1691 }
 0x49c   : > { %v1867_v62 = vmul.f32 1.442695, %v1763_v5  ;;  %v1869_v12 = vmul.f32 1.442695, %v1764_v13  ;;  %v1765_v50 = vsub.f32 %v4814_v54, %v1692_v55  ;;  %v1766_v35 = vsub.f32 %v4819_v9, %v1692_v55  ;;  %1964 = vadd.xlane.f32.xlu1 %v1963_v22 }
 0x49d   : > { %v1966_v1 = vadd.f32 %v5056_v49, %v5050_v14 }
 0x49e   : > { %3690 = vpow2.f32 %v1867_v62  ;;  %v1871_v37 = vmul.f32 1.442695, %v1765_v50  ;;  %v1873_v29 = vmul.f32 1.442695, %v1766_v35 }
 0x49f   : > { %3692 = vpow2.f32 %v1869_v12  ;;  %1967 = vadd.xlane.f32.xlu0 %v1966_v1 }
 0x4a0   : > { %v5062_v48 = vpop.eup %3682  ;;  %3694 = vpow2.f32 %v1871_v37 }
 0x4a1   : > { %v5064_v36 = vpop.eup %3684  ;;  %3696 = vpow2.f32 %v1873_v29  ;;  %v1695_v6 = vpop.xlane.xlu1 %1694 }
 0x4a2   : > { %v5066_v10 = vpop.eup %3686  ;;  %v1767_v54 = vsub.f32 %v4825_v26, %v1695_v6  ;;  %v1768_v9 = vsub.f32 %v4828_v60, %v1695_v6  ;;  %v1969_v5 = vadd.f32 %v5064_v36, %v5062_v48 }
 0x4a3   : > { %v5072_v13 = vpop.eup %3688  ;;  %v1698_v22 = vpop.xlane.xlu0 %1697 }
 0x4a4   : > { %v1875_v55 = vmul.f32 1.442695, %v1767_v54  ;;  %v1877_v62 = vmul.f32 1.442695, %v1768_v9  ;;  %v1769_v12 = vsub.f32 %v4830_v23, %v1698_v22  ;;  %v1770_v50 = vsub.f32 %v4835_v47, %v1698_v22  ;;  %1970 = vadd.xlane.f32.xlu1 %v1969_v5 }
 0x4a5   : > { %v1972_v35 = vadd.f32 %v5072_v13, %v5066_v10 }
 0x4a6   : > { %3698 = vpow2.f32 %v1875_v55  ;;  %v1879_v26 = vmul.f32 1.442695, %v1769_v12  ;;  %v1881_v1 = vmul.f32 1.442695, %v1770_v50 }
 0x4a7   : > { %3700 = vpow2.f32 %v1877_v62  ;;  %1973 = vadd.xlane.f32.xlu0 %v1972_v35 }
 0x4a8   : > { %v5078_v60 = vpop.eup %3690  ;;  %3702 = vpow2.f32 %v1879_v26 }
 0x4a9   : > { %5673 = vst [vmem:[#allocation17_spill] sm:$0xff] %v5078_v60  ;;  %v5080_v37 = vpop.eup %3692  ;;  %3704 = vpow2.f32 %v1881_v1 }
 0x4aa   : > { %v5082_v29 = vpop.eup %3694  ;;  %v1975_v23 = vadd.f32 %v5080_v37, %v5078_v60 }
 0x4ab   : > { %v5086_v47 = vpop.eup %3696 }
 0x4ac   : > { %1976 = vadd.xlane.f32.xlu1 %v1975_v23  ;;  %v1978_v6 = vadd.f32 %v5086_v47, %v5082_v29 }
 0x4ae   : > { %1979 = vadd.xlane.f32.xlu0 %v1978_v6 }
 0x4b0   : > { %v5090_v54 = vpop.eup %3698 }
 0x4b1   : > { %5674 = vst [vmem:[#allocation18_spill] sm:$0xff] %v5090_v54  ;;  %v5092_v9 = vpop.eup %3700 }
 0x4b2   : > { %5675 = vst [vmem:[#allocation19_spill] sm:$0xff] %v5092_v9  ;;  %v5094_v5 = vpop.eup %3702  ;;  %v1981_v22 = vadd.f32 %v5092_v9, %v5090_v54 }
 0x4b3   : > { %5676 = vst [vmem:[#allocation20_spill] sm:$0xff] %v5094_v5  ;;  %v5098_v55 = vpop.eup %3704 }
 0x4b4   : > { %5677 = vst [vmem:[#allocation21_spill] sm:$0xff] %v5098_v55  ;;  %1982 = vadd.xlane.f32.xlu1 %v1981_v22  ;;  %v1984_v62 = vadd.f32 %v5098_v55, %v5094_v5 }
 0x4b6   : > { %1985 = vadd.xlane.f32.xlu0 %v1984_v62 }
 0x4e8   : > { %v1917_v12 = vpop.xlane.xlu1 %1916 }
 0x4e9   : > { %3706 = vrcp.f32 %v1917_v12 }
 0x4eb   : > { %v1920_v50 = vpop.xlane.xlu0 %1919 }
 0x4ec   : > { %3708 = vrcp.f32 %v1920_v50  ;;  %v1701_v35 = vpop.xlane.xlu1 %1700 }
 0x4ed   : > { %v1771_v26 = vsub.f32 %v4902_v38, %v1701_v35  ;;  %v1772_v1 = vsub.f32 %v4846_v16, %v1701_v35 }
 0x4ef   : > { %v1883_v23 = vmul.f32 1.442695, %v1771_v26  ;;  %v1885_v6 = vmul.f32 1.442695, %v1772_v1  ;;  %v1704_v60 = vpop.xlane.xlu0 %1703 }
 0x4f0   : > { %v1773_v54 = vsub.f32 %v4910_v58, %v1704_v60  ;;  %v1774_v22 = vsub.f32 %v4849_v24, %v1704_v60  ;;  %v1923_v9 = vpop.xlane.xlu1 %1922 }
 0x4f1   : > { %3710 = vpow2.f32 %v1883_v23 }
 0x4f2   : > { %3712 = vpow2.f32 %v1885_v6  ;;  %v1887_v62 = vmul.f32 1.442695, %v1773_v54  ;;  %v1889_v5 = vmul.f32 1.442695, %v1774_v22 }
 0x4f3   : > { %v3707_v12 = vpop.eup %3706  ;;  %3714 = vrcp.f32 %v1923_v9 }
 0x4f4   : > { %3716 = vpow2.f32 %v1887_v62  ;;  %v1926_v50 = vpop.xlane.xlu0 %1925  ;;  %v1707_v55 = vpop.xlane.xlu1 %1706  ;;  %v2044_v58 = vmul.f32 %v3707_v12, %v4892_v63  ;;  %v2043_v9 = vmul.f32 %v3707_v12, %v4890_v19 }
 0x4f5   : > { %3718 = vpow2.f32 %v1889_v5  ;;  %v1775_v16 = vsub.f32 %v4922_v8, %v1707_v55  ;;  %v1776_v38 = vsub.f32 %v4858_v61, %v1707_v55 }
 0x4f6   : > { %v3709_v35 = vpop.eup %3708  ;;  %3720 = vrcp.f32 %v1926_v50 }
 0x4f7   : > { %v2045_v24 = vmul.f32 %v3709_v35, %v4894_v11  ;;  %v1891_v60 = vmul.f32 1.442695, %v1775_v16  ;;  %v1893_v26 = vmul.f32 1.442695, %v1776_v38  ;;  %v2046_v54 = vmul.f32 %v3709_v35, %v4899_v41 }
 0x4f8   : > { %v1929_v1 = vpop.xlane.xlu1 %1928  ;;  %v1710_v23 = vpop.xlane.xlu0 %1709 }
 0x4f9   : > { %3722 = vpow2.f32 %v1891_v60  ;;  %v1777_v5 = vsub.f32 %v4936_v44, %v1710_v23  ;;  %v1778_v8 = vsub.f32 %v4861_v17, %v1710_v23  ;;  %v2108_v61 = vpack.c.bf16 %v2046_v54, %v2044_v58 }
 0x4fa   : > { %3724 = vpow2.f32 %v1893_v26  ;;  %v2107_v55 = vpack.c.bf16 %v2045_v24, %v2043_v9 }
 0x4fb   : > { %v5114_v6 = vpop.eup %3710  ;;  %3726 = vrcp.f32 %v1929_v1  ;;  %v1895_v63 = vmul.f32 1.442695, %v1777_v5  ;;  %v1897_v11 = vmul.f32 1.442695, %v1778_v8  ;;  %2187 = vmatprep.mubr.bf16.mxu1 %v2108_v61 }
 0x4fc   : > { %v5116_v22 = vpop.eup %3712  ;;  %2188 = vmatmul.mubr.bf16.vlgmr.msra.gmra.mrb[64].mxu1 %v2107_v55  ;;  %v1932_v19 = vpop.xlane.xlu0 %1931 }
 0x4fd   : > { %v1713_v41 = vpop.xlane.xlu1 %1712  ;;  %v3715_v62 = vpop.eup %3714  ;;  %3728 = vpow2.f32 %v1895_v63  ;;  %v1987_v12 = vadd.f32 %v5116_v22, %v5114_v6 }
 0x4fe   : > { %v1779_v44 = vsub.f32 %v4950_v53, %v1713_v41  ;;  %v1780_v17 = vsub.f32 %v4870_v43, %v1713_v41  ;;  %v5122_v50 = vpop.eup %3716  ;;  %3730 = vpow2.f32 %v1897_v11  ;;  %v2048_v43 = vmul.f32 %v3715_v62, %v4914_v33 }
 0x4ff   : > { %v5124_v16 = vpop.eup %3718  ;;  %3732 = vrcp.f32 %v1932_v19  ;;  %1988 = vadd.xlane.f32.xlu1 %v1987_v12  ;;  %v2047_v1 = vmul.f32 %v3715_v62, %v4912_v40 }
 0x500   : > { %v1899_v38 = vmul.f32 1.442695, %v1779_v44  ;;  %v1901_v35 = vmul.f32 1.442695, %v1780_v17  ;;  %v3721_v58 = vpop.eup %3720  ;;  %v1716_v60 = vpop.xlane.xlu0 %1715  ;;  %v1990_v53 = vadd.f32 %v5124_v16, %v5122_v50 }
 0x501   : > { %v1935_v24 = vpop.xlane.xlu1 %1934  ;;  %v1781_v26 = vsub.f32 %v4960_v34, %v1716_v60  ;;  %v1782_v54 = vsub.f32 %v4873_v52, %v1716_v60  ;;  %v2050_v9 = vmul.f32 %v3721_v58, %v4927_v15  ;;  %v2049_v23 = vmul.f32 %v3721_v58, %v4924_v46  ;;  %v5678_v60 = vld [vmem:[#allocation8_spill] sm:$0xff] }
 0x502   : > { %3734 = vpow2.f32 %v1899_v38  ;;  %1991 = vadd.xlane.f32.xlu0 %v1990_v53 }
 0x503   : > { %3736 = vpow2.f32 %v1901_v35  ;;  %v5134_v5 = vpop.eup %3722  ;;  %v1903_v8 = vmul.f32 1.442695, %v1781_v26  ;;  %v1905_v61 = vmul.f32 1.442695, %v1782_v54  ;;  %v2110_v55 = vpack.c.bf16 %v2050_v9, %v2048_v43 }
 0x504   : > { %v5136_v63 = vpop.eup %3724  ;;  %3738 = vrcp.f32 %v1935_v24  ;;  %v1938_v33 = vpop.xlane.xlu0 %1937  ;;  %v2109_v11 = vpack.c.bf16 %v2049_v23, %v2047_v1 }
 0x505   : > { %v1719_v34 = vpop.xlane.xlu1 %1718  ;;  %v3727_v52 = vpop.eup %3726  ;;  %3740 = vpow2.f32 %v1903_v8  ;;  %2195 = vmatprep.mubr.bf16.mxu1 %v2110_v55  ;;  %v1993_v40 = vadd.f32 %v5136_v63, %v5134_v5 }
 0x506   : > { %v1783_v15 = vsub.f32 %v4974_v25, %v1719_v34  ;;  %v1784_v19 = vsub.f32 %v4882_v30, %v1719_v34  ;;  %3742 = vpow2.f32 %v1905_v61  ;;  %2196 = vmatmul.mubr.bf16.gmra.mrb[68].mxu1 %v2109_v11  ;;  %v2052_v12 = vmul.f32 %v3727_v52, %v4938_v3  ;;  %v5679_v34 = vld [vmem:[#allocation10_spill] sm:$0xff] }
 0x507   : > { %v5142_v46 = vpop.eup %3728  ;;  %3744 = vrcp.f32 %v1938_v33  ;;  %1994 = vadd.xlane.f32.xlu1 %v1993_v40  ;;  %v2051_v53 = vmul.f32 %v3727_v52, %v5678_v60 }
 0x508   : > { %v1907_v41 = vmul.f32 1.442695, %v1783_v15  ;;  %v1909_v62 = vmul.f32 1.442695, %v1784_v19  ;;  %v5144_v44 = vpop.eup %3730  ;;  %v1722_v17 = vpop.xlane.xlu0 %1721  ;;  %v5680_v15 = vld [vmem:[#allocation9_spill] sm:$0xff] }
 0x509   : > { %v3733_v25 = vpop.eup %3732  ;;  %v1941_v30 = vpop.xlane.xlu1 %1940  ;;  %v1785_v38 = vsub.f32 %v4984_v56, %v1722_v17  ;;  %v1786_v35 = vsub.f32 %v4884_v31, %v1722_v17  ;;  %v1996_v58 = vadd.f32 %v5144_v44, %v5142_v46 }
 0x50a   : > { %3746 = vpow2.f32 %v1907_v41  ;;  %v2054_v24 = vmul.f32 %v3733_v25, %v4947_v32  ;;  %v2053_v43 = vmul.f32 %v3733_v25, %v4940_v27 }
 0x50b   : > { %3748 = vpow2.f32 %v1909_v62  ;;  %v1911_v3 = vmul.f32 1.442695, %v1785_v38  ;;  %v1913_v54 = vmul.f32 1.442695, %v1786_v35  ;;  %1997 = vadd.xlane.f32.xlu0 %v1996_v58 }
 0x50c   : > { %v5154_v26 = vpop.eup %3734  ;;  %3750 = vrcp.f32 %v1941_v30  ;;  %v1944_v56 = vpop.xlane.xlu0 %1943  ;;  %v2112_v31 = vpack.c.bf16 %v2054_v24, %v2052_v12  ;;  %v2111_v1 = vpack.c.bf16 %v2053_v43, %v2051_v53  ;;  %v5681_v53 = vld [vmem:[#allocation12_spill] sm:$0xff] }
 0x50d   : > { %v5156_v9 = vpop.eup %3736  ;;  %3752 = vpow2.f32 %v1911_v3 }
 0x50e   : > { %v1999_v23 = vadd.f32 %v5156_v9, %v5154_v26  ;;  %v3739_v32 = vpop.eup %3738  ;;  %3754 = vpow2.f32 %v1913_v54  ;;  %2203 = vmatprep.mubr.bf16.mxu1 %v2112_v31  ;;  %v5682_v54 = vld [vmem:[#allocation11_spill] sm:$0xff]  ;;  %v5683_v31 = vld [vmem:[#allocation13_spill] sm:$0xff] }
 0x50f   : > { %v5160_v8 = vpop.eup %3740  ;;  %3756 = vrcp.f32 %v1944_v56  ;;  %2204 = vmatmul.mubr.bf16.gmra.mrb[72].mxu1 %v2111_v1  ;;  %v2056_v11 = vmul.f32 %v3739_v32, %v5679_v34  ;;  %v2055_v19 = vmul.f32 %v3739_v32, %v5680_v15 }
 0x510   : > { %2000 = vadd.xlane.f32.xlu1 %v1999_v23  ;;  %v5162_v27 = vpop.eup %3742  ;;  %v1947_v61 = vpop.xlane.xlu1 %1946 }
 0x511   : > { %v3745_v55 = vpop.eup %3744  ;;  %v2002_v33 = vadd.f32 %v5162_v27, %v5160_v8  ;;  %3758 = vrcp.f32 %v1947_v61 }
 0x512   : > { %v2058_v52 = vmul.f32 %v3745_v55, %v4971_v21  ;;  %v2057_v40 = vmul.f32 %v3745_v55, %v4964_v2 }
 0x513   : > { %2003 = vadd.xlane.f32.xlu0 %v2002_v33  ;;  %v1950_v62 = vpop.xlane.xlu0 %1949 }
 0x514   : > { %v5170_v41 = vpop.eup %3746  ;;  %3760 = vrcp.f32 %v1950_v62  ;;  %v2114_v12 = vpack.c.bf16 %v2058_v52, %v2056_v11  ;;  %v2113_v25 = vpack.c.bf16 %v2057_v40, %v2055_v19  ;;  %v5684_v40 = vld [vmem:[#allocation14_spill] sm:$0xff] }
 0x515   : > { %v5172_v17 = vpop.eup %3748 }
 0x516   : > { %v2005_v30 = vadd.f32 %v5172_v17, %v5170_v41  ;;  %v3751_v38 = vpop.eup %3750  ;;  %2211 = vmatprep.mubr.bf16.mxu1 %v2114_v12 }
 0x517   : > { %v5176_v35 = vpop.eup %3752  ;;  %2212 = vmatmul.mubr.bf16.gmra.mrb[76].mxu1 %v2113_v25  ;;  %v2060_v43 = vmul.f32 %v3751_v38, %v5681_v53  ;;  %v2059_v56 = vmul.f32 %v3751_v38, %v5682_v54 }
 0x518   : > { %2006 = vadd.xlane.f32.xlu1 %v2005_v30  ;;  %v5178_v21 = vpop.eup %3754  ;;  %v1953_v2 = vpop.xlane.xlu1 %1952  ;;  %v5685_v30 = vld [vmem:[#allocation16_spill] sm:$0xff] }
 0x519   : > { %v3757_v58 = vpop.eup %3756  ;;  %3762 = vrcp.f32 %v1953_v2  ;;  %v2008_v24 = vadd.f32 %v5178_v21, %v5176_v35 }
 0x51a   : > { %v1956_v60 = vpop.xlane.xlu0 %1955  ;;  %v2062_v3 = vmul.f32 %v3757_v58, %v4995_v7  ;;  %v2061_v1 = vmul.f32 %v3757_v58, %v5683_v31 }
 0x51b   : > { %2009 = vadd.xlane.f32.xlu0 %v2008_v24  ;;  %3764 = vrcp.f32 %v1956_v60  ;;  %v3759_v23 = vpop.eup %3758 }
 0x51c   : > { %v2116_v32 = vpack.c.bf16 %v2062_v3, %v2060_v43  ;;  %v2115_v61 = vpack.c.bf16 %v2061_v1, %v2059_v56  ;;  %v2064_v33 = vmul.f32 %v3759_v23, %v5002_v18  ;;  %v2063_v62 = vmul.f32 %v3759_v23, %v5684_v40  ;;  %v2326_v40 = vld [vmem:[%s4018_s21 + $0x50] sm:$0xff] }
 0x51e   : > { %v3761_v55 = vpop.eup %3760  ;;  %2219 = vmatprep.mubr.bf16.mxu1 %v2116_v32 }
 0x51f   : > { %2220 = vmatmul.mubr.bf16.gmra.mrb[80].mxu1 %v2115_v61  ;;  %v2066_v34 = vmul.f32 %v3761_v55, %v5009_v28  ;;  %v2065_v7 = vmul.f32 %v3761_v55, %v5004_v20  ;;  %v5686_v20 = vld [vmem:[#allocation15_spill] sm:$0xff] }
 0x520   : > { %v1959_v11 = vpop.xlane.xlu1 %1958 }
 0x521   : > { %3766 = vrcp.f32 %v1959_v11  ;;  %v2118_v52 = vpack.c.bf16 %v2066_v34, %v2064_v33  ;;  %v2117_v25 = vpack.c.bf16 %v2065_v7, %v2063_v62  ;;  %v2317_v34 = vld [vmem:[%s4018_s21 + $0x8] sm:$0xff]  ;;  %v2316_v11 = vld [vmem:[%s4018_s21] sm:$0xff] }
 0x522   : > { %v1962_v15 = vpop.xlane.xlu0 %1961 }
 0x523   : > { %v3763_v19 = vpop.eup %3762  ;;  %3768 = vrcp.f32 %v1962_v15  ;;  %2227 = vmatprep.mubr.bf16.mxu1 %v2118_v52  ;;  %v2319_v15 = vld [vmem:[%s4018_s21 + $0x18] sm:$0xff] }
 0x524   : > { %v2068_v38 = vmul.f32 %v3763_v19, %v5685_v30  ;;  %v2067_v60 = vmul.f32 %v3763_v19, %v5686_v20  ;;  %v2323_v19 = vld [vmem:[%s4018_s21 + $0x38] sm:$0xff]  ;;  %v2325_v30 = vld [vmem:[%s4018_s21 + $0x48] sm:$0xff] }
 0x525   : > { %v3765_v12 = vpop.eup %3764 }
 0x526   : > { %v2070_v2 = vmul.f32 %v3765_v12, %v5022_v51  ;;  %v2069_v58 = vmul.f32 %v3765_v12, %v5018_v42 }
 0x527   : > { %2228 = vmatmul.mubr.bf16.gmra.mrb[84].mxu1 %v2117_v25  ;;  %v2344_v25 = vpack.c.bf16 %v2326_v40, %v2323_v19  ;;  %v2337_v19 = vld [vmem:[%s4018_s21 + $0xa8] sm:$0xff]  ;;  %v5691_v40 = vld [vmem:[#allocation18_spill] sm:$0xff] }
 0x528   : > { %v2120_v18 = vpack.c.bf16 %v2070_v2, %v2068_v38  ;;  %v2119_v3 = vpack.c.bf16 %v2069_v58, %v2067_v60 }
 0x529   : > { %v1965_v28 = vpop.xlane.xlu1 %1964 }
 0x52a   : > { %2235 = vmatprep.mubr.bf16.mxu1 %v2120_v18  ;;  %3770 = vrcp.f32 %v1965_v28 }
 0x52b   : > { %v3767_v24 = vpop.eup %3766 }
 0x52c   : > { %v1968_v53 = vpop.xlane.xlu0 %1967  ;;  %v2072_v54 = vmul.f32 %v3767_v24, %v5032_v39  ;;  %v2071_v1 = vmul.f32 %v3767_v24, %v5030_v59  ;;  %v2320_v59 = vld [vmem:[%s4018_s21 + $0x20] sm:$0xff] }
 0x52d   : > { %v3769_v43 = vpop.eup %3768  ;;  %3772 = vrcp.f32 %v1968_v53  ;;  %v2341_v7 = vpack.c.bf16 %v2320_v59, %v2317_v34  ;;  %v5690_v34 = vld [vmem:[#allocation20_spill] sm:$0xff] }
 0x52e   : > { %v2074_v56 = vmul.f32 %v3769_v43, %v5038_v45  ;;  %v2073_v42 = vmul.f32 %v3769_v43, %v5034_v0 }
 0x52f   : > { %2236 = vmatmul.mubr.bf16.gmra.mrb[88].mxu1 %v2119_v3  ;;  %2512 = vmatprep.subr.bf16.mxu0 %v2341_v7 }
 0x530   : > { %v2122_v51 = vpack.c.bf16 %v2074_v56, %v2072_v54  ;;  %v2121_v39 = vpack.c.bf16 %v2073_v42, %v2071_v1  ;;  %3450 = vmatprep.subr.bf16.mxu1 %v2341_v7  ;;  %v2329_v1 = vld [vmem:[%s4018_s21 + $0x68] sm:$0xff] }
 0x531   : > { %v1971_v31 = vpop.xlane.xlu1 %1970 }
 0x532   : > { %2243 = vmatprep.mubr.bf16.mxu1 %v2122_v51  ;;  %3774 = vrcp.f32 %v1971_v31  ;;  %v5687_v51 = vld [vmem:[#allocation17_spill] sm:$0xff] }
 0x534   : > { %v1974_v23 = vpop.xlane.xlu0 %1973  ;;  %v3771_v32 = vpop.eup %3770 }
 0x535   : > { %3776 = vrcp.f32 %v1974_v23  ;;  %v2076_v61 = vmul.f32 %v3771_v32, %v5048_v4  ;;  %v2075_v12 = vmul.f32 %v3771_v32, %v5046_v57  ;;  %v2340_v4 = vpack.c.bf16 %v2319_v15, %v2316_v11  ;;  %v2332_v23 = vld [vmem:[%s4018_s21 + $0x80] sm:$0xff]  ;;  %v2335_v11 = vld [vmem:[%s4018_s21 + $0x98] sm:$0xff]  ;;  %v2334_v15 = vld [vmem:[%s4018_s21 + $0x90] sm:$0xff] }
 0x537   : > { %v3773_v45 = vpop.eup %3772  ;;  %2244 = vmatmul.mubr.bf16.gmra.mrb[92].mxu1 %v2121_v39  ;;  %2513 = vmatpush1.bf16.msra.mxu0 %v2340_v4  ;;  %v2347_v39 = vpack.c.bf16 %v2332_v23, %v2329_v1 }
 0x538   : > { %v2078_v55 = vmul.f32 %v3773_v45, %v5056_v49  ;;  %v2077_v33 = vmul.f32 %v3773_v45, %v5050_v14  ;;  %v2322_v49 = vld [vmem:[%s4018_s21 + $0x30] sm:$0xff]  ;;  %2514 = vmatprep.subr.bf16.mxu0 %v2344_v25  ;;  %3454 = vmatpush1.bf16.msra.mxu1 %v2340_v4  ;;  %v2328_v45 = vld [vmem:[%s4018_s21 + $0x60] sm:$0xff] }
 0x539   : > { %v1977_v0 = vpop.xlane.xlu1 %1976  ;;  %v2343_v2 = vpack.c.bf16 %v2325_v30, %v2322_v49  ;;  %3451 = vmatprep.subr.bf16.mxu1 %v2344_v25 }
 0x53a   : > { %3778 = vrcp.f32 %v1977_v0  ;;  %v2124_v52 = vpack.c.bf16 %v2078_v55, %v2076_v61  ;;  %v2123_v38 = vpack.c.bf16 %v2077_v33, %v2075_v12  ;;  %v5689_v55 = vld [vmem:[#allocation21_spill] sm:$0xff]  ;;  %v2349_v12 = vpack.c.bf16 %v2337_v19, %v2334_v15 }
 0x53b   : > { %v1980_v62 = vpop.xlane.xlu0 %1979  ;;  %2515 = vmatpush1.bf16.msra.mxu0 %v2343_v2 }
 0x53c   : > { %3780 = vrcp.f32 %v1980_v62  ;;  %2251 = vmatprep.mubr.bf16.mxu1 %v2124_v52  ;;  %v3775_v14 = vpop.eup %3774  ;;  %3455 = vmatpush1.bf16.msra.mxu1 %v2343_v2  ;;  %v2338_v52 = vld [vmem:[%s4018_s21 + $0xb0] sm:$0xff] }
 0x53d   : > { %v2080_v28 = vmul.f32 %v3775_v14, %v5064_v36  ;;  %v2079_v53 = vmul.f32 %v3775_v14, %v5062_v48  ;;  %2516 = vmatprep.subr.bf16.mxu0 %v2347_v39  ;;  %3452 = vmatprep.subr.bf16.mxu1 %v2347_v39  ;;  %v2350_v7 = vpack.c.bf16 %v2338_v52, %v2335_v11 }
 0x53f   : > { %v3777_v18 = vpop.eup %3776  ;;  %2252 = vmatmul.mubr.bf16.gmra.mrb[96].mxu1 %v2123_v38 }
 0x540   : > { %v2082_v57 = vmul.f32 %v3777_v18, %v5072_v13  ;;  %v2081_v24 = vmul.f32 %v3777_v18, %v5066_v10 }
 0x541   : > { %v1983_v58 = vpop.xlane.xlu1 %1982 }
 0x542   : > { %3782 = vrcp.f32 %v1983_v58  ;;  %v2126_v20 = vpack.c.bf16 %v2082_v57, %v2080_v28  ;;  %v2125_v3 = vpack.c.bf16 %v2081_v24, %v2079_v53 }
 0x543   : > { %v1986_v60 = vpop.xlane.xlu0 %1985 }
 0x544   : > { %v3779_v43 = vpop.eup %3778  ;;  %3784 = vrcp.f32 %v1986_v60  ;;  %2259 = vmatprep.mubr.bf16.mxu1 %v2126_v20 }
 0x545   : > { %v2084_v13 = vmul.f32 %v3779_v43, %v5080_v37  ;;  %v2083_v31 = vmul.f32 %v3779_v43, %v5687_v51  ;;  %v2331_v37 = vld [vmem:[%s4018_s21 + $0x78] sm:$0xff] }
 0x546   : > { %v3781_v36 = vpop.eup %3780  ;;  %v2346_v0 = vpack.c.bf16 %v2331_v37, %v2328_v45 }
 0x547   : > { %2260 = vmatmul.mubr.bf16.gmra.mrb[100].mxu1 %v2125_v3  ;;  %v2086_v10 = vmul.f32 %v3781_v36, %v5086_v47  ;;  %v2085_v56 = vmul.f32 %v3781_v36, %v5082_v29  ;;  %v5688_v47 = vld [vmem:[#allocation19_spill] sm:$0xff] }
 0x548   : > { %2517 = vmatpush1.bf16.msra.mxu0 %v2346_v0  ;;  %3456 = vmatpush1.bf16.msra.mxu1 %v2346_v0 }
 0x549   : > { %v2128_v54 = vpack.c.bf16 %v2086_v10, %v2084_v13  ;;  %v2127_v42 = vpack.c.bf16 %v2085_v56, %v2083_v31  ;;  %2518 = vmatprep.subr.bf16.mxu0 %v2350_v7  ;;  %3453 = vmatprep.subr.bf16.mxu1 %v2350_v7 }
 0x54b   : > { %2267 = vmatprep.mubr.bf16.mxu1 %v2128_v54 }
 0x54c   : > { %v3783_v48 = vpop.eup %3782  ;;  %2519 = vmatpush1.bf16.msra.mxu0 %v2349_v12  ;;  %3457 = vmatpush1.bf16.msra.mxu1 %v2349_v12 }
 0x54d   : > { %v2088_v61 = vmul.f32 %v3783_v48, %v5688_v47  ;;  %v2087_v62 = vmul.f32 %v3783_v48, %v5691_v40 }
 0x54e   : > { %v3785_v32 = vpop.eup %3784 }
 0x54f   : > { %2268 = vmatmul.mubr.bf16.gmra.mrb[104].mxu1 %v2127_v42  ;;  %v2090_v29 = vmul.f32 %v3785_v32, %v5689_v55  ;;  %v2089_v59 = vmul.f32 %v3785_v32, %v5690_v34 }
 0x551   : > { %v2130_v33 = vpack.c.bf16 %v2090_v29, %v2088_v61  ;;  %v2129_v4 = vpack.c.bf16 %v2089_v59, %v2087_v62 }
 0x553   : > { %2275 = vmatprep.mubr.bf16.mxu1 %v2130_v33 }
 0x557   : > { %2276 = vmatmul.mubr.bf16.gmra.mrb[108].mxu1 %v2129_v4 }
 0x58c   : > { %v1989_v25 = vpop.xlane.xlu1 %1988 }
 0x58d   : > { %3786 = vrcp.f32 %v1989_v25 }
 0x58f   : > { %v1992_v49 = vpop.xlane.xlu0 %1991 }
 0x590   : > { %3788 = vrcp.f32 %v1992_v49 }
 0x594   : > { %v1995_v30 = vpop.xlane.xlu1 %1994 }
 0x595   : > { %3790 = vrcp.f32 %v1995_v30 }
 0x597   : > { %v3787_v14 = vpop.eup %3786 }
 0x598   : > { %v1998_v38 = vpop.xlane.xlu0 %1997  ;;  %v2092_v18 = vmul.f32 %v3787_v14, %v5116_v22  ;;  %v2091_v57 = vmul.f32 %v3787_v14, %v5114_v6 }
 0x599   : > { %3792 = vrcp.f32 %v1998_v38 }
 0x59a   : > { %v3789_v2 = vpop.eup %3788 }
 0x59b   : > { %v2094_v28 = vmul.f32 %v3789_v2, %v5124_v16  ;;  %v2093_v58 = vmul.f32 %v3789_v2, %v5122_v50 }
 0x59d   : > { %v2001_v24 = vpop.xlane.xlu1 %2000  ;;  %v2132_v20 = vpack.c.bf16 %v2094_v28, %v2092_v18  ;;  %v2131_v60 = vpack.c.bf16 %v2093_v58, %v2091_v57 }
 0x59e   : > { %3794 = vrcp.f32 %v2001_v24 }
 0x59f   : > { %2283 = vmatprep.mubr.bf16.mxu1 %v2132_v20  ;;  %v3791_v43 = vpop.eup %3790 }
 0x5a0   : > { %2284 = vmatmul.mubr.bf16.gmra.mrb[112].mxu1 %v2131_v60  ;;  %v2004_v53 = vpop.xlane.xlu0 %2003  ;;  %v2096_v13 = vmul.f32 %v3791_v43, %v5136_v63  ;;  %v2095_v16 = vmul.f32 %v3791_v43, %v5134_v5 }
 0x5a1   : > { %3796 = vrcp.f32 %v2004_v53 }
 0x5a3   : > { %v3793_v3 = vpop.eup %3792 }
 0x5a4   : > { %v2098_v22 = vmul.f32 %v3793_v3, %v5144_v44  ;;  %v2097_v6 = vmul.f32 %v3793_v3, %v5142_v46 }
 0x5a5   : > { %v2007_v36 = vpop.xlane.xlu1 %2006 }
 0x5a6   : > { %v2134_v50 = vpack.c.bf16 %v2098_v22, %v2096_v13  ;;  %v2133_v10 = vpack.c.bf16 %v2097_v6, %v2095_v16  ;;  %3798 = vrcp.f32 %v2007_v36  ;;  %v2318_v36 = vld [vmem:[%s4018_s21 + $0x10] sm:$0xff]  ;;  %v2321_v13 = vld [vmem:[%s4018_s21 + $0x28] sm:$0xff] }
 0x5a7   : > { %v5274_v16 = vpack.c.bf16 %v2321_v13, %v2318_v36  ;;  %v2330_v36 = vld [vmem:[%s4018_s21 + $0x70] sm:$0xff]  ;;  %v2333_v13 = vld [vmem:[%s4018_s21 + $0x88] sm:$0xff] }
 0x5a8   : > { %v2010_v54 = vpop.xlane.xlu0 %2009  ;;  %2291 = vmatprep.mubr.bf16.mxu1 %v2134_v50  ;;  %v3795_v56 = vpop.eup %3794 }
 0x5a9   : > { %3800 = vrcp.f32 %v2010_v54  ;;  %2292 = vmatmul.mubr.bf16.gmra.mrb[116].mxu1 %v2133_v10  ;;  %v2100_v31 = vmul.f32 %v3795_v56, %v5156_v9  ;;  %v2099_v63 = vmul.f32 %v3795_v56, %v5154_v26  ;;  %v5692_v26 = vmov 0   ;;  %3410 = vmatprep.subr.bf16.mxu1 %v5274_v16 }
 0x5ab   : > { %v3797_v51 = vpop.eup %3796 }
 0x5ac   : > { %v2102_v48 = vmul.f32 %v3797_v51, %v5162_v27  ;;  %v2101_v44 = vmul.f32 %v3797_v51, %v5160_v8 }
 0x5ae   : > { %v2136_v5 = vpack.c.bf16 %v2102_v48, %v2100_v31  ;;  %v2135_v42 = vpack.c.bf16 %v2101_v44, %v2099_v63 }
 0x5b0   : > { %2299 = vmatprep.mubr.bf16.mxu1 %v2136_v5  ;;  %v3799_v46 = vpop.eup %3798 }
 0x5b1   : > { %2300 = vmatmul.mubr.bf16.gmra.mrb[120].mxu1 %v2135_v42  ;;  %v2104_v23 = vmul.f32 %v3799_v46, %v5172_v17  ;;  %v2103_v39 = vmul.f32 %v3799_v46, %v5170_v41 }
 0x5b3   : > { %v3801_v1 = vpop.eup %3800 }
 0x5b4   : > { %v2106_v32 = vmul.f32 %v3801_v1, %v5178_v21  ;;  %v2105_v9 = vmul.f32 %v3801_v1, %v5176_v35 }
 0x5b6   : > { %v2138_v45 = vpack.c.bf16 %v2106_v32, %v2104_v23  ;;  %v2137_v27 = vpack.c.bf16 %v2105_v9, %v2103_v39 }
 0x5b8   : > { %2307 = vmatprep.mubr.bf16.mxu1 %v2138_v45 }
 0x5b9   : > { %2308 = vmatmul.mubr.bf16.gmra.mrb[124].mxu1 %v2137_v27 }
 0x5ba   : > { %2664 = vmatprep.mubr.bf16.mxu1 %v5692_v26 }
 0x5cf   : > { %v3294_v8 = vpop.f32.mrb[64].mxu1 }
 0x5d0   : > { %v3295_v37 = vpop.f32.mrb[65].mxu1 }
 0x5d1   : > { %v3296_v47 = vadd.f32 %v3295_v37, %v3294_v8  ;;  %v3297_v61 = vpop.f32.mrb[66].mxu1 }
 0x5d2   : > { %v3298_v55 = vpop.f32.mrb[67].mxu1 }
 0x5d3   : > { %v3299_v29 = vadd.f32 %v3298_v55, %v3297_v61 }
 0x5d5   : > { %v5247_v0 = vpack.c.bf16 %v3299_v29, %v3296_v47 }
 0x5d7   : > { %3195 = vmatmul.mubr.msk.bf16.vlgmr.msra.gmra.mrb[64].mxu0 %vm1109_vm0, %v5247_v0 }
 0x5d8   : > { %2554 = vmatprep.mubr.bf16.mxu0 %v5692_v26 }
 0x5d9   : > { %v3300_v41 = vpop.f32.mrb[68].mxu1 }
 0x5da   : > { %v3301_v17 = vpop.f32.mrb[69].mxu1 }
 0x5db   : > { %v3302_v35 = vadd.f32 %v3301_v17, %v3300_v41  ;;  %v3303_v21 = vpop.f32.mrb[70].mxu1 }
 0x5dc   : > { %v3304_v33 = vpop.f32.mrb[71].mxu1 }
 0x5dd   : > { %v3305_v34 = vadd.f32 %v3304_v33, %v3303_v21 }
 0x5df   : > { %v5252_v59 = vpack.c.bf16 %v3305_v34, %v3302_v35 }
 0x5e1   : > { %3196 = vmatmul.mubr.msk.bf16.gmra.mrb[68].mxu0 %vm1109_vm0, %v5252_v59 }
 0x5e2   : > { %v3306_v11 = vpop.f32.mrb[72].mxu1  ;;  %2564 = vmatprep.mubr.bf16.mxu0 %v5692_v26 }
 0x5e3   : > { %v3307_v52 = vpop.f32.mrb[73].mxu1 }
 0x5e4   : > { %v3308_v7 = vadd.f32 %v3307_v52, %v3306_v11  ;;  %v3309_v15 = vpop.f32.mrb[74].mxu1 }
 0x5e5   : > { %v3310_v19 = vpop.f32.mrb[75].mxu1 }
 0x5e6   : > { %v3311_v40 = vadd.f32 %v3310_v19, %v3309_v15 }
 0x5e8   : > { %v5257_v62 = vpack.c.bf16 %v3311_v40, %v3308_v7 }
 0x5ea   : > { %v3312_v12 = vpop.f32.mrb[76].mxu1  ;;  %3197 = vmatmul.mubr.msk.bf16.gmra.mrb[72].mxu0 %vm1109_vm0, %v5257_v62 }
 0x5eb   : > { %v3313_v4 = vpop.f32.mrb[77].mxu1  ;;  %2574 = vmatprep.mubr.bf16.mxu0 %v5692_v26 }
 0x5ec   : > { %v3314_v25 = vadd.f32 %v3313_v4, %v3312_v12  ;;  %v3315_v49 = vpop.f32.mrb[78].mxu1 }
 0x5ed   : > { %v3316_v30 = vpop.f32.mrb[79].mxu1 }
 0x5ee   : > { %v3317_v14 = vadd.f32 %v3316_v30, %v3315_v49 }
 0x5f0   : > { %v5262_v38 = vpack.c.bf16 %v3317_v14, %v3314_v25 }
 0x5f2   : > { %v3318_v2 = vpop.f32.mrb[80].mxu1  ;;  %3198 = vmatmul.mubr.msk.bf16.gmra.mrb[76].mxu0 %vm1109_vm0, %v5262_v38 }
 0x5f3   : > { %v3319_v18 = vpop.f32.mrb[81].mxu1  ;;  %2584 = vmatprep.mubr.bf16.mxu0 %v5692_v26 }
 0x5f4   : > { %v3320_v28 = vadd.f32 %v3319_v18, %v3318_v2  ;;  %v3321_v57 = vpop.f32.mrb[82].mxu1 }
 0x5f5   : > { %v3322_v58 = vpop.f32.mrb[83].mxu1 }
 0x5f6   : > { %v3323_v24 = vadd.f32 %v3322_v58, %v3321_v57 }
 0x5f8   : > { %v5267_v20 = vpack.c.bf16 %v3323_v24, %v3320_v28  ;;  %v2324_v24 = vld [vmem:[%s4018_s21 + $0x40] sm:$0xff] }
 0x5fa   : > { %v3324_v60 = vpop.f32.mrb[84].mxu1  ;;  %3199 = vmatmul.mubr.msk.bf16.gmra.mrb[80].mxu0 %vm1109_vm0, %v5267_v20 }
 0x5fb   : > { %v3325_v53 = vpop.f32.mrb[85].mxu1  ;;  %2594 = vmatprep.mubr.bf16.mxu0 %v5692_v26 }
 0x5fc   : > { %v3326_v43 = vadd.f32 %v3325_v53, %v3324_v60  ;;  %v3327_v3 = vpop.f32.mrb[86].mxu1  ;;  %v2327_v60 = vld [vmem:[%s4018_s21 + $0x58] sm:$0xff] }
 0x5fd   : > { %v3328_v22 = vpop.f32.mrb[87].mxu1 }
 0x5fe   : > { %v3329_v6 = vadd.f32 %v3328_v22, %v3327_v3  ;;  %v2345_v3 = vpack.c.bf16 %v2327_v60, %v2324_v24  ;;  %v2368_v60 = vld [vmem:[%s4020_s8 + $0x80] sm:$0xff] }
 0x600   : > { %v5277_v50 = vpack.c.bf16 %v3329_v6, %v3326_v43 }
 0x602   : > { %v3330_v10 = vpop.f32.mrb[88].mxu1  ;;  %3200 = vmatmul.mubr.msk.bf16.gmra.mrb[84].mxu0 %vm1109_vm0, %v5277_v50 }
 0x603   : > { %v3331_v54 = vpop.f32.mrb[89].mxu1  ;;  %2604 = vmatprep.mubr.bf16.mxu0 %v5692_v26 }
 0x604   : > { %v3332_v56 = vadd.f32 %v3331_v54, %v3330_v10  ;;  %v3333_v51 = vpop.f32.mrb[90].mxu1  ;;  %v2348_v10 = vpack.c.bf16 %v2333_v13, %v2330_v36 }
 0x605   : > { %v3334_v31 = vpop.f32.mrb[91].mxu1 }
 0x606   : > { %v3335_v48 = vadd.f32 %v3334_v31, %v3333_v51  ;;  %v2336_v31 = vld [vmem:[%s4018_s21 + $0xa0] sm:$0xff] }
 0x608   : > { %v5282_v63 = vpack.c.bf16 %v3335_v48, %v3332_v56  ;;  %v2339_v48 = vld [vmem:[%s4018_s21 + $0xb8] sm:$0xff]  ;;  %s3534_s21 = smul.u32 12288, %s3884_s19  ;;  %s5693_s19 = sand.u32 1, %s3872_s16  }
 0x609   : > { %s5572_s11 = scalar_lea.sflag [#allocation3], %s5693_s19 }
 0x60a   : > { %v3336_v44 = vpop.f32.mrb[92].mxu1  ;;  %3201 = vmatmul.mubr.msk.bf16.gmra.mrb[88].mxu0 %vm1109_vm0, %v5282_v63  ;;  %s5563_s7 = scalar_lea.hbm %s5628_s4, %s3534_s21 }
 0x60b   : > { %v3337_v5 = vpop.f32.mrb[93].mxu1  ;;  %2614 = vmatprep.mubr.bf16.mxu0 %v5692_v26 }
 0x60c   : > { %v3338_v42 = vadd.f32 %v3337_v5, %v3336_v44  ;;  %v3339_v46 = vpop.f32.mrb[94].mxu1 }
 0x60d   : > { %v3340_v1 = vpop.f32.mrb[95].mxu1 }
 0x60e   : > { %v3341_v23 = vadd.f32 %v3340_v1, %v3339_v46 }
 0x610   : > { %v5287_v32 = vpack.c.bf16 %v3341_v23, %v3338_v42  ;;  %v2351_v42 = vpack.c.bf16 %v2339_v48, %v2336_v31 }
 0x612   : > { %v3342_v39 = vpop.f32.mrb[96].mxu1  ;;  %3202 = vmatmul.mubr.msk.bf16.gmra.mrb[92].mxu0 %vm1109_vm0, %v5287_v32 }
 0x613   : > { %v3343_v9 = vpop.f32.mrb[97].mxu1  ;;  %2624 = vmatprep.mubr.bf16.mxu0 %v5692_v26 }
 0x614   : > { %v3344_v45 = vadd.f32 %v3343_v9, %v3342_v39  ;;  %v3345_v27 = vpop.f32.mrb[98].mxu1 }
 0x615   : > { %v3346_v8 = vpop.f32.mrb[99].mxu1 }
 0x616   : > { %v3347_v37 = vadd.f32 %v3346_v8, %v3345_v27 }
 0x618   : > { %v5292_v47 = vpack.c.bf16 %v3347_v37, %v3344_v45 }
 0x61a   : > { %v3348_v61 = vpop.f32.mrb[100].mxu1  ;;  %3203 = vmatmul.mubr.msk.bf16.gmra.mrb[96].mxu0 %vm1109_vm0, %v5292_v47 }
 0x61b   : > { %v3349_v55 = vpop.f32.mrb[101].mxu1  ;;  %2634 = vmatprep.mubr.bf16.mxu0 %v5692_v26 }
 0x61c   : > { %v3350_v29 = vadd.f32 %v3349_v55, %v3348_v61  ;;  %v3351_v41 = vpop.f32.mrb[102].mxu1 }
 0x61d   : > { %v3352_v17 = vpop.f32.mrb[103].mxu1 }
 0x61e   : > { %v3353_v35 = vadd.f32 %v3352_v17, %v3351_v41  ;;  %v2353_v17 = vld [vmem:[%s4020_s8 + $0x8] sm:$0xff] }
 0x620   : > { %v5297_v21 = vpack.c.bf16 %v3353_v35, %v3350_v29 }
 0x622   : > { %v3354_v33 = vpop.f32.mrb[104].mxu1  ;;  %3204 = vmatmul.mubr.msk.bf16.gmra.mrb[100].mxu0 %vm1109_vm0, %v5297_v21 }
 0x623   : > { %v3355_v34 = vpop.f32.mrb[105].mxu1  ;;  %2644 = vmatprep.mubr.bf16.mxu0 %v5692_v26 }
 0x624   : > { %v3356_v11 = vadd.f32 %v3355_v34, %v3354_v33  ;;  %v3357_v52 = vpop.f32.mrb[106].mxu1  ;;  %v2356_v34 = vld [vmem:[%s4020_s8 + $0x20] sm:$0xff] }
 0x625   : > { %v3358_v7 = vpop.f32.mrb[107].mxu1 }
 0x626   : > { %v3359_v15 = vadd.f32 %v3358_v7, %v3357_v52  ;;  %v2358_v7 = vld [vmem:[%s4020_s8 + $0x30] sm:$0xff] }
 0x628   : > { %v5302_v19 = vpack.c.bf16 %v3359_v15, %v3356_v11  ;;  %v2359_v15 = vld [vmem:[%s4020_s8 + $0x38] sm:$0xff] }
 0x62a   : > { %v3360_v40 = vpop.f32.mrb[108].mxu1  ;;  %3205 = vmatmul.mubr.msk.bf16.gmra.mrb[104].mxu0 %vm1109_vm0, %v5302_v19 }
 0x62b   : > { %v3361_v12 = vpop.f32.mrb[109].mxu1  ;;  %2654 = vmatprep.mubr.bf16.mxu0 %v5692_v26 }
 0x62c   : > { %v3362_v4 = vadd.f32 %v3361_v12, %v3360_v40  ;;  %v3363_v25 = vpop.f32.mrb[110].mxu1 }
 0x62d   : > { %v3364_v49 = vpop.f32.mrb[111].mxu1 }
 0x62e   : > { %v3365_v30 = vadd.f32 %v3364_v49, %v3363_v25 }
 0x630   : > { %v5307_v14 = vpack.c.bf16 %v3365_v30, %v3362_v4 }
 0x632   : > { %3206 = vmatmul.mubr.msk.bf16.gmra.mrb[108].mxu0 %vm1109_vm0, %v5307_v14 }
 0x673   : > { %v3366_v2 = vpop.f32.mrb[112].mxu1 }
 0x674   : > { %v3367_v18 = vpop.f32.mrb[113].mxu1 }
 0x675   : > { %v3368_v28 = vadd.f32 %v3367_v18, %v3366_v2  ;;  %v3369_v57 = vpop.f32.mrb[114].mxu1 }
 0x676   : > { %v3370_v58 = vpop.f32.mrb[115].mxu1 }
 0x677   : > { %v3371_v53 = vadd.f32 %v3370_v58, %v3369_v57  ;;  %v2367_v57 = vld [vmem:[%s4020_s8 + $0x78] sm:$0xff] }
 0x679   : > { %v5313_v43 = vpack.c.bf16 %v3371_v53, %v3368_v28 }
 0x67b   : > { %3207 = vmatmul.mubr.msk.bf16.vlgmr.msra.gmra.mrb[128].mxu1 %vm1109_vm0, %v5313_v43 }
 0x67c   : > { %v3372_v22 = vpop.f32.mrb[116].mxu1  ;;  %3411 = vmatpush3.bf16.msra.mxu1 %v5274_v16  ;;  %2674 = vmatprep.mubr.bf16.mxu1 %v5692_v26 }
 0x67d   : > { %v3373_v6 = vpop.f32.mrb[117].mxu1  ;;  %3412 = vmatprep.subr.bf16.mxu1 %v2345_v3 }
 0x67e   : > { %v3374_v54 = vadd.f32 %v3373_v6, %v3372_v22  ;;  %v3375_v56 = vpop.f32.mrb[118].mxu1  ;;  %v2370_v22 = vld [vmem:[%s4020_s8 + $0x90] sm:$0xff] }
 0x67f   : > { %v3376_v51 = vpop.f32.mrb[119].mxu1 }
 0x680   : > { %v3377_v44 = vadd.f32 %v3376_v51, %v3375_v56  ;;  %3413 = vmatpush3.bf16.msra.mxu1 %v2345_v3  ;;  %v2374_v51 = vld [vmem:[%s4020_s8 + $0xb0] sm:$0xff] }
 0x681   : > { %3414 = vmatprep.subr.bf16.mxu1 %v2348_v10 }
 0x682   : > { %v5323_v5 = vpack.c.bf16 %v3377_v44, %v3374_v54 }
 0x684   : > { %v3378_v46 = vpop.f32.mrb[120].mxu1  ;;  %3208 = vmatmul.mubr.msk.bf16.gmra.mrb[132].mxu1 %vm1109_vm0, %v5323_v5 }
 0x685   : > { %v3379_v16 = vpop.f32.mrb[121].mxu1  ;;  %2684 = vmatprep.mubr.bf16.mxu1 %v5692_v26  ;;  %3415 = vmatpush3.bf16.msra.mxu1 %v2348_v10  ;;  %v2373_v10 = vld [vmem:[%s4020_s8 + $0xa8] sm:$0xff] }
 0x686   : > { %v3380_v1 = vadd.f32 %v3379_v16, %v3378_v46  ;;  %v3381_v23 = vpop.f32.mrb[122].mxu1  ;;  %3416 = vmatprep.subr.bf16.mxu1 %v2351_v42  ;;  %v2376_v46 = vld [vmem:[%s4020_s8 + $0xc0] sm:$0xff] }
 0x687   : > { %v3382_v39 = vpop.f32.mrb[123].mxu1 }
 0x688   : > { %v3383_v9 = vadd.f32 %v3382_v39, %v3381_v23 }
 0x689   : > { %3417 = vmatpush3.bf16.msra.mxu1 %v2351_v42 }
 0x68a   : > { %v5328_v45 = vpack.c.bf16 %v3383_v9, %v3380_v1  ;;  %v2379_v1 = vld [vmem:[%s4020_s8 + $0xd8] sm:$0xff]  ;;  %v2380_v9 = vld [vmem:[%s4020_s8 + $0xe0] sm:$0xff] }
 0x68c   : > { %v3384_v27 = vpop.f32.mrb[124].mxu1  ;;  %3209 = vmatmul.mubr.msk.bf16.gmra.mrb[136].mxu1 %vm1109_vm0, %v5328_v45 }
 0x68d   : > { %v3385_v8 = vpop.f32.mrb[125].mxu1  ;;  %2694 = vmatprep.mubr.bf16.mxu1 %v5692_v26  ;;  %v2352_v26 = vld [vmem:[%s4020_s8] sm:$0xff] }
 0x68e   : > { %v3386_v37 = vadd.f32 %v3385_v8, %v3384_v27  ;;  %v3387_v61 = vpop.f32.mrb[126].mxu1 }
 0x68f   : > { %v3388_v55 = vpop.f32.mrb[127].mxu1 }
 0x690   : > { %v3389_v29 = vadd.f32 %v3388_v55, %v3387_v61  ;;  %v2383_v55 = vld [vmem:[%s4020_s8 + $0xf8] sm:$0xff] }
 0x692   : > { %v5333_v41 = vpack.c.bf16 %v3389_v29, %v3386_v37 }
 0x694   : > { %3210 = vmatmul.mubr.msk.bf16.gmra.mrb[140].mxu1 %vm1109_vm0, %v5333_v41 }
 0x695   : > { %3418 = vmatprep.mubr.msk.bf16.mxu1 %vm1109_vm0, %v5247_v0  ;;  %v2355_v0 = vld [vmem:[%s4020_s8 + $0x18] sm:$0xff] }
 0x69c   : > { %3419 = vmatmul.mubr.msk.bf16.vlgmr.msra.gmra.mrb[144].mxu1 %vm1109_vm0, %v5252_v59 }
 0x69d   : > { %3422 = vmatprep.mubr.msk.bf16.mxu1 %vm1109_vm0, %v5257_v62 }
 0x6a4   : > { %3423 = vmatmul.mubr.msk.bf16.gmra.mrb[148].mxu1 %vm1109_vm0, %v5262_v38 }
 0x6a5   : > { %3426 = vmatprep.mubr.msk.bf16.mxu1 %vm1109_vm0, %v5267_v20 }
 0x6aa   : > { %v2546_v35 = vpop.f32.mrb[64].mxu0 }
 0x6ab   : > { %v2866_v33 = vadd.f32 %v2546_v35, %v2352_v26  ;;  %v2548_v59 = vpop.f32.mrb[65].mxu0  ;;  %v2385_v26 = vld [vmem:[%s4020_s8 + $0x108] sm:$0xff] }
 0x6ac   : > { %v2867_v62 = vadd.f32 %v2548_v59, %v2353_v17  ;;  %v2550_v11 = vpop.f32.mrb[66].mxu0  ;;  %3427 = vmatmul.mubr.msk.bf16.gmra.mrb[152].mxu1 %vm1109_vm0, %v5277_v50  ;;  %v2361_v50 = vld [vmem:[%s4020_s8 + $0x48] sm:$0xff] }
 0x6ad   : > { %2962 = vst [vmem:[%s4020_s8] sm:$0xff] %v2866_v33  ;;  %v2869_v38 = vadd.f32 %v2550_v11, %v2355_v0  ;;  %v2552_v20 = vpop.f32.mrb[67].mxu0  ;;  %3430 = vmatprep.mubr.msk.bf16.mxu1 %vm1109_vm0, %v5282_v63  ;;  %v2362_v63 = vld [vmem:[%s4020_s8 + $0x50] sm:$0xff] }
 0x6ae   : > { %2963 = vst [vmem:[%s4020_s8 + $0x8] sm:$0xff] %v2867_v62  ;;  %v2870_v52 = vadd.f32 %v2552_v20, %v2356_v34  ;;  %v2386_v0 = vld [vmem:[%s4020_s8 + $0x110] sm:$0xff] }
 0x6af   : > { %2965 = vst [vmem:[%s4020_s8 + $0x18] sm:$0xff] %v2869_v38  ;;  %v2389_v38 = vld [vmem:[%s4020_s8 + $0x128] sm:$0xff] }
 0x6b0   : > { %2966 = vst [vmem:[%s4020_s8 + $0x20] sm:$0xff] %v2870_v52  ;;  %v2391_v52 = vld [vmem:[%s4020_s8 + $0x138] sm:$0xff] }
 0x6b4   : > { %v2556_v40 = vpop.f32.mrb[68].mxu0  ;;  %3431 = vmatmul.mubr.msk.bf16.gmra.mrb[156].mxu1 %vm1109_vm0, %v5287_v32  ;;  %v2364_v32 = vld [vmem:[%s4020_s8 + $0x60] sm:$0xff] }
 0x6b5   : > { %v2872_v12 = vadd.f32 %v2556_v40, %v2358_v7  ;;  %v2558_v4 = vpop.f32.mrb[69].mxu0  ;;  %3434 = vmatprep.mubr.msk.bf16.mxu1 %vm1109_vm0, %v5292_v47  ;;  %v2365_v47 = vld [vmem:[%s4020_s8 + $0x68] sm:$0xff]  ;;  %v2392_v40 = vld [vmem:[%s4020_s8 + $0x140] sm:$0xff] }
 0x6b6   : > { %v2873_v25 = vadd.f32 %v2558_v4, %v2359_v15  ;;  %v2560_v49 = vpop.f32.mrb[70].mxu0 }
 0x6b7   : > { %2968 = vst [vmem:[%s4020_s8 + $0x30] sm:$0xff] %v2872_v12  ;;  %v2875_v30 = vadd.f32 %v2560_v49, %v2361_v50  ;;  %v2562_v2 = vpop.f32.mrb[71].mxu0  ;;  %v2394_v49 = vld [vmem:[%s4020_s8 + $0x150] sm:$0xff] }
 0x6b8   : > { %2969 = vst [vmem:[%s4020_s8 + $0x38] sm:$0xff] %v2873_v25  ;;  %v2876_v18 = vadd.f32 %v2562_v2, %v2362_v63 }
 0x6b9   : > { %2971 = vst [vmem:[%s4020_s8 + $0x48] sm:$0xff] %v2875_v30  ;;  %v2395_v30 = vld [vmem:[%s4020_s8 + $0x158] sm:$0xff] }
 0x6ba   : > { %2972 = vst [vmem:[%s4020_s8 + $0x50] sm:$0xff] %v2876_v18  ;;  %v2397_v18 = vld [vmem:[%s4020_s8 + $0x168] sm:$0xff] }
 0x6bc   : > { %3435 = vmatmul.mubr.msk.bf16.gmra.mrb[160].mxu1 %vm1109_vm0, %v5297_v21 }
 0x6bd   : > { %v2566_v28 = vpop.f32.mrb[72].mxu0  ;;  %3438 = vmatprep.mubr.msk.bf16.mxu1 %vm1109_vm0, %v5302_v19  ;;  %v2371_v19 = vld [vmem:[%s4020_s8 + $0x98] sm:$0xff] }
 0x6be   : > { %v2878_v58 = vadd.f32 %v2566_v28, %v2364_v32  ;;  %v2568_v24 = vpop.f32.mrb[73].mxu0  ;;  %v2398_v28 = vld [vmem:[%s4020_s8 + $0x170] sm:$0xff] }
 0x6bf   : > { %v2879_v53 = vadd.f32 %v2568_v24, %v2365_v47  ;;  %v2570_v3 = vpop.f32.mrb[74].mxu0 }
 0x6c0   : > { %2974 = vst [vmem:[%s4020_s8 + $0x60] sm:$0xff] %v2878_v58  ;;  %v2881_v36 = vadd.f32 %v2570_v3, %v2367_v57  ;;  %v2572_v13 = vpop.f32.mrb[75].mxu0  ;;  %v2400_v3 = vld [vmem:[%s4020_s8 + $0x180] sm:$0xff] }
 0x6c1   : > { %2975 = vst [vmem:[%s4020_s8 + $0x68] sm:$0xff] %v2879_v53  ;;  %v2882_v21 = vadd.f32 %v2572_v13, %v2368_v60 }
 0x6c2   : > { %2977 = vst [vmem:[%s4020_s8 + $0x78] sm:$0xff] %v2881_v36  ;;  %v2401_v36 = vld [vmem:[%s4020_s8 + $0x188] sm:$0xff] }
 0x6c3   : > { %2978 = vst [vmem:[%s4020_s8 + $0x80] sm:$0xff] %v2882_v21  ;;  %v2403_v21 = vld [vmem:[%s4020_s8 + $0x198] sm:$0xff] }
 0x6c4   : > { %3439 = vmatmul.mubr.msk.bf16.gmra.mrb[164].mxu1 %vm1109_vm0, %v5307_v14 }
 0x6c5   : > { %v2576_v6 = vpop.f32.mrb[76].mxu0  ;;  %3442 = vmatprep.mubr.msk.bf16.mxu1 %vm1109_vm0, %v5313_v43  ;;  %v2377_v43 = vld [vmem:[%s4020_s8 + $0xc8] sm:$0xff] }
 0x6c6   : > { %v2884_v54 = vadd.f32 %v2576_v6, %v2370_v22  ;;  %v2578_v56 = vpop.f32.mrb[77].mxu0  ;;  %v2404_v6 = vld [vmem:[%s4020_s8 + $0x1a0] sm:$0xff] }
 0x6c7   : > { %v2885_v31 = vadd.f32 %v2578_v56, %v2371_v19  ;;  %v2580_v48 = vpop.f32.mrb[78].mxu0 }
 0x6c8   : > { %2980 = vst [vmem:[%s4020_s8 + $0x90] sm:$0xff] %v2884_v54  ;;  %v2887_v44 = vadd.f32 %v2580_v48, %v2373_v10  ;;  %v2582_v42 = vpop.f32.mrb[79].mxu0  ;;  %v2406_v48 = vld [vmem:[%s4020_s8 + $0x1b0] sm:$0xff] }
 0x6c9   : > { %2981 = vst [vmem:[%s4020_s8 + $0x98] sm:$0xff] %v2885_v31  ;;  %v2888_v14 = vadd.f32 %v2582_v42, %v2374_v51 }
 0x6ca   : > { %2983 = vst [vmem:[%s4020_s8 + $0xa8] sm:$0xff] %v2887_v44  ;;  %v2407_v44 = vld [vmem:[%s4020_s8 + $0x1b8] sm:$0xff] }
 0x6cb   : > { %2984 = vst [vmem:[%s4020_s8 + $0xb0] sm:$0xff] %v2888_v14  ;;  %v2409_v14 = vld [vmem:[%s4020_s8 + $0x1c8] sm:$0xff] }
 0x6cc   : > { %3443 = vmatmul.mubr.msk.bf16.gmra.mrb[168].mxu1 %vm1109_vm0, %v5323_v5 }
 0x6cd   : > { %v2586_v16 = vpop.f32.mrb[80].mxu0  ;;  %3446 = vmatprep.mubr.msk.bf16.mxu1 %vm1109_vm0, %v5328_v45  ;;  %v2382_v45 = vld [vmem:[%s4020_s8 + $0xf0] sm:$0xff] }
 0x6ce   : > { %v2890_v23 = vadd.f32 %v2586_v16, %v2376_v46  ;;  %v2588_v39 = vpop.f32.mrb[81].mxu0  ;;  %v2410_v16 = vld [vmem:[%s4020_s8 + $0x1d0] sm:$0xff] }
 0x6cf   : > { %v2891_v27 = vadd.f32 %v2588_v39, %v2377_v43  ;;  %v2590_v8 = vpop.f32.mrb[82].mxu0 }
 0x6d0   : > { %2986 = vst [vmem:[%s4020_s8 + $0xc0] sm:$0xff] %v2890_v23  ;;  %v2893_v37 = vadd.f32 %v2590_v8, %v2379_v1  ;;  %v2592_v5 = vpop.f32.mrb[83].mxu0  ;;  %v2412_v8 = vld [vmem:[%s4020_s8 + $0x1e0] sm:$0xff] }
 0x6d1   : > { %2987 = vst [vmem:[%s4020_s8 + $0xc8] sm:$0xff] %v2891_v27  ;;  %v2894_v61 = vadd.f32 %v2592_v5, %v2380_v9 }
 0x6d2   : > { %2989 = vst [vmem:[%s4020_s8 + $0xd8] sm:$0xff] %v2893_v37  ;;  %v2413_v37 = vld [vmem:[%s4020_s8 + $0x1e8] sm:$0xff] }
 0x6d3   : > { %2990 = vst [vmem:[%s4020_s8 + $0xe0] sm:$0xff] %v2894_v61  ;;  %v2415_v61 = vld [vmem:[%s4020_s8 + $0x1f8] sm:$0xff] }
 0x6d4   : > { %3447 = vmatmul.mubr.msk.bf16.gmra.mrb[172].mxu1 %vm1109_vm0, %v5333_v41  ;;  %v2388_v41 = vld [vmem:[%s4020_s8 + $0x120] sm:$0xff] }
 0x6d5   : > { %v2596_v29 = vpop.f32.mrb[84].mxu0 }
 0x6d6   : > { %v2896_v17 = vadd.f32 %v2596_v29, %v2382_v45  ;;  %v2598_v35 = vpop.f32.mrb[85].mxu0  ;;  %v2416_v29 = vld [vmem:[%s4020_s8 + $0x200] sm:$0xff] }
 0x6d7   : > { %v2897_v33 = vadd.f32 %v2598_v35, %v2383_v55  ;;  %v2600_v59 = vpop.f32.mrb[86].mxu0 }
 0x6d8   : > { %2992 = vst [vmem:[%s4020_s8 + $0xf0] sm:$0xff] %v2896_v17  ;;  %v2899_v34 = vadd.f32 %v2600_v59, %v2385_v26  ;;  %v2602_v62 = vpop.f32.mrb[87].mxu0  ;;  %v2418_v59 = vld [vmem:[%s4020_s8 + $0x210] sm:$0xff] }
 0x6d9   : > { %2993 = vst [vmem:[%s4020_s8 + $0xf8] sm:$0xff] %v2897_v33  ;;  %v2900_v11 = vadd.f32 %v2602_v62, %v2386_v0 }
 0x6da   : > { %2995 = vst [vmem:[%s4020_s8 + $0x108] sm:$0xff] %v2899_v34  ;;  %v2419_v34 = vld [vmem:[%s4020_s8 + $0x218] sm:$0xff] }
 0x6db   : > { %2996 = vst [vmem:[%s4020_s8 + $0x110] sm:$0xff] %v2900_v11  ;;  %v2421_v11 = vld [vmem:[%s4020_s8 + $0x228] sm:$0xff] }
 0x6dd   : > { %v2606_v20 = vpop.f32.mrb[88].mxu0 }
 0x6de   : > { %v2902_v7 = vadd.f32 %v2606_v20, %v2388_v41  ;;  %v2608_v15 = vpop.f32.mrb[89].mxu0  ;;  %v2422_v20 = vld [vmem:[%s4020_s8 + $0x230] sm:$0xff] }
 0x6df   : > { %v2903_v50 = vadd.f32 %v2608_v15, %v2389_v38  ;;  %v2610_v12 = vpop.f32.mrb[90].mxu0 }
 0x6e0   : > { %2998 = vst [vmem:[%s4020_s8 + $0x120] sm:$0xff] %v2902_v7  ;;  %v2905_v4 = vadd.f32 %v2610_v12, %v2391_v52  ;;  %v2612_v63 = vpop.f32.mrb[91].mxu0  ;;  %v2424_v12 = vld [vmem:[%s4020_s8 + $0x240] sm:$0xff] }
 0x6e1   : > { %2999 = vst [vmem:[%s4020_s8 + $0x128] sm:$0xff] %v2903_v50  ;;  %v2906_v25 = vadd.f32 %v2612_v63, %v2392_v40 }
 0x6e2   : > { %3001 = vst [vmem:[%s4020_s8 + $0x138] sm:$0xff] %v2905_v4  ;;  %v2425_v4 = vld [vmem:[%s4020_s8 + $0x248] sm:$0xff] }
 0x6e3   : > { %3002 = vst [vmem:[%s4020_s8 + $0x140] sm:$0xff] %v2906_v25  ;;  %v2427_v25 = vld [vmem:[%s4020_s8 + $0x258] sm:$0xff] }
 0x6e5   : > { %v2616_v2 = vpop.f32.mrb[92].mxu0 }
 0x6e6   : > { %v2908_v32 = vadd.f32 %v2616_v2, %v2394_v49  ;;  %v2618_v47 = vpop.f32.mrb[93].mxu0  ;;  %v2428_v2 = vld [vmem:[%s4020_s8 + $0x260] sm:$0xff] }
 0x6e7   : > { %v2909_v57 = vadd.f32 %v2618_v47, %v2395_v30  ;;  %v2620_v58 = vpop.f32.mrb[94].mxu0 }
 0x6e8   : > { %3004 = vst [vmem:[%s4020_s8 + $0x150] sm:$0xff] %v2908_v32  ;;  %v2911_v24 = vadd.f32 %v2620_v58, %v2397_v18  ;;  %v2622_v60 = vpop.f32.mrb[95].mxu0  ;;  %v2430_v58 = vld [vmem:[%s4020_s8 + $0x270] sm:$0xff] }
 0x6e9   : > { %3005 = vst [vmem:[%s4020_s8 + $0x158] sm:$0xff] %v2909_v57  ;;  %v2912_v53 = vadd.f32 %v2622_v60, %v2398_v28 }
 0x6ea   : > { %3007 = vst [vmem:[%s4020_s8 + $0x168] sm:$0xff] %v2911_v24  ;;  %v2431_v24 = vld [vmem:[%s4020_s8 + $0x278] sm:$0xff] }
 0x6eb   : > { %3008 = vst [vmem:[%s4020_s8 + $0x170] sm:$0xff] %v2912_v53  ;;  %v2433_v53 = vld [vmem:[%s4020_s8 + $0x288] sm:$0xff] }
 0x6ed   : > { %v2626_v13 = vpop.f32.mrb[96].mxu0 }
 0x6ee   : > { %v2914_v22 = vadd.f32 %v2626_v13, %v2400_v3  ;;  %v2628_v19 = vpop.f32.mrb[97].mxu0  ;;  %v2434_v13 = vld [vmem:[%s4020_s8 + $0x290] sm:$0xff] }
 0x6ef   : > { %v2915_v10 = vadd.f32 %v2628_v19, %v2401_v36  ;;  %v2630_v54 = vpop.f32.mrb[98].mxu0 }
 0x6f0   : > { %3010 = vst [vmem:[%s4020_s8 + $0x180] sm:$0xff] %v2914_v22  ;;  %v2917_v56 = vadd.f32 %v2630_v54, %v2403_v21  ;;  %v2632_v51 = vpop.f32.mrb[99].mxu0  ;;  %v2436_v54 = vld [vmem:[%s4020_s8 + $0x2a0] sm:$0xff] }
 0x6f1   : > { %3011 = vst [vmem:[%s4020_s8 + $0x188] sm:$0xff] %v2915_v10  ;;  %v2918_v31 = vadd.f32 %v2632_v51, %v2404_v6 }
 0x6f2   : > { %3013 = vst [vmem:[%s4020_s8 + $0x198] sm:$0xff] %v2917_v56  ;;  %v2437_v56 = vld [vmem:[%s4020_s8 + $0x2a8] sm:$0xff] }
 0x6f3   : > { %3014 = vst [vmem:[%s4020_s8 + $0x1a0] sm:$0xff] %v2918_v31  ;;  %v2439_v31 = vld [vmem:[%s4020_s8 + $0x2b8] sm:$0xff] }
 0x6f5   : > { %v2636_v42 = vpop.f32.mrb[100].mxu0 }
 0x6f6   : > { %v2920_v46 = vadd.f32 %v2636_v42, %v2406_v48  ;;  %v2638_v43 = vpop.f32.mrb[101].mxu0  ;;  %v2440_v42 = vld [vmem:[%s4020_s8 + $0x2c0] sm:$0xff] }
 0x6f7   : > { %v2921_v1 = vadd.f32 %v2638_v43, %v2407_v44  ;;  %v2640_v23 = vpop.f32.mrb[102].mxu0 }
 0x6f8   : > { %3016 = vst [vmem:[%s4020_s8 + $0x1b0] sm:$0xff] %v2920_v46  ;;  %v2923_v39 = vadd.f32 %v2640_v23, %v2409_v14  ;;  %v2642_v9 = vpop.f32.mrb[103].mxu0  ;;  %v2442_v23 = vld [vmem:[%s4020_s8 + $0x2d0] sm:$0xff] }
 0x6f9   : > { %3017 = vst [vmem:[%s4020_s8 + $0x1b8] sm:$0xff] %v2921_v1  ;;  %v2924_v27 = vadd.f32 %v2642_v9, %v2410_v16 }
 0x6fa   : > { %3019 = vst [vmem:[%s4020_s8 + $0x1c8] sm:$0xff] %v2923_v39  ;;  %v2443_v39 = vld [vmem:[%s4020_s8 + $0x2d8] sm:$0xff] }
 0x6fb   : > { %3020 = vst [vmem:[%s4020_s8 + $0x1d0] sm:$0xff] %v2924_v27  ;;  %v2445_v27 = vld [vmem:[%s4020_s8 + $0x2e8] sm:$0xff] }
 0x6fd   : > { %v2646_v5 = vpop.f32.mrb[104].mxu0 }
 0x6fe   : > { %v2926_v45 = vadd.f32 %v2646_v5, %v2412_v8  ;;  %v2648_v55 = vpop.f32.mrb[105].mxu0  ;;  %v2446_v5 = vld [vmem:[%s4020_s8 + $0x2f0] sm:$0xff] }
 0x6ff   : > { %v2927_v26 = vadd.f32 %v2648_v55, %v2413_v37  ;;  %v2650_v17 = vpop.f32.mrb[106].mxu0 }
 0x700   : > { %3022 = vst [vmem:[%s4020_s8 + $0x1e0] sm:$0xff] %v2926_v45  ;;  %v2929_v35 = vadd.f32 %v2650_v17, %v2415_v61  ;;  %v2652_v0 = vpop.f32.mrb[107].mxu0  ;;  %v2360_v17 = vld [vmem:[%s4020_s8 + $0x40] sm:$0xff] }
 0x701   : > { %3023 = vst [vmem:[%s4020_s8 + $0x1e8] sm:$0xff] %v2927_v26  ;;  %v2930_v33 = vadd.f32 %v2652_v0, %v2416_v29 }
 0x702   : > { %3025 = vst [vmem:[%s4020_s8 + $0x1f8] sm:$0xff] %v2929_v35  ;;  %v2354_v35 = vld [vmem:[%s4020_s8 + $0x10] sm:$0xff] }
 0x703   : > { %3026 = vst [vmem:[%s4020_s8 + $0x200] sm:$0xff] %v2930_v33  ;;  %v2363_v33 = vld [vmem:[%s4020_s8 + $0x58] sm:$0xff] }
 0x705   : > { %v2656_v62 = vpop.f32.mrb[108].mxu0 }
 0x706   : > { %v2932_v41 = vadd.f32 %v2656_v62, %v2418_v59  ;;  %v2658_v38 = vpop.f32.mrb[109].mxu0  ;;  %v2357_v62 = vld [vmem:[%s4020_s8 + $0x28] sm:$0xff] }
 0x707   : > { %v2933_v52 = vadd.f32 %v2658_v38, %v2419_v34  ;;  %v2660_v7 = vpop.f32.mrb[110].mxu0 }
 0x708   : > { %3028 = vst [vmem:[%s4020_s8 + $0x210] sm:$0xff] %v2932_v41  ;;  %v2935_v15 = vadd.f32 %v2660_v7, %v2421_v11  ;;  %v2662_v40 = vpop.f32.mrb[111].mxu0  ;;  %v2372_v7 = vld [vmem:[%s4020_s8 + $0xa0] sm:$0xff] }
 0x709   : > { %3029 = vst [vmem:[%s4020_s8 + $0x218] sm:$0xff] %v2933_v52  ;;  %v2936_v50 = vadd.f32 %v2662_v40, %v2422_v20 }
 0x70a   : > { %3031 = vst [vmem:[%s4020_s8 + $0x228] sm:$0xff] %v2935_v15  ;;  %v2366_v15 = vld [vmem:[%s4020_s8 + $0x70] sm:$0xff] }
 0x70b   : > { %3032 = vst [vmem:[%s4020_s8 + $0x230] sm:$0xff] %v2936_v50  ;;  %v2375_v50 = vld [vmem:[%s4020_s8 + $0xb8] sm:$0xff] }
 0x74e   : > { %v2666_v63 = vpop.f32.mrb[128].mxu1 }
 0x74f   : > { %v2938_v49 = vadd.f32 %v2666_v63, %v2424_v12  ;;  %v2668_v30 = vpop.f32.mrb[129].mxu1  ;;  %v2369_v63 = vld [vmem:[%s4020_s8 + $0x88] sm:$0xff] }
 0x750   : > { %v2939_v18 = vadd.f32 %v2668_v30, %v2425_v4  ;;  %v2670_v32 = vpop.f32.mrb[130].mxu1 }
 0x751   : > { %3034 = vst [vmem:[%s4020_s8 + $0x240] sm:$0xff] %v2938_v49  ;;  %v2941_v47 = vadd.f32 %v2670_v32, %v2427_v25  ;;  %v2672_v28 = vpop.f32.mrb[131].mxu1  ;;  %v2384_v32 = vld [vmem:[%s4020_s8 + $0x100] sm:$0xff] }
 0x752   : > { %3035 = vst [vmem:[%s4020_s8 + $0x248] sm:$0xff] %v2939_v18  ;;  %v2942_v57 = vadd.f32 %v2672_v28, %v2428_v2 }
 0x753   : > { %3037 = vst [vmem:[%s4020_s8 + $0x258] sm:$0xff] %v2941_v47  ;;  %v2378_v47 = vld [vmem:[%s4020_s8 + $0xd0] sm:$0xff] }
 0x754   : > { %3038 = vst [vmem:[%s4020_s8 + $0x260] sm:$0xff] %v2942_v57  ;;  %v2387_v57 = vld [vmem:[%s4020_s8 + $0x118] sm:$0xff] }
 0x757   : > { %v2676_v60 = vpop.f32.mrb[132].mxu1 }
 0x758   : > { %v2944_v3 = vadd.f32 %v2676_v60, %v2430_v58  ;;  %v2678_v36 = vpop.f32.mrb[133].mxu1  ;;  %v2381_v60 = vld [vmem:[%s4020_s8 + $0xe8] sm:$0xff] }
 0x759   : > { %v2945_v21 = vadd.f32 %v2678_v36, %v2431_v24  ;;  %v2680_v22 = vpop.f32.mrb[134].mxu1 }
 0x75a   : > { %3040 = vst [vmem:[%s4020_s8 + $0x270] sm:$0xff] %v2944_v3  ;;  %v2947_v19 = vadd.f32 %v2680_v22, %v2433_v53  ;;  %v2682_v6 = vpop.f32.mrb[135].mxu1  ;;  %v2396_v22 = vld [vmem:[%s4020_s8 + $0x160] sm:$0xff] }
 0x75b   : > { %3041 = vst [vmem:[%s4020_s8 + $0x278] sm:$0xff] %v2945_v21  ;;  %v2948_v10 = vadd.f32 %v2682_v6, %v2434_v13 }
 0x75c   : > { %3043 = vst [vmem:[%s4020_s8 + $0x288] sm:$0xff] %v2947_v19  ;;  %v2390_v19 = vld [vmem:[%s4020_s8 + $0x130] sm:$0xff] }
 0x75d   : > { %3044 = vst [vmem:[%s4020_s8 + $0x290] sm:$0xff] %v2948_v10  ;;  %v2399_v10 = vld [vmem:[%s4020_s8 + $0x178] sm:$0xff] }
 0x75f   : > { %v2686_v51 = vpop.f32.mrb[136].mxu1 }
 0x760   : > { %v2950_v48 = vadd.f32 %v2686_v51, %v2436_v54  ;;  %v2688_v44 = vpop.f32.mrb[137].mxu1  ;;  %v2393_v51 = vld [vmem:[%s4020_s8 + $0x148] sm:$0xff] }
 0x761   : > { %v2951_v14 = vadd.f32 %v2688_v44, %v2437_v56  ;;  %v2690_v46 = vpop.f32.mrb[138].mxu1 }
 0x762   : > { %3046 = vst [vmem:[%s4020_s8 + $0x2a0] sm:$0xff] %v2950_v48  ;;  %v2953_v43 = vadd.f32 %v2690_v46, %v2439_v31  ;;  %v2692_v16 = vpop.f32.mrb[139].mxu1  ;;  %v2408_v46 = vld [vmem:[%s4020_s8 + $0x1c0] sm:$0xff] }
 0x763   : > { %3047 = vst [vmem:[%s4020_s8 + $0x2a8] sm:$0xff] %v2951_v14  ;;  %v2954_v1 = vadd.f32 %v2692_v16, %v2440_v42 }
 0x764   : > { %3049 = vst [vmem:[%s4020_s8 + $0x2b8] sm:$0xff] %v2953_v43  ;;  %v2402_v43 = vld [vmem:[%s4020_s8 + $0x190] sm:$0xff] }
 0x765   : > { %3050 = vst [vmem:[%s4020_s8 + $0x2c0] sm:$0xff] %v2954_v1  ;;  %v2411_v1 = vld [vmem:[%s4020_s8 + $0x1d8] sm:$0xff] }
 0x767   : > { %v2696_v9 = vpop.f32.mrb[140].mxu1 }
 0x768   : > { %v2956_v8 = vadd.f32 %v2696_v9, %v2442_v23  ;;  %v2698_v37 = vpop.f32.mrb[141].mxu1  ;;  %v2405_v9 = vld [vmem:[%s4020_s8 + $0x1a8] sm:$0xff] }
 0x769   : > { %v2957_v61 = vadd.f32 %v2698_v37, %v2443_v39  ;;  %v2700_v45 = vpop.f32.mrb[142].mxu1 }
 0x76a   : > { %3052 = vst [vmem:[%s4020_s8 + $0x2d0] sm:$0xff] %v2956_v8  ;;  %v2959_v55 = vadd.f32 %v2700_v45, %v2445_v27  ;;  %v2702_v29 = vpop.f32.mrb[143].mxu1  ;;  %v2420_v45 = vld [vmem:[%s4020_s8 + $0x220] sm:$0xff] }
 0x76b   : > { %3053 = vst [vmem:[%s4020_s8 + $0x2d8] sm:$0xff] %v2957_v61  ;;  %v2960_v26 = vadd.f32 %v2702_v29, %v2446_v5 }
 0x76c   : > { %3055 = vst [vmem:[%s4020_s8 + $0x2e8] sm:$0xff] %v2959_v55  ;;  %v2414_v55 = vld [vmem:[%s4020_s8 + $0x1f0] sm:$0xff] }
 0x76d   : > { %3056 = vst [vmem:[%s4020_s8 + $0x2f0] sm:$0xff] %v2960_v26  ;;  %v2423_v26 = vld [vmem:[%s4020_s8 + $0x238] sm:$0xff] }
 0x76f   : > { %v3420_v0 = vpop.f32.mrb[144].mxu1 }
 0x770   : > { %v2874_v59 = vadd.f32 %v3420_v0, %v2360_v17  ;;  %v2739_v34 = vpop.f32.mrb[145].mxu1  ;;  %v2417_v0 = vld [vmem:[%s4020_s8 + $0x208] sm:$0xff] }
 0x771   : > { %v2868_v11 = vadd.f32 %v2739_v34, %v2354_v35  ;;  %v3421_v41 = vpop.f32.mrb[146].mxu1 }
 0x772   : > { %2970 = vst [vmem:[%s4020_s8 + $0x40] sm:$0xff] %v2874_v59  ;;  %v2877_v38 = vadd.f32 %v3421_v41, %v2363_v33  ;;  %v2742_v20 = vpop.f32.mrb[147].mxu1  ;;  %v2432_v41 = vld [vmem:[%s4020_s8 + $0x280] sm:$0xff] }
 0x773   : > { %2964 = vst [vmem:[%s4020_s8 + $0x10] sm:$0xff] %v2868_v11  ;;  %v2871_v52 = vadd.f32 %v2742_v20, %v2357_v62 }
 0x774   : > { %2973 = vst [vmem:[%s4020_s8 + $0x58] sm:$0xff] %v2877_v38  ;;  %v2426_v38 = vld [vmem:[%s4020_s8 + $0x250] sm:$0xff] }
 0x775   : > { %2967 = vst [vmem:[%s4020_s8 + $0x28] sm:$0xff] %v2871_v52  ;;  %v2435_v52 = vld [vmem:[%s4020_s8 + $0x298] sm:$0xff] }
 0x777   : > { %v3424_v40 = vpop.f32.mrb[148].mxu1 }
 0x778   : > { %v2886_v12 = vadd.f32 %v3424_v40, %v2372_v7  ;;  %v2755_v4 = vpop.f32.mrb[149].mxu1  ;;  %v2429_v40 = vld [vmem:[%s4020_s8 + $0x268] sm:$0xff] }
 0x779   : > { %v2880_v25 = vadd.f32 %v2755_v4, %v2366_v15  ;;  %v3425_v49 = vpop.f32.mrb[150].mxu1 }
 0x77a   : > { %2982 = vst [vmem:[%s4020_s8 + $0xa0] sm:$0xff] %v2886_v12  ;;  %v2889_v30 = vadd.f32 %v3425_v49, %v2375_v50  ;;  %v2758_v2 = vpop.f32.mrb[151].mxu1  ;;  %v2444_v49 = vld [vmem:[%s4020_s8 + $0x2e0] sm:$0xff] }
 0x77b   : > { %2976 = vst [vmem:[%s4020_s8 + $0x70] sm:$0xff] %v2880_v25  ;;  %v2883_v18 = vadd.f32 %v2758_v2, %v2369_v63 }
 0x77c   : > { %2985 = vst [vmem:[%s4020_s8 + $0xb8] sm:$0xff] %v2889_v30  ;;  %v2438_v30 = vld [vmem:[%s4020_s8 + $0x2b0] sm:$0xff] }
 0x77d   : > { %2979 = vst [vmem:[%s4020_s8 + $0x88] sm:$0xff] %v2883_v18  ;;  %v2447_v18 = vld [vmem:[%s4020_s8 + $0x2f8] sm:$0xff] }
 0x77f   : > { %v3428_v28 = vpop.f32.mrb[152].mxu1 }
 0x780   : > { %v2898_v58 = vadd.f32 %v3428_v28, %v2384_v32  ;;  %v2771_v24 = vpop.f32.mrb[153].mxu1  ;;  %v2441_v28 = vld [vmem:[%s4020_s8 + $0x2c8] sm:$0xff] }
 0x781   : > { %v2892_v53 = vadd.f32 %v2771_v24, %v2378_v47  ;;  %v3429_v3 = vpop.f32.mrb[154].mxu1 }
 0x782   : > { %2994 = vst [vmem:[%s4020_s8 + $0x100] sm:$0xff] %v2898_v58  ;;  %v2901_v36 = vadd.f32 %v3429_v3, %v2387_v57  ;;  %v2774_v13 = vpop.f32.mrb[155].mxu1 }
 0x783   : > { %2988 = vst [vmem:[%s4020_s8 + $0xd0] sm:$0xff] %v2892_v53  ;;  %v2895_v21 = vadd.f32 %v2774_v13, %v2381_v60 }
 0x784   : > { %2997 = vst [vmem:[%s4020_s8 + $0x118] sm:$0xff] %v2901_v36 }
 0x785   : > { %2991 = vst [vmem:[%s4020_s8 + $0xe8] sm:$0xff] %v2895_v21 }
 0x787   : > { %v3432_v6 = vpop.f32.mrb[156].mxu1 }
 0x788   : > { %v2910_v54 = vadd.f32 %v3432_v6, %v2396_v22  ;;  %v2787_v56 = vpop.f32.mrb[157].mxu1 }
 0x789   : > { %v2904_v31 = vadd.f32 %v2787_v56, %v2390_v19  ;;  %v3433_v48 = vpop.f32.mrb[158].mxu1 }
 0x78a   : > { %3006 = vst [vmem:[%s4020_s8 + $0x160] sm:$0xff] %v2910_v54  ;;  %v2913_v44 = vadd.f32 %v3433_v48, %v2399_v10  ;;  %v2790_v42 = vpop.f32.mrb[159].mxu1 }
 0x78b   : > { %3000 = vst [vmem:[%s4020_s8 + $0x130] sm:$0xff] %v2904_v31  ;;  %v2907_v14 = vadd.f32 %v2790_v42, %v2393_v51 }
 0x78c   : > { %3009 = vst [vmem:[%s4020_s8 + $0x178] sm:$0xff] %v2913_v44 }
 0x78d   : > { %3003 = vst [vmem:[%s4020_s8 + $0x148] sm:$0xff] %v2907_v14 }
 0x78f   : > { %v3436_v16 = vpop.f32.mrb[160].mxu1 }
 0x790   : > { %v2922_v23 = vadd.f32 %v3436_v16, %v2408_v46  ;;  %v2803_v39 = vpop.f32.mrb[161].mxu1 }
 0x791   : > { %v2916_v27 = vadd.f32 %v2803_v39, %v2402_v43  ;;  %v3437_v8 = vpop.f32.mrb[162].mxu1 }
 0x792   : > { %3018 = vst [vmem:[%s4020_s8 + $0x1c0] sm:$0xff] %v2922_v23  ;;  %v2925_v37 = vadd.f32 %v3437_v8, %v2411_v1  ;;  %v2806_v5 = vpop.f32.mrb[163].mxu1 }
 0x793   : > { %3012 = vst [vmem:[%s4020_s8 + $0x190] sm:$0xff] %v2916_v27  ;;  %v2919_v61 = vadd.f32 %v2806_v5, %v2405_v9 }
 0x794   : > { %3021 = vst [vmem:[%s4020_s8 + $0x1d8] sm:$0xff] %v2925_v37 }
 0x795   : > { %3015 = vst [vmem:[%s4020_s8 + $0x1a8] sm:$0xff] %v2919_v61 }
 0x797   : > { %v3440_v29 = vpop.f32.mrb[164].mxu1 }
 0x798   : > { %v2934_v17 = vadd.f32 %v3440_v29, %v2420_v45  ;;  %v2819_v35 = vpop.f32.mrb[165].mxu1 }
 0x799   : > { %v2928_v33 = vadd.f32 %v2819_v35, %v2414_v55  ;;  %v3441_v59 = vpop.f32.mrb[166].mxu1 }
 0x79a   : > { %3030 = vst [vmem:[%s4020_s8 + $0x220] sm:$0xff] %v2934_v17  ;;  %v2937_v34 = vadd.f32 %v3441_v59, %v2423_v26  ;;  %v2822_v62 = vpop.f32.mrb[167].mxu1 }
 0x79b   : > { %3024 = vst [vmem:[%s4020_s8 + $0x1f0] sm:$0xff] %v2928_v33  ;;  %v2931_v11 = vadd.f32 %v2822_v62, %v2417_v0 }
 0x79c   : > { %3033 = vst [vmem:[%s4020_s8 + $0x238] sm:$0xff] %v2937_v34 }
 0x79d   : > { %3027 = vst [vmem:[%s4020_s8 + $0x208] sm:$0xff] %v2931_v11 }
 0x79f   : > { %v3444_v20 = vpop.f32.mrb[168].mxu1 }
 0x7a0   : > { %v2946_v7 = vadd.f32 %v3444_v20, %v2432_v41  ;;  %v2835_v15 = vpop.f32.mrb[169].mxu1 }
 0x7a1   : > { %v2940_v50 = vadd.f32 %v2835_v15, %v2426_v38  ;;  %v3445_v12 = vpop.f32.mrb[170].mxu1 }
 0x7a2   : > { %3042 = vst [vmem:[%s4020_s8 + $0x280] sm:$0xff] %v2946_v7  ;;  %v2949_v4 = vadd.f32 %v3445_v12, %v2435_v52  ;;  %v2838_v63 = vpop.f32.mrb[171].mxu1 }
 0x7a3   : > { %3036 = vst [vmem:[%s4020_s8 + $0x250] sm:$0xff] %v2940_v50  ;;  %v2943_v25 = vadd.f32 %v2838_v63, %v2429_v40 }
 0x7a4   : > { %3045 = vst [vmem:[%s4020_s8 + $0x298] sm:$0xff] %v2949_v4 }
 0x7a5   : > { %3039 = vst [vmem:[%s4020_s8 + $0x268] sm:$0xff] %v2943_v25 }
 0x7a7   : > { %v3448_v2 = vpop.f32.mrb[172].mxu1 }
 0x7a8   : > { %v2958_v32 = vadd.f32 %v3448_v2, %v2444_v49  ;;  %v2851_v47 = vpop.f32.mrb[173].mxu1 }
 0x7a9   : > { %v2952_v57 = vadd.f32 %v2851_v47, %v2438_v30  ;;  %v3449_v58 = vpop.f32.mrb[174].mxu1 }
 0x7aa   : > { %3054 = vst [vmem:[%s4020_s8 + $0x2e0] sm:$0xff] %v2958_v32  ;;  %v2961_v24 = vadd.f32 %v3449_v58, %v2447_v18  ;;  %v2854_v60 = vpop.f32.mrb[175].mxu1 }
 0x7ab   : > { %3048 = vst [vmem:[%s4020_s8 + $0x2b0] sm:$0xff] %v2952_v57  ;;  %v2955_v53 = vadd.f32 %v2854_v60, %v2441_v28 }
 0x7ac   : > { %3057 = vst [vmem:[%s4020_s8 + $0x2f8] sm:$0xff] %v2961_v24 }
 0x7ad   : > { %3051 = vst [vmem:[%s4020_s8 + $0x2c8] sm:$0xff] %v2955_v53 }
 0x7ae   : > { %3815 = shalt.err (!%p3812_p10)
}
 0x7af   : > { %s3816_s24 = scalar_lea.hbm %s5563_s7, 12288  ;;  %s3820_s8 = scalar_lea.hbm %s5628_s4, 24576 }
 0x7b0   : > { %p3817_p11 = scmp.ne.s32.totalorder %s5563_s7, %s3816_s24  ;;  %p3821_p0 = scmp.lt.u32.totalorder %s5563_s7, %s5628_s4 }
 0x7b1   : > { %p3822_p1 = scmp.lt.u32.totalorder %s3820_s8, %s3816_s24  ;;  %p3824_p4 = scmp.lt.u32.totalorder %s3816_s24, %s5563_s7 }
 0x7b2   : > { %p3818_p12 = pnand %p3817_p11, %p3977_p3 }
 0x7b3   : > { %p3823_p2 = por %p3822_p1, %p3821_p0 }
 0x7b4   : > { %p3819_p13 = pneg %p3818_p12 }
 0x7b5   : > { %p3825_p5 = por %p3824_p4, %p3823_p2 }
 0x7b7   : > { %p3826_p6 = pnand %p3825_p5, %p3819_p13 }
 0x7b9   : > { %3829 = shalt.err (!%p3826_p6)
}
 0x7ba   : > { %s3901_s18 = smov 384   ;;  %s3902_s21 = smov 24  }
 0x7bb   : > { %3535 = dma.vmem_to_hbm [thread:$0]  (%p3977_p3), %s5565_s25, 12288, %s5563_s7, %s5572_s11, %s3901_s18, %s3901_s18, %s3902_s21  }
 0x7bc PF: > { %p3541_p7 = scmp.ge.s32.totalorder %s3896_s22, 2  ;;  %s3087_s26 = sand.u32 1, %s3868_s15  }
 0x7bd   : > { %s3088_s6 = scalar_lea.sflag [#allocation3], %s3087_s26 }
 0x7be   : > { %p3538_p8 = pnand %p3541_p7, %p3987_p9 }
 0x7c0   : > { %3863 = dma.done.wait (!%p3538_p8), %s3088_s6, 12288  }
 0x7c1   : > { %3865 = vsyncadd (!%p3538_p8), %s3088_s6, 4294955008  ;;  %s17_s22 = sadd.s32 1, %s3896_s22   ;;  %s5694_s19 = sld [smem:[#allocation5_spill]] }
 0x7c2   : > { %p14_p10 = scmp.ge.s32.totalorder %s17_s22, 14   ;;  %s5695_s27 = sld [smem:[#allocation6_spill]] }
 0x7c3   : > { %s5696_s21 = sld [smem:[#allocation7_spill]]  ;;  %s5697_s15 = smov %s3872_s16 }
 0x7c4   : > { %s5698_s16 = smov %s3876_s17  ;;  %s5699_s17 = smov %s3995_s5 }
 0x7c5   : > { %s5700_s18 = smov %s3888_s20  ;;  %16 = sbr.rel (!%p14_p10) target bundleno = 5 (0x5), region = 81 }
 0x7c8   : > { %s5701_s20 = smov %s5695_s27 }
 0x7cc   :  { %3093 = vsyncpa [#allocation3], 1 }
 0x7cd   :  { %3095 = vsyncpa [#allocation3 + $0x1], 1 }

</bundles_post_ra>
